<compile_context>
chip_gen: v7x
topology: tpu7x:2x2x1
jax: 0.10.0
libtpu: 0.0.40
codegen_flags: <defaults>
</compile_context>

<pallas_src>
import functools

import jax
import jax.numpy as jnp
from jax.experimental import pallas as pl
from jax.experimental.pallas import tpu as pltpu


# ----------------------------------------------------------------------------
# Fused kernel: input embedding (grid step 0) + one encoder layer per grid step.
# The grid axis iterates over layers; h stays resident in the output block.
# ----------------------------------------------------------------------------
def action_encoder_kernel(
    ng_ref, wr_ref, br_ref, wl_ref, bl_ref,                   # embedding inputs
    wq_ref, bq_ref, wk_ref, bk_ref, wv_ref, bv_ref,           # attention (layer l)
    wo_ref, bo_ref,
    w1_ref, b1_ref, w2_ref, b2_ref,                           # FFN (layer l)
    g1_ref, be1_ref, g2_ref, be2_ref,                         # BatchNorm (layer l)
    o_ref,                                                    # resident h / output
    *, n_remain, nb_heads):
  cdt = jnp.bfloat16
  eps_bn = 1e-5

  # --- grid step 0: Normalization_layer + input_emb / input_emb_for_last ----
  @pl.when(pl.program_id(0) == 0)
  def _embed():
    ng = ng_ref[...]                                          # (B, k+1, dim_in) f32
    # TODO(synk): Normalization_layer is not defined in the reference source;
    # assumed per-group (over the k+1 nodes) zero-mean / unit-variance scaling.
    mu = jnp.mean(ng, axis=1, keepdims=True)
    var = jnp.mean(jnp.square(ng - mu), axis=1, keepdims=True)
    scaled = (ng - mu) * jax.lax.rsqrt(var + 1e-6)

    sr = scaled[:, :n_remain, :]                              # remaining candidates
    sl = scaled[:, n_remain:, :]                              # last visited node
    wr = wr_ref[...]                                          # (dim_in, E) f32
    wl = wl_ref[...]
    dim_in = wr.shape[0]
    # dim_in == 2: broadcast FMAs on the VPU instead of a depth-2 MXU matmul.
    emb_r = sr[:, :, 0:1] * wr[0:1, :] + br_ref[...]
    emb_l = sl[:, :, 0:1] * wl[0:1, :] + bl_ref[...]
    for d in range(1, dim_in):
      emb_r = emb_r + sr[:, :, d:d + 1] * wr[d:d + 1, :]
      emb_l = emb_l + sl[:, :, d:d + 1] * wl[d:d + 1, :]
    # Disjoint sublane-slice stores (rows [0,k) -> input_emb, row k -> _for_last).
    o_ref[:, :n_remain, :] = emb_r
    o_ref[:, n_remain:, :] = emb_l

  # --- one transformer encoder layer (MHA + BN + FFN + BN) ------------------
  h = o_ref[...]                                              # (B, S, D) f32, resident
  B, S, D = h.shape
  H = nb_heads
  hd = D // H

  hb = h.astype(cdt)
  # 1/sqrt(hd) is pre-folded into wq / bq by the wrapper (prepare_params).
  q = jnp.einsum("bsd,de->bse", hb, wq_ref[0],
                 preferred_element_type=jnp.float32) + bq_ref[0]
  kx = jnp.einsum("bsd,de->bse", hb, wk_ref[0],
                  preferred_element_type=jnp.float32) + bk_ref[0]
  v = jnp.einsum("bsd,de->bse", hb, wv_ref[0],
                 preferred_element_type=jnp.float32) + bv_ref[0]

  # Merge heads into the leading batch axis -> single batched einsums for all
  # heads (3-D, one batch dim: the well-supported Mosaic batched-matmul form).
  def split_heads(x):                                         # (B,S,D) -> (H*B,S,hd)
    if H == 1:
      return x
    return jnp.concatenate([x[:, :, i * hd:(i + 1) * hd] for i in range(H)],
                           axis=0)

  qh = split_heads(q).astype(cdt)
  kh = split_heads(kx).astype(cdt)
  vh = split_heads(v).astype(cdt)

  s = jnp.einsum("bqd,bkd->bqk", qh, kh,
                 preferred_element_type=jnp.float32)          # (H*B, S, S)
  s_max = jnp.max(s, axis=-1, keepdims=True)
  e = jnp.exp(s - s_max)
  p_att = e * pl.reciprocal(jnp.sum(e, axis=-1, keepdims=True), approx=True)
  oh = jnp.einsum("bqk,bkd->bqd", p_att.astype(cdt), vh,
                  preferred_element_type=jnp.float32)         # (H*B, S, hd)

  # Re-assemble heads on the lane axis -> one full-depth (D x D) output proj.
  if H == 1:
    o_cat = oh
  else:
    o_cat = jnp.concatenate([oh[i * B:(i + 1) * B] for i in range(H)], axis=-1)
  att = jnp.einsum("bsd,de->bse", o_cat.astype(cdt), wo_ref[0],
                   preferred_element_type=jnp.float32) + bo_ref[0]

  h1 = h + att                                                # residual

  # BatchNorm1d #1: training-mode batch statistics over (B, S) per channel.
  # TODO(synk): running-mean/var buffers (eval mode) are not modeled.
  m1 = jnp.mean(h1, axis=(0, 1), keepdims=True)
  v1 = jnp.mean(jnp.square(h1 - m1), axis=(0, 1), keepdims=True)
  h1 = (h1 - m1) * jax.lax.rsqrt(v1 + eps_bn) * g1_ref[0] + be1_ref[0]

  # Feed-forward.
  f = jnp.einsum("bsd,df->bsf", h1.astype(cdt), w1_ref[0],
                 preferred_element_type=jnp.float32) + b1_ref[0]
  f = jnp.maximum(f, 0.0)
  f2 = jnp.einsum("bsf,fd->bsd", f.astype(cdt), w2_ref[0],
                  preferred_element_type=jnp.float32) + b2_ref[0]
  h2 = h1 + f2                                                # residual

  # BatchNorm1d #2.
  m2 = jnp.mean(h2, axis=(0, 1), keepdims=True)
  v2 = jnp.mean(jnp.square(h2 - m2), axis=(0, 1), keepdims=True)
  o_ref[...] = (h2 - m2) * jax.lax.rsqrt(v2 + eps_bn) * g2_ref[0] + be2_ref[0]


# ----------------------------------------------------------------------------
# Wrapper
# ----------------------------------------------------------------------------
def action_encoder_tsp_forward(p, graph, idx, last_visited_node, nb_heads):
  """Forward pass of action_encoder_tsp (mask=None path) via one pallas_call."""
  # TODO(synk): the optional `mask` branch of the reference (overwrite masked
  # nodes with the last visited node + attention mask) is not implemented.
  bsz, n_remain = idx.shape
  del bsz
  node_group = jnp.take_along_axis(graph, idx[..., None], axis=1)  # gather = glue
  node_group = jnp.concatenate([node_group, last_visited_node], axis=1)
  B, S, dim_in = node_group.shape
  L, _, dim_emb = p["wq"].shape
  dim_ff = p["w1"].shape[-1]
  assert dim_emb % nb_heads == 0

  kernel = functools.partial(action_encoder_kernel,
                             n_remain=n_remain, nb_heads=nb_heads)

  c3 = lambda l: (0, 0, 0)          # constant blocks (embedding inputs, h/out)
  c2 = lambda l: (0, 0)
  per_layer = lambda l: (l, 0, 0)   # stream layer l's weights each grid step

  in_specs = [
      pl.BlockSpec((B, S, dim_in), c3),                  # node_group
      pl.BlockSpec((dim_in, dim_emb), c2),               # w_remain
      pl.BlockSpec((1, dim_emb), c2),                    # b_remain
      pl.BlockSpec((dim_in, dim_emb), c2),               # w_last
      pl.BlockSpec((1, dim_emb), c2),                    # b_last
      pl.BlockSpec((1, dim_emb, dim_emb), per_layer),    # wq (scale folded, bf16)
      pl.BlockSpec((1, 1, dim_emb), per_layer),          # bq
      pl.BlockSpec((1, dim_emb, dim_emb), per_layer),    # wk
      pl.BlockSpec((1, 1, dim_emb), per_layer),          # bk
      pl.BlockSpec((1, dim_emb, dim_emb), per_layer),    # wv
      pl.BlockSpec((1, 1, dim_emb), per_layer),          # bv
      pl.BlockSpec((1, dim_emb, dim_emb), per_layer),    # wo
      pl.BlockSpec((1, 1, dim_emb), per_layer),          # bo
      pl.BlockSpec((1, dim_emb, dim_ff), per_layer),     # w1
      pl.BlockSpec((1, 1, dim_ff), per_layer),           # b1
      pl.BlockSpec((1, dim_ff, dim_emb), per_layer),     # w2
      pl.BlockSpec((1, 1, dim_emb), per_layer),          # b2
      pl.BlockSpec((1, 1, dim_emb), per_layer),          # g1
      pl.BlockSpec((1, 1, dim_emb), per_layer),          # be1
      pl.BlockSpec((1, 1, dim_emb), per_layer),          # g2
      pl.BlockSpec((1, 1, dim_emb), per_layer),          # be2
  ]
  # Output block index never changes -> h stays resident in VMEM across the
  # whole layer sweep and is written back to HBM once at the end.
  out_specs = pl.BlockSpec((B, S, dim_emb), c3)

  return pl.pallas_call(
      kernel,
      out_shape=jax.ShapeDtypeStruct((B, S, dim_emb), jnp.float32),
      grid_spec=pltpu.PrefetchScalarGridSpec(
          num_scalar_prefetch=0,
          grid=(L,),
          in_specs=in_specs,
          out_specs=out_specs),
      compiler_params=pltpu.CompilerParams(
          dimension_semantics=("arbitrary",),    # layer axis is sequential
          vmem_limit_bytes=32 * 1024 * 1024),
  )(node_group,
    p["w_remain"], p["b_remain"], p["w_last"], p["b_last"],
    p["wq"], p["bq"], p["wk"], p["bk"], p["wv"], p["bv"], p["wo"], p["bo"],
    p["w1"], p["b1"], p["w2"], p["b2"],
    p["g1"], p["be1"], p["g2"], p["be2"])


# ----------------------------------------------------------------------------
# Parameters: PyTorch-style init + kernel-ready packing
# ----------------------------------------------------------------------------
def linear_params(key, fan_in, fan_out):
  kw, kb = jax.random.split(key)
  bound = 1.0 / (fan_in ** 0.5)
  w = jax.random.uniform(kw, (fan_in, fan_out), jnp.float32, -bound, bound)
  b = jax.random.uniform(kb, (1, fan_out), jnp.float32, -bound, bound)
  return w, b


def init_params(key, dim_in, dim_emb, dim_ff, nb_layers):
  """PyTorch-equivalent f32 per-layer parameters (nn.Linear uniform init)."""
  keys = jax.random.split(key, 2 + nb_layers)
  w_r, b_r = linear_params(keys[0], dim_in, dim_emb)
  w_l, b_l = linear_params(keys[1], dim_in, dim_emb)
  layers = []
  for li in range(nb_layers):
    lk = jax.random.split(keys[2 + li], 6)
    wq, bq = linear_params(lk[0], dim_emb, dim_emb)
    wk, bk = linear_params(lk[1], dim_emb, dim_emb)
    wv, bv = linear_params(lk[2], dim_emb, dim_emb)
    wo, bo = linear_params(lk[3], dim_emb, dim_emb)
    w1, b1 = linear_params(lk[4], dim_emb, dim_ff)
    w2, b2 = linear_params(lk[5], dim_ff, dim_emb)
    layers.append(dict(
        wq=wq, bq=bq, wk=wk, bk=bk, wv=wv, bv=bv, wo=wo, bo=bo,
        w1=w1, b1=b1, w2=w2, b2=b2,
        g1=jnp.ones((1, dim_emb), jnp.float32),
        be1=jnp.zeros((1, dim_emb), jnp.float32),
        g2=jnp.ones((1, dim_emb), jnp.float32),
        be2=jnp.zeros((1, dim_emb), jnp.float32)))
  return dict(w_remain=w_r, b_remain=b_r, w_last=w_l, b_last=b_l, layers=layers)


def prepare_params(params, nb_heads):
  """Stack per-layer weights on a leading L axis, fold the 1/sqrt(head_dim)
  attention scale into W_q / b_q, and cast MXU operands to bf16."""
  layers = params["layers"]
  dim_emb = layers[0]["wq"].shape[0]
  scale = 1.0 / ((dim_emb // nb_heads) ** 0.5)
  stack = lambda name: jnp.stack([lp[name] for lp in layers], axis=0)
  bf16 = lambda x: x.astype(jnp.bfloat16)
  return dict(
      w_remain=params["w_remain"], b_remain=params["b_remain"],
      w_last=params["w_last"], b_last=params["b_last"],
      wq=bf16(stack("wq") * scale), bq=stack("bq") * scale,
      wk=bf16(stack("wk")), bk=stack("bk"),
      wv=bf16(stack("wv")), bv=stack("bv"),
      wo=bf16(stack("wo")), bo=stack("bo"),
      w1=bf16(stack("w1")), b1=stack("b1"),
      w2=bf16(stack("w2")), b2=stack("b2"),
      g1=stack("g1"), be1=stack("be1"), g2=stack("g2"), be2=stack("be2"))


# ----------------------------------------------------------------------------
if __name__ == "__main__":
  # Small, module-consistent shapes; dim_emb / dim_ff lane-dense (x128).
  bsz, nb_nodes, dim_input_nodes = 2, 16, 2
  k = 8                                  # candidate nodes -> seq = k + 1 = 9
  dim_emb, dim_ff = 128, 256
  nb_layers_encoder, nb_heads = 2, 2

  root = jax.random.PRNGKey(0)
  k_graph, k_idx, k_last, k_par = jax.random.split(root, 4)

  graph = jax.random.uniform(k_graph, (bsz, nb_nodes, dim_input_nodes),
                             jnp.float32)
  idx = jax.random.randint(k_idx, (bsz, k), 0, nb_nodes, jnp.int32)
  last_visited_node = jax.random.uniform(k_last, (bsz, 1, dim_input_nodes),
                                         jnp.float32)

  params = init_params(k_par, dim_input_nodes, dim_emb, dim_ff,
                       nb_layers_encoder)
  prepped = prepare_params(params, nb_heads)

  fwd = jax.jit(action_encoder_tsp_forward, static_argnums=(4,))
  out = fwd(prepped, graph, idx, last_visited_node, nb_heads)
  out = jax.block_until_ready(out)

  assert out.shape == (bsz, k + 1, dim_emb), out.shape
  assert bool(jnp.all(jnp.isfinite(out)))
  print("KERNEL_OK")
</pallas_src>

<mosaic_0001>
module attributes {stable_mosaic.version = 11 : i64} {
  func.func @action_encoder_kernel(%arg0: i32, %arg1: memref<2x9x2xf32, #tpu.memory_space<vmem>>, %arg2: memref<2x128xf32, #tpu.memory_space<vmem>>, %arg3: memref<1x128xf32, #tpu.memory_space<vmem>>, %arg4: memref<2x128xf32, #tpu.memory_space<vmem>>, %arg5: memref<1x128xf32, #tpu.memory_space<vmem>>, %arg6: memref<1x128x128xbf16, #tpu.memory_space<vmem>>, %arg7: memref<1x1x128xf32, #tpu.memory_space<vmem>>, %arg8: memref<1x128x128xbf16, #tpu.memory_space<vmem>>, %arg9: memref<1x1x128xf32, #tpu.memory_space<vmem>>, %arg10: memref<1x128x128xbf16, #tpu.memory_space<vmem>>, %arg11: memref<1x1x128xf32, #tpu.memory_space<vmem>>, %arg12: memref<1x128x128xbf16, #tpu.memory_space<vmem>>, %arg13: memref<1x1x128xf32, #tpu.memory_space<vmem>>, %arg14: memref<1x128x256xbf16, #tpu.memory_space<vmem>>, %arg15: memref<1x1x256xf32, #tpu.memory_space<vmem>>, %arg16: memref<1x256x128xbf16, #tpu.memory_space<vmem>>, %arg17: memref<1x1x128xf32, #tpu.memory_space<vmem>>, %arg18: memref<1x1x128xf32, #tpu.memory_space<vmem>>, %arg19: memref<1x1x128xf32, #tpu.memory_space<vmem>>, %arg20: memref<1x1x128xf32, #tpu.memory_space<vmem>>, %arg21: memref<1x1x128xf32, #tpu.memory_space<vmem>>, %arg22: memref<2x9x128xf32, #tpu.memory_space<vmem>>) attributes {dimension_semantics = [#tpu.dimension_semantics<arbitrary>], iteration_bounds = array<i64: 2>, scalar_prefetch = 0 : i64, scratch_operands = 0 : i64, tpu.core_type = #tpu.core_type<tc>, window_params = [{pipeline_mode = #tpu.pipeline_mode<synchronous>, transform_indices = @transform_0, window_bounds = array<i64: 2, 9, 2>}, {pipeline_mode = #tpu.pipeline_mode<synchronous>, transform_indices = @transform_1, window_bounds = array<i64: 2, 128>}, {pipeline_mode = #tpu.pipeline_mode<synchronous>, transform_indices = @transform_2, window_bounds = array<i64: 1, 128>}, {pipeline_mode = #tpu.pipeline_mode<synchronous>, transform_indices = @transform_3, window_bounds = array<i64: 2, 128>}, {pipeline_mode = #tpu.pipeline_mode<synchronous>, transform_indices = @transform_4, window_bounds = array<i64: 1, 128>}, {transform_indices = @transform_5, window_bounds = array<i64: 1, 128, 128>}, {transform_indices = @transform_6, window_bounds = array<i64: 1, 1, 128>}, {transform_indices = @transform_7, window_bounds = array<i64: 1, 128, 128>}, {transform_indices = @transform_8, window_bounds = array<i64: 1, 1, 128>}, {transform_indices = @transform_9, window_bounds = array<i64: 1, 128, 128>}, {transform_indices = @transform_10, window_bounds = array<i64: 1, 1, 128>}, {transform_indices = @transform_11, window_bounds = array<i64: 1, 128, 128>}, {transform_indices = @transform_12, window_bounds = array<i64: 1, 1, 128>}, {transform_indices = @transform_13, window_bounds = array<i64: 1, 128, 256>}, {transform_indices = @transform_14, window_bounds = array<i64: 1, 1, 256>}, {transform_indices = @transform_15, window_bounds = array<i64: 1, 256, 128>}, {transform_indices = @transform_16, window_bounds = array<i64: 1, 1, 128>}, {transform_indices = @transform_17, window_bounds = array<i64: 1, 1, 128>}, {transform_indices = @transform_18, window_bounds = array<i64: 1, 1, 128>}, {transform_indices = @transform_19, window_bounds = array<i64: 1, 1, 128>}, {transform_indices = @transform_20, window_bounds = array<i64: 1, 1, 128>}, {pipeline_mode = #tpu.pipeline_mode<synchronous>, transform_indices = @transform_21, window_bounds = array<i64: 2, 9, 128>}]} {
    %c0_i32 = arith.constant 0 : i32
    %0 = arith.cmpi eq, %arg0, %c0_i32 : i32
    %1 = arith.extui %0 : i1 to i32
    %c0_i32_0 = arith.constant 0 : i32
    %2 = arith.cmpi ne, %1, %c0_i32_0 : i32
    scf.if %2 {
      %c0_74 = arith.constant 0 : index
      %c0_75 = arith.constant 0 : index
      %c0_76 = arith.constant 0 : index
      %145 = vector.load %arg1[%c0_74, %c0_75, %c0_76] : memref<2x9x2xf32, #tpu.memory_space<vmem>>, vector<2x9x2xf32>
      %cst_77 = arith.constant dense<0.000000e+00> : vector<2x2xf32>
      %146 = vector.multi_reduction <add>, %145, %cst_77 [1] : vector<2x9x2xf32> to vector<2x2xf32>
      %147 = vector.shape_cast %146 : vector<2x2xf32> to vector<2x1x2xf32>
      %cst_78 = arith.constant 9.000000e+00 : f32
      %148 = vector.broadcast %cst_78 : f32 to vector<2x1x2xf32>
      %149 = arith.divf %147, %148 : vector<2x1x2xf32>
      %150 = vector.broadcast %149 : vector<2x1x2xf32> to vector<2x9x2xf32>
      %151 = arith.subf %145, %150 : vector<2x9x2xf32>
      %152 = arith.mulf %151, %151 : vector<2x9x2xf32>
      %cst_79 = arith.constant dense<0.000000e+00> : vector<2x2xf32>
      %153 = vector.multi_reduction <add>, %152, %cst_79 [1] : vector<2x9x2xf32> to vector<2x2xf32>
      %154 = vector.shape_cast %153 : vector<2x2xf32> to vector<2x1x2xf32>
      %cst_80 = arith.constant 9.000000e+00 : f32
      %155 = vector.broadcast %cst_80 : f32 to vector<2x1x2xf32>
      %156 = arith.divf %154, %155 : vector<2x1x2xf32>
      %157 = vector.broadcast %149 : vector<2x1x2xf32> to vector<2x9x2xf32>
      %158 = arith.subf %145, %157 : vector<2x9x2xf32>
      %cst_81 = arith.constant 9.99999997E-7 : f32
      %159 = vector.broadcast %cst_81 : f32 to vector<2x1x2xf32>
      %160 = arith.addf %156, %159 : vector<2x1x2xf32>
      %161 = math.rsqrt %160 : vector<2x1x2xf32>
      %162 = vector.broadcast %161 : vector<2x1x2xf32> to vector<2x9x2xf32>
      %163 = arith.mulf %158, %162 : vector<2x9x2xf32>
      %164 = vector.extract_strided_slice %163 {offsets = [0, 0, 0], sizes = [2, 8, 2], strides = [1, 1, 1]} : vector<2x9x2xf32> to vector<2x8x2xf32>
      %165 = vector.extract_strided_slice %163 {offsets = [0, 8, 0], sizes = [2, 1, 2], strides = [1, 1, 1]} : vector<2x9x2xf32> to vector<2x1x2xf32>
      %c0_82 = arith.constant 0 : index
      %c0_83 = arith.constant 0 : index
      %166 = vector.load %arg2[%c0_82, %c0_83] : memref<2x128xf32, #tpu.memory_space<vmem>>, vector<2x128xf32>
      %c0_84 = arith.constant 0 : index
      %c0_85 = arith.constant 0 : index
      %167 = vector.load %arg4[%c0_84, %c0_85] : memref<2x128xf32, #tpu.memory_space<vmem>>, vector<2x128xf32>
      %168 = vector.extract_strided_slice %164 {offsets = [0, 0, 0], sizes = [2, 8, 1], strides = [1, 1, 1]} : vector<2x8x2xf32> to vector<2x8x1xf32>
      %169 = vector.extract_strided_slice %166 {offsets = [0, 0], sizes = [1, 128], strides = [1, 1]} : vector<2x128xf32> to vector<1x128xf32>
      %170 = vector.shape_cast %169 : vector<1x128xf32> to vector<1x1x128xf32>
      %171 = vector.broadcast %168 : vector<2x8x1xf32> to vector<2x8x128xf32>
      %172 = vector.broadcast %170 : vector<1x1x128xf32> to vector<2x8x128xf32>
      %173 = arith.mulf %171, %172 : vector<2x8x128xf32>
      %c0_86 = arith.constant 0 : index
      %c0_87 = arith.constant 0 : index
      %174 = vector.load %arg3[%c0_86, %c0_87] : memref<1x128xf32, #tpu.memory_space<vmem>>, vector<1x128xf32>
      %175 = vector.shape_cast %174 : vector<1x128xf32> to vector<1x1x128xf32>
      %176 = vector.broadcast %175 : vector<1x1x128xf32> to vector<2x8x128xf32>
      %177 = arith.addf %173, %176 : vector<2x8x128xf32>
      %178 = vector.extract_strided_slice %165 {offsets = [0, 0, 0], sizes = [2, 1, 1], strides = [1, 1, 1]} : vector<2x1x2xf32> to vector<2x1x1xf32>
      %179 = vector.extract_strided_slice %167 {offsets = [0, 0], sizes = [1, 128], strides = [1, 1]} : vector<2x128xf32> to vector<1x128xf32>
      %180 = vector.shape_cast %179 : vector<1x128xf32> to vector<1x1x128xf32>
      %181 = vector.broadcast %178 : vector<2x1x1xf32> to vector<2x1x128xf32>
      %182 = vector.broadcast %180 : vector<1x1x128xf32> to vector<2x1x128xf32>
      %183 = arith.mulf %181, %182 : vector<2x1x128xf32>
      %c0_88 = arith.constant 0 : index
      %c0_89 = arith.constant 0 : index
      %184 = vector.load %arg5[%c0_88, %c0_89] : memref<1x128xf32, #tpu.memory_space<vmem>>, vector<1x128xf32>
      %185 = vector.shape_cast %184 : vector<1x128xf32> to vector<1x1x128xf32>
      %186 = vector.broadcast %185 : vector<1x1x128xf32> to vector<2x1x128xf32>
      %187 = arith.addf %183, %186 : vector<2x1x128xf32>
      %188 = vector.extract_strided_slice %164 {offsets = [0, 0, 1], sizes = [2, 8, 1], strides = [1, 1, 1]} : vector<2x8x2xf32> to vector<2x8x1xf32>
      %189 = vector.extract_strided_slice %166 {offsets = [1, 0], sizes = [1, 128], strides = [1, 1]} : vector<2x128xf32> to vector<1x128xf32>
      %190 = vector.shape_cast %189 : vector<1x128xf32> to vector<1x1x128xf32>
      %191 = vector.broadcast %188 : vector<2x8x1xf32> to vector<2x8x128xf32>
      %192 = vector.broadcast %190 : vector<1x1x128xf32> to vector<2x8x128xf32>
      %193 = arith.mulf %191, %192 : vector<2x8x128xf32>
      %194 = arith.addf %177, %193 : vector<2x8x128xf32>
      %195 = vector.extract_strided_slice %165 {offsets = [0, 0, 1], sizes = [2, 1, 1], strides = [1, 1, 1]} : vector<2x1x2xf32> to vector<2x1x1xf32>
      %196 = vector.extract_strided_slice %167 {offsets = [1, 0], sizes = [1, 128], strides = [1, 1]} : vector<2x128xf32> to vector<1x128xf32>
      %197 = vector.shape_cast %196 : vector<1x128xf32> to vector<1x1x128xf32>
      %198 = vector.broadcast %195 : vector<2x1x1xf32> to vector<2x1x128xf32>
      %199 = vector.broadcast %197 : vector<1x1x128xf32> to vector<2x1x128xf32>
      %200 = arith.mulf %198, %199 : vector<2x1x128xf32>
      %201 = arith.addf %187, %200 : vector<2x1x128xf32>
      %c0_90 = arith.constant 0 : index
      %c0_91 = arith.constant 0 : index
      %c0_92 = arith.constant 0 : index
      %202 = vector.load %arg22[%c0_90, %c0_91, %c0_92] : memref<2x9x128xf32, #tpu.memory_space<vmem>>, vector<2x8x128xf32>
      tpu.vector_store %arg22[%c0_90, %c0_91, %c0_92], %194 {strides = array<i32>} : memref<2x9x128xf32, #tpu.memory_space<vmem>>, vector<2x8x128xf32>,
      %c0_93 = arith.constant 0 : index
      %c8 = arith.constant 8 : index
      %c0_94 = arith.constant 0 : index
      %203 = vector.load %arg22[%c0_93, %c8, %c0_94] : memref<2x9x128xf32, #tpu.memory_space<vmem>>, vector<2x1x128xf32>
      tpu.vector_store %arg22[%c0_93, %c8, %c0_94], %201 {strides = array<i32>} : memref<2x9x128xf32, #tpu.memory_space<vmem>>, vector<2x1x128xf32>,
    } else {
    }
    %c0 = arith.constant 0 : index
    %c0_1 = arith.constant 0 : index
    %c0_2 = arith.constant 0 : index
    %3 = vector.load %arg22[%c0, %c0_1, %c0_2] : memref<2x9x128xf32, #tpu.memory_space<vmem>>, vector<2x9x128xf32>
    %4 = arith.truncf %3 : vector<2x9x128xf32> to vector<2x9x128xbf16>
    %c0_3 = arith.constant 0 : index
    %c0_4 = arith.constant 0 : index
    %c0_5 = arith.constant 0 : index
    %5 = vector.load %arg6[%c0_3, %c0_4, %c0_5] : memref<1x128x128xbf16, #tpu.memory_space<vmem>>, vector<1x128x128xbf16>
    %6 = vector.shape_cast %5 : vector<1x128x128xbf16> to vector<128x128xbf16>
    "tpu.trace_start"() <{level = 10 : i32, message = "bsd,de->bse"}> : () -> ()
    %cst = arith.constant dense<0.000000e+00> : vector<2x9x128xf32>
    %7 = tpu.matmul %4, %6, %cst {dimension_numbers = #tpu.dot_dimension_numbers<[2], [0], [0, 1], [1], [0, 0, 0, 1, 1, 1], [], []>} : vector<2x9x128xbf16>, vector<128x128xbf16>, vector<2x9x128xf32> -> vector<2x9x128xf32>
    "tpu.trace_stop"() : () -> ()
    %c0_6 = arith.constant 0 : index
    %c0_7 = arith.constant 0 : index
    %c0_8 = arith.constant 0 : index
    %8 = vector.load %arg7[%c0_6, %c0_7, %c0_8] : memref<1x1x128xf32, #tpu.memory_space<vmem>>, vector<1x1x128xf32>
    %9 = vector.shape_cast %8 : vector<1x1x128xf32> to vector<1x128xf32>
    %10 = vector.shape_cast %9 : vector<1x128xf32> to vector<1x1x128xf32>
    %11 = vector.broadcast %10 : vector<1x1x128xf32> to vector<2x9x128xf32>
    %12 = arith.addf %7, %11 : vector<2x9x128xf32>
    %c0_9 = arith.constant 0 : index
    %c0_10 = arith.constant 0 : index
    %c0_11 = arith.constant 0 : index
    %13 = vector.load %arg8[%c0_9, %c0_10, %c0_11] : memref<1x128x128xbf16, #tpu.memory_space<vmem>>, vector<1x128x128xbf16>
    %14 = vector.shape_cast %13 : vector<1x128x128xbf16> to vector<128x128xbf16>
    "tpu.trace_start"() <{level = 10 : i32, message = "bsd,de->bse"}> : () -> ()
    %cst_12 = arith.constant dense<0.000000e+00> : vector<2x9x128xf32>
    %15 = tpu.matmul %4, %14, %cst_12 {dimension_numbers = #tpu.dot_dimension_numbers<[2], [0], [0, 1], [1], [0, 0, 0, 1, 1, 1], [], []>} : vector<2x9x128xbf16>, vector<128x128xbf16>, vector<2x9x128xf32> -> vector<2x9x128xf32>
    "tpu.trace_stop"() : () -> ()
    %c0_13 = arith.constant 0 : index
    %c0_14 = arith.constant 0 : index
    %c0_15 = arith.constant 0 : index
    %16 = vector.load %arg9[%c0_13, %c0_14, %c0_15] : memref<1x1x128xf32, #tpu.memory_space<vmem>>, vector<1x1x128xf32>
    %17 = vector.shape_cast %16 : vector<1x1x128xf32> to vector<1x128xf32>
    %18 = vector.shape_cast %17 : vector<1x128xf32> to vector<1x1x128xf32>
    %19 = vector.broadcast %18 : vector<1x1x128xf32> to vector<2x9x128xf32>
    %20 = arith.addf %15, %19 : vector<2x9x128xf32>
    %c0_16 = arith.constant 0 : index
    %c0_17 = arith.constant 0 : index
    %c0_18 = arith.constant 0 : index
    %21 = vector.load %arg10[%c0_16, %c0_17, %c0_18] : memref<1x128x128xbf16, #tpu.memory_space<vmem>>, vector<1x128x128xbf16>
    %22 = vector.shape_cast %21 : vector<1x128x128xbf16> to vector<128x128xbf16>
    "tpu.trace_start"() <{level = 10 : i32, message = "bsd,de->bse"}> : () -> ()
    %cst_19 = arith.constant dense<0.000000e+00> : vector<2x9x128xf32>
    %23 = tpu.matmul %4, %22, %cst_19 {dimension_numbers = #tpu.dot_dimension_numbers<[2], [0], [0, 1], [1], [0, 0, 0, 1, 1, 1], [], []>} : vector<2x9x128xbf16>, vector<128x128xbf16>, vector<2x9x128xf32> -> vector<2x9x128xf32>
    "tpu.trace_stop"() : () -> ()
    %c0_20 = arith.constant 0 : index
    %c0_21 = arith.constant 0 : index
    %c0_22 = arith.constant 0 : index
    %24 = vector.load %arg11[%c0_20, %c0_21, %c0_22] : memref<1x1x128xf32, #tpu.memory_space<vmem>>, vector<1x1x128xf32>
    %25 = vector.shape_cast %24 : vector<1x1x128xf32> to vector<1x128xf32>
    %26 = vector.shape_cast %25 : vector<1x128xf32> to vector<1x1x128xf32>
    %27 = vector.broadcast %26 : vector<1x1x128xf32> to vector<2x9x128xf32>
    %28 = arith.addf %23, %27 : vector<2x9x128xf32>
    %29 = vector.extract_strided_slice %12 {offsets = [0, 0, 0], sizes = [2, 9, 64], strides = [1, 1, 1]} : vector<2x9x128xf32> to vector<2x9x64xf32>
    %30 = vector.extract_strided_slice %12 {offsets = [0, 0, 64], sizes = [2, 9, 64], strides = [1, 1, 1]} : vector<2x9x128xf32> to vector<2x9x64xf32>
    %31 = tpu.concatenate %29, %30 in 0 : vector<2x9x64xf32>, vector<2x9x64xf32> -> vector<4x9x64xf32>
    %32 = arith.truncf %31 : vector<4x9x64xf32> to vector<4x9x64xbf16>
    %33 = vector.extract_strided_slice %20 {offsets = [0, 0, 0], sizes = [2, 9, 64], strides = [1, 1, 1]} : vector<2x9x128xf32> to vector<2x9x64xf32>
    %34 = vector.extract_strided_slice %20 {offsets = [0, 0, 64], sizes = [2, 9, 64], strides = [1, 1, 1]} : vector<2x9x128xf32> to vector<2x9x64xf32>
    %35 = tpu.concatenate %33, %34 in 0 : vector<2x9x64xf32>, vector<2x9x64xf32> -> vector<4x9x64xf32>
    %36 = arith.truncf %35 : vector<4x9x64xf32> to vector<4x9x64xbf16>
    %37 = vector.extract_strided_slice %28 {offsets = [0, 0, 0], sizes = [2, 9, 64], strides = [1, 1, 1]} : vector<2x9x128xf32> to vector<2x9x64xf32>
    %38 = vector.extract_strided_slice %28 {offsets = [0, 0, 64], sizes = [2, 9, 64], strides = [1, 1, 1]} : vector<2x9x128xf32> to vector<2x9x64xf32>
    %39 = tpu.concatenate %37, %38 in 0 : vector<2x9x64xf32>, vector<2x9x64xf32> -> vector<4x9x64xf32>
    %40 = arith.truncf %39 : vector<4x9x64xf32> to vector<4x9x64xbf16>
    "tpu.trace_start"() <{level = 10 : i32, message = "bqd,bkd->bqk"}> : () -> ()
    %cst_23 = arith.constant dense<0.000000e+00> : vector<4x9x9xf32>
    %41 = tpu.matmul %32, %36, %cst_23 {dimension_numbers = #tpu.dot_dimension_numbers<[2], [2], [1], [1], [0, 0, 0, 1, 1, 1], [0], [0]>} : vector<4x9x64xbf16>, vector<4x9x64xbf16>, vector<4x9x9xf32> -> vector<4x9x9xf32>
    "tpu.trace_stop"() : () -> ()
    %cst_24 = arith.constant dense<0xFF800000> : vector<4x9xf32>
    %42 = vector.multi_reduction <maximumf>, %41, %cst_24 [2] : vector<4x9x9xf32> to vector<4x9xf32>
    %43 = vector.shape_cast %42 : vector<4x9xf32> to vector<4x9x1xf32>
    %44 = vector.broadcast %43 : vector<4x9x1xf32> to vector<4x9x9xf32>
    %45 = arith.subf %41, %44 : vector<4x9x9xf32>
    %46 = math.exp %45 : vector<4x9x9xf32>
    %cst_25 = arith.constant dense<0.000000e+00> : vector<4x9xf32>
    %47 = vector.multi_reduction <add>, %46, %cst_25 [2] : vector<4x9x9xf32> to vector<4x9xf32>
    %48 = vector.shape_cast %47 : vector<4x9xf32> to vector<4x9x1xf32>
    %49 = tpu.reciprocal %48 {approx = true} : vector<4x9x1xf32> -> vector<4x9x1xf32>
    %50 = vector.broadcast %49 : vector<4x9x1xf32> to vector<4x9x9xf32>
    %51 = arith.mulf %46, %50 : vector<4x9x9xf32>
    %52 = arith.truncf %51 : vector<4x9x9xf32> to vector<4x9x9xbf16>
    "tpu.trace_start"() <{level = 10 : i32, message = "bqk,bkd->bqd"}> : () -> ()
    %cst_26 = arith.constant dense<0.000000e+00> : vector<4x9x64xf32>
    %53 = tpu.matmul %52, %40, %cst_26 {dimension_numbers = #tpu.dot_dimension_numbers<[2], [1], [1], [2], [0, 0, 0, 1, 1, 2], [0], [0]>} : vector<4x9x9xbf16>, vector<4x9x64xbf16>, vector<4x9x64xf32> -> vector<4x9x64xf32>
    "tpu.trace_stop"() : () -> ()
    %54 = vector.extract_strided_slice %53 {offsets = [0, 0, 0], sizes = [2, 9, 64], strides = [1, 1, 1]} : vector<4x9x64xf32> to vector<2x9x64xf32>
    %55 = vector.extract_strided_slice %53 {offsets = [2, 0, 0], sizes = [2, 9, 64], strides = [1, 1, 1]} : vector<4x9x64xf32> to vector<2x9x64xf32>
    %56 = tpu.concatenate %54, %55 in 2 : vector<2x9x64xf32>, vector<2x9x64xf32> -> vector<2x9x128xf32>
    %57 = arith.truncf %56 : vector<2x9x128xf32> to vector<2x9x128xbf16>
    %c0_27 = arith.constant 0 : index
    %c0_28 = arith.constant 0 : index
    %c0_29 = arith.constant 0 : index
    %58 = vector.load %arg12[%c0_27, %c0_28, %c0_29] : memref<1x128x128xbf16, #tpu.memory_space<vmem>>, vector<1x128x128xbf16>
    %59 = vector.shape_cast %58 : vector<1x128x128xbf16> to vector<128x128xbf16>
    "tpu.trace_start"() <{level = 10 : i32, message = "bsd,de->bse"}> : () -> ()
    %cst_30 = arith.constant dense<0.000000e+00> : vector<2x9x128xf32>
    %60 = tpu.matmul %57, %59, %cst_30 {dimension_numbers = #tpu.dot_dimension_numbers<[2], [0], [0, 1], [1], [0, 0, 0, 1, 1, 1], [], []>} : vector<2x9x128xbf16>, vector<128x128xbf16>, vector<2x9x128xf32> -> vector<2x9x128xf32>
    "tpu.trace_stop"() : () -> ()
    %c0_31 = arith.constant 0 : index
    %c0_32 = arith.constant 0 : index
    %c0_33 = arith.constant 0 : index
    %61 = vector.load %arg13[%c0_31, %c0_32, %c0_33] : memref<1x1x128xf32, #tpu.memory_space<vmem>>, vector<1x1x128xf32>
    %62 = vector.shape_cast %61 : vector<1x1x128xf32> to vector<1x128xf32>
    %63 = vector.shape_cast %62 : vector<1x128xf32> to vector<1x1x128xf32>
    %64 = vector.broadcast %63 : vector<1x1x128xf32> to vector<2x9x128xf32>
    %65 = arith.addf %60, %64 : vector<2x9x128xf32>
    %66 = arith.addf %3, %65 : vector<2x9x128xf32>
    %cst_34 = arith.constant dense<0.000000e+00> : vector<128xf32>
    %67 = vector.multi_reduction <add>, %66, %cst_34 [0, 1] : vector<2x9x128xf32> to vector<128xf32>
    %68 = vector.shape_cast %67 : vector<128xf32> to vector<1x1x128xf32>
    %cst_35 = arith.constant 1.800000e+01 : f32
    %69 = vector.broadcast %cst_35 : f32 to vector<1x1x128xf32>
    %70 = arith.divf %68, %69 : vector<1x1x128xf32>
    %71 = vector.broadcast %70 : vector<1x1x128xf32> to vector<2x9x128xf32>
    %72 = arith.subf %66, %71 : vector<2x9x128xf32>
    %73 = arith.mulf %72, %72 : vector<2x9x128xf32>
    %cst_36 = arith.constant dense<0.000000e+00> : vector<128xf32>
    %74 = vector.multi_reduction <add>, %73, %cst_36 [0, 1] : vector<2x9x128xf32> to vector<128xf32>
    %75 = vector.shape_cast %74 : vector<128xf32> to vector<1x1x128xf32>
    %cst_37 = arith.constant 1.800000e+01 : f32
    %76 = vector.broadcast %cst_37 : f32 to vector<1x1x128xf32>
    %77 = arith.divf %75, %76 : vector<1x1x128xf32>
    %78 = vector.broadcast %70 : vector<1x1x128xf32> to vector<2x9x128xf32>
    %79 = arith.subf %66, %78 : vector<2x9x128xf32>
    %cst_38 = arith.constant 9.99999974E-6 : f32
    %80 = vector.broadcast %cst_38 : f32 to vector<1x1x128xf32>
    %81 = arith.addf %77, %80 : vector<1x1x128xf32>
    %82 = math.rsqrt %81 : vector<1x1x128xf32>
    %83 = vector.broadcast %82 : vector<1x1x128xf32> to vector<2x9x128xf32>
    %84 = arith.mulf %79, %83 : vector<2x9x128xf32>
    %c0_39 = arith.constant 0 : index
    %c0_40 = arith.constant 0 : index
    %c0_41 = arith.constant 0 : index
    %85 = vector.load %arg18[%c0_39, %c0_40, %c0_41] : memref<1x1x128xf32, #tpu.memory_space<vmem>>, vector<1x1x128xf32>
    %86 = vector.shape_cast %85 : vector<1x1x128xf32> to vector<1x128xf32>
    %87 = vector.shape_cast %86 : vector<1x128xf32> to vector<1x1x128xf32>
    %88 = vector.broadcast %87 : vector<1x1x128xf32> to vector<2x9x128xf32>
    %89 = arith.mulf %84, %88 : vector<2x9x128xf32>
    %c0_42 = arith.constant 0 : index
    %c0_43 = arith.constant 0 : index
    %c0_44 = arith.constant 0 : index
    %90 = vector.load %arg19[%c0_42, %c0_43, %c0_44] : memref<1x1x128xf32, #tpu.memory_space<vmem>>, vector<1x1x128xf32>
    %91 = vector.shape_cast %90 : vector<1x1x128xf32> to vector<1x128xf32>
    %92 = vector.shape_cast %91 : vector<1x128xf32> to vector<1x1x128xf32>
    %93 = vector.broadcast %92 : vector<1x1x128xf32> to vector<2x9x128xf32>
    %94 = arith.addf %89, %93 : vector<2x9x128xf32>
    %95 = arith.truncf %94 : vector<2x9x128xf32> to vector<2x9x128xbf16>
    %c0_45 = arith.constant 0 : index
    %c0_46 = arith.constant 0 : index
    %c0_47 = arith.constant 0 : index
    %96 = vector.load %arg14[%c0_45, %c0_46, %c0_47] : memref<1x128x256xbf16, #tpu.memory_space<vmem>>, vector<1x128x256xbf16>
    %97 = vector.shape_cast %96 : vector<1x128x256xbf16> to vector<128x256xbf16>
    "tpu.trace_start"() <{level = 10 : i32, message = "bsd,df->bsf"}> : () -> ()
    %cst_48 = arith.constant dense<0.000000e+00> : vector<2x9x256xf32>
    %98 = tpu.matmul %95, %97, %cst_48 {dimension_numbers = #tpu.dot_dimension_numbers<[2], [0], [0, 1], [1], [0, 0, 0, 1, 1, 1], [], []>} : vector<2x9x128xbf16>, vector<128x256xbf16>, vector<2x9x256xf32> -> vector<2x9x256xf32>
    "tpu.trace_stop"() : () -> ()
    %c0_49 = arith.constant 0 : index
    %c0_50 = arith.constant 0 : index
    %c0_51 = arith.constant 0 : index
    %99 = vector.load %arg15[%c0_49, %c0_50, %c0_51] : memref<1x1x256xf32, #tpu.memory_space<vmem>>, vector<1x1x256xf32>
    %100 = vector.shape_cast %99 : vector<1x1x256xf32> to vector<1x256xf32>
    %101 = vector.shape_cast %100 : vector<1x256xf32> to vector<1x1x256xf32>
    %102 = vector.broadcast %101 : vector<1x1x256xf32> to vector<2x9x256xf32>
    %103 = arith.addf %98, %102 : vector<2x9x256xf32>
    %cst_52 = arith.constant 0.000000e+00 : f32
    %104 = vector.broadcast %cst_52 : f32 to vector<2x9x256xf32>
    %105 = arith.maximumf %103, %104 : vector<2x9x256xf32>
    %106 = arith.truncf %105 : vector<2x9x256xf32> to vector<2x9x256xbf16>
    %c0_53 = arith.constant 0 : index
    %c0_54 = arith.constant 0 : index
    %c0_55 = arith.constant 0 : index
    %107 = vector.load %arg16[%c0_53, %c0_54, %c0_55] : memref<1x256x128xbf16, #tpu.memory_space<vmem>>, vector<1x256x128xbf16>
    %108 = vector.shape_cast %107 : vector<1x256x128xbf16> to vector<256x128xbf16>
    "tpu.trace_start"() <{level = 10 : i32, message = "bsf,fd->bsd"}> : () -> ()
    %cst_56 = arith.constant dense<0.000000e+00> : vector<2x9x128xf32>
    %109 = tpu.matmul %106, %108, %cst_56 {dimension_numbers = #tpu.dot_dimension_numbers<[2], [0], [0, 1], [1], [0, 0, 0, 1, 1, 1], [], []>} : vector<2x9x256xbf16>, vector<256x128xbf16>, vector<2x9x128xf32> -> vector<2x9x128xf32>
    "tpu.trace_stop"() : () -> ()
    %c0_57 = arith.constant 0 : index
    %c0_58 = arith.constant 0 : index
    %c0_59 = arith.constant 0 : index
    %110 = vector.load %arg17[%c0_57, %c0_58, %c0_59] : memref<1x1x128xf32, #tpu.memory_space<vmem>>, vector<1x1x128xf32>
    %111 = vector.shape_cast %110 : vector<1x1x128xf32> to vector<1x128xf32>
    %112 = vector.shape_cast %111 : vector<1x128xf32> to vector<1x1x128xf32>
    %113 = vector.broadcast %112 : vector<1x1x128xf32> to vector<2x9x128xf32>
    %114 = arith.addf %109, %113 : vector<2x9x128xf32>
    %115 = arith.addf %94, %114 : vector<2x9x128xf32>
    %cst_60 = arith.constant dense<0.000000e+00> : vector<128xf32>
    %116 = vector.multi_reduction <add>, %115, %cst_60 [0, 1] : vector<2x9x128xf32> to vector<128xf32>
    %117 = vector.shape_cast %116 : vector<128xf32> to vector<1x1x128xf32>
    %cst_61 = arith.constant 1.800000e+01 : f32
    %118 = vector.broadcast %cst_61 : f32 to vector<1x1x128xf32>
    %119 = arith.divf %117, %118 : vector<1x1x128xf32>
    %120 = vector.broadcast %119 : vector<1x1x128xf32> to vector<2x9x128xf32>
    %121 = arith.subf %115, %120 : vector<2x9x128xf32>
    %122 = arith.mulf %121, %121 : vector<2x9x128xf32>
    %cst_62 = arith.constant dense<0.000000e+00> : vector<128xf32>
    %123 = vector.multi_reduction <add>, %122, %cst_62 [0, 1] : vector<2x9x128xf32> to vector<128xf32>
    %124 = vector.shape_cast %123 : vector<128xf32> to vector<1x1x128xf32>
    %cst_63 = arith.constant 1.800000e+01 : f32
    %125 = vector.broadcast %cst_63 : f32 to vector<1x1x128xf32>
    %126 = arith.divf %124, %125 : vector<1x1x128xf32>
    %127 = vector.broadcast %119 : vector<1x1x128xf32> to vector<2x9x128xf32>
    %128 = arith.subf %115, %127 : vector<2x9x128xf32>
    %cst_64 = arith.constant 9.99999974E-6 : f32
    %129 = vector.broadcast %cst_64 : f32 to vector<1x1x128xf32>
    %130 = arith.addf %126, %129 : vector<1x1x128xf32>
    %131 = math.rsqrt %130 : vector<1x1x128xf32>
    %132 = vector.broadcast %131 : vector<1x1x128xf32> to vector<2x9x128xf32>
    %133 = arith.mulf %128, %132 : vector<2x9x128xf32>
    %c0_65 = arith.constant 0 : index
    %c0_66 = arith.constant 0 : index
    %c0_67 = arith.constant 0 : index
    %134 = vector.load %arg20[%c0_65, %c0_66, %c0_67] : memref<1x1x128xf32, #tpu.memory_space<vmem>>, vector<1x1x128xf32>
    %135 = vector.shape_cast %134 : vector<1x1x128xf32> to vector<1x128xf32>
    %136 = vector.shape_cast %135 : vector<1x128xf32> to vector<1x1x128xf32>
    %137 = vector.broadcast %136 : vector<1x1x128xf32> to vector<2x9x128xf32>
    %138 = arith.mulf %133, %137 : vector<2x9x128xf32>
    %c0_68 = arith.constant 0 : index
    %c0_69 = arith.constant 0 : index
    %c0_70 = arith.constant 0 : index
    %139 = vector.load %arg21[%c0_68, %c0_69, %c0_70] : memref<1x1x128xf32, #tpu.memory_space<vmem>>, vector<1x1x128xf32>
    %140 = vector.shape_cast %139 : vector<1x1x128xf32> to vector<1x128xf32>
    %141 = vector.shape_cast %140 : vector<1x128xf32> to vector<1x1x128xf32>
    %142 = vector.broadcast %141 : vector<1x1x128xf32> to vector<2x9x128xf32>
    %143 = arith.addf %138, %142 : vector<2x9x128xf32>
    %c0_71 = arith.constant 0 : index
    %c0_72 = arith.constant 0 : index
    %c0_73 = arith.constant 0 : index
    %144 = vector.load %arg22[%c0_71, %c0_72, %c0_73] : memref<2x9x128xf32, #tpu.memory_space<vmem>>, vector<2x9x128xf32>
    tpu.vector_store %arg22[%c0_71, %c0_72, %c0_73], %143 {strides = array<i32>} : memref<2x9x128xf32, #tpu.memory_space<vmem>>, vector<2x9x128xf32>,
    return
  }
  func.func @transform_0(%arg0: i32) -> (i32, i32, i32) {
    %c0_i32 = arith.constant 0 : i32
    %c0_i32_0 = arith.constant 0 : i32
    %c0_i32_1 = arith.constant 0 : i32
    %c0_i32_2 = arith.constant 0 : i32
    return %c0_i32, %c0_i32_0, %c0_i32_1 : i32, i32, i32
  }
  func.func @transform_1(%arg0: i32) -> (i32, i32) {
    %c0_i32 = arith.constant 0 : i32
    %c0_i32_0 = arith.constant 0 : i32
    %c0_i32_1 = arith.constant 0 : i32
    return %c0_i32, %c0_i32_0 : i32, i32
  }
  func.func @transform_2(%arg0: i32) -> (i32, i32) {
    %c0_i32 = arith.constant 0 : i32
    %c0_i32_0 = arith.constant 0 : i32
    %c0_i32_1 = arith.constant 0 : i32
    return %c0_i32, %c0_i32_0 : i32, i32
  }
  func.func @transform_3(%arg0: i32) -> (i32, i32) {
    %c0_i32 = arith.constant 0 : i32
    %c0_i32_0 = arith.constant 0 : i32
    %c0_i32_1 = arith.constant 0 : i32
    return %c0_i32, %c0_i32_0 : i32, i32
  }
  func.func @transform_4(%arg0: i32) -> (i32, i32) {
    %c0_i32 = arith.constant 0 : i32
    %c0_i32_0 = arith.constant 0 : i32
    %c0_i32_1 = arith.constant 0 : i32
    return %c0_i32, %c0_i32_0 : i32, i32
  }
  func.func @transform_5(%arg0: i32) -> (i32, i32, i32) {
    %c0_i32 = arith.constant 0 : i32
    %c0_i32_0 = arith.constant 0 : i32
    %c0_i32_1 = arith.constant 0 : i32
    return %arg0, %c0_i32, %c0_i32_0 : i32, i32, i32
  }
  func.func @transform_6(%arg0: i32) -> (i32, i32, i32) {
    %c0_i32 = arith.constant 0 : i32
    %c0_i32_0 = arith.constant 0 : i32
    %c0_i32_1 = arith.constant 0 : i32
    return %arg0, %c0_i32, %c0_i32_0 : i32, i32, i32
  }
  func.func @transform_7(%arg0: i32) -> (i32, i32, i32) {
    %c0_i32 = arith.constant 0 : i32
    %c0_i32_0 = arith.constant 0 : i32
    %c0_i32_1 = arith.constant 0 : i32
    return %arg0, %c0_i32, %c0_i32_0 : i32, i32, i32
  }
  func.func @transform_8(%arg0: i32) -> (i32, i32, i32) {
    %c0_i32 = arith.constant 0 : i32
    %c0_i32_0 = arith.constant 0 : i32
    %c0_i32_1 = arith.constant 0 : i32
    return %arg0, %c0_i32, %c0_i32_0 : i32, i32, i32
  }
  func.func @transform_9(%arg0: i32) -> (i32, i32, i32) {
    %c0_i32 = arith.constant 0 : i32
    %c0_i32_0 = arith.constant 0 : i32
    %c0_i32_1 = arith.constant 0 : i32
    return %arg0, %c0_i32, %c0_i32_0 : i32, i32, i32
  }
  func.func @transform_10(%arg0: i32) -> (i32, i32, i32) {
    %c0_i32 = arith.constant 0 : i32
    %c0_i32_0 = arith.constant 0 : i32
    %c0_i32_1 = arith.constant 0 : i32
    return %arg0, %c0_i32, %c0_i32_0 : i32, i32, i32
  }
  func.func @transform_11(%arg0: i32) -> (i32, i32, i32) {
    %c0_i32 = arith.constant 0 : i32
    %c0_i32_0 = arith.constant 0 : i32
    %c0_i32_1 = arith.constant 0 : i32
    return %arg0, %c0_i32, %c0_i32_0 : i32, i32, i32
  }
  func.func @transform_12(%arg0: i32) -> (i32, i32, i32) {
    %c0_i32 = arith.constant 0 : i32
    %c0_i32_0 = arith.constant 0 : i32
    %c0_i32_1 = arith.constant 0 : i32
    return %arg0, %c0_i32, %c0_i32_0 : i32, i32, i32
  }
  func.func @transform_13(%arg0: i32) -> (i32, i32, i32) {
    %c0_i32 = arith.constant 0 : i32
    %c0_i32_0 = arith.constant 0 : i32
    %c0_i32_1 = arith.constant 0 : i32
    return %arg0, %c0_i32, %c0_i32_0 : i32, i32, i32
  }
  func.func @transform_14(%arg0: i32) -> (i32, i32, i32) {
    %c0_i32 = arith.constant 0 : i32
    %c0_i32_0 = arith.constant 0 : i32
    %c0_i32_1 = arith.constant 0 : i32
    return %arg0, %c0_i32, %c0_i32_0 : i32, i32, i32
  }
  func.func @transform_15(%arg0: i32) -> (i32, i32, i32) {
    %c0_i32 = arith.constant 0 : i32
    %c0_i32_0 = arith.constant 0 : i32
    %c0_i32_1 = arith.constant 0 : i32
    return %arg0, %c0_i32, %c0_i32_0 : i32, i32, i32
  }
  func.func @transform_16(%arg0: i32) -> (i32, i32, i32) {
    %c0_i32 = arith.constant 0 : i32
    %c0_i32_0 = arith.constant 0 : i32
    %c0_i32_1 = arith.constant 0 : i32
    return %arg0, %c0_i32, %c0_i32_0 : i32, i32, i32
  }
  func.func @transform_17(%arg0: i32) -> (i32, i32, i32) {
    %c0_i32 = arith.constant 0 : i32
    %c0_i32_0 = arith.constant 0 : i32
    %c0_i32_1 = arith.constant 0 : i32
    return %arg0, %c0_i32, %c0_i32_0 : i32, i32, i32
  }
  func.func @transform_18(%arg0: i32) -> (i32, i32, i32) {
    %c0_i32 = arith.constant 0 : i32
    %c0_i32_0 = arith.constant 0 : i32
    %c0_i32_1 = arith.constant 0 : i32
    return %arg0, %c0_i32, %c0_i32_0 : i32, i32, i32
  }
  func.func @transform_19(%arg0: i32) -> (i32, i32, i32) {
    %c0_i32 = arith.constant 0 : i32
    %c0_i32_0 = arith.constant 0 : i32
    %c0_i32_1 = arith.constant 0 : i32
    return %arg0, %c0_i32, %c0_i32_0 : i32, i32, i32
  }
  func.func @transform_20(%arg0: i32) -> (i32, i32, i32) {
    %c0_i32 = arith.constant 0 : i32
    %c0_i32_0 = arith.constant 0 : i32
    %c0_i32_1 = arith.constant 0 : i32
    return %arg0, %c0_i32, %c0_i32_0 : i32, i32, i32
  }
  func.func @transform_21(%arg0: i32) -> (i32, i32, i32) {
    %c0_i32 = arith.constant 0 : i32
    %c0_i32_0 = arith.constant 0 : i32
    %c0_i32_1 = arith.constant 0 : i32
    %c0_i32_2 = arith.constant 0 : i32
    return %c0_i32, %c0_i32_0, %c0_i32_1 : i32, i32, i32
  }
}

</mosaic_0001>

<bundles_post_ra>
// kernel: action_encoder_tsp_forward.1
= control target key start
LH: loop header
LB: loop body
LE: loop exit
PB: predicated region body
PF: predicated region fallthrough
CT: control target
= control target key end

     0   :  { %s9122_s0 = inlined_call_operand.vmem [shape: f32[2,9,2], index: 0, kind: input, shape index: {}]   ;;  %s9123_s1 = inlined_call_operand.vmem [shape: f32[2,128], index: 1, kind: input, shape index: {}]   ;;  %s9124_s2 = inlined_call_operand.vmem [shape: f32[1,128], index: 2, kind: input, shape index: {}]   ;;  %s9125_s3 = inlined_call_operand.vmem [shape: f32[2,128], index: 3, kind: input, shape index: {}]   ;;  %s9126_s4 = inlined_call_operand.vmem [shape: f32[1,128], index: 4, kind: input, shape index: {}]   ;;  %s9127_s5 = inlined_call_operand.hbm [shape: bf16[2,128,128], index: 5, kind: input, shape index: {}]   ;;  %s9128_s6 = inlined_call_operand.vmem [shape: f32[2,1,128], index: 6, kind: input, shape index: {}]   ;;  %s9129_s7 = inlined_call_operand.hbm [shape: bf16[2,128,128], index: 7, kind: input, shape index: {}]   ;;  %s9130_s8 = inlined_call_operand.vmem [shape: f32[2,1,128], index: 8, kind: input, shape index: {}]   ;;  %s9131_s9 = inlined_call_operand.hbm [shape: bf16[2,128,128], index: 9, kind: input, shape index: {}]   ;;  %s9132_s10 = inlined_call_operand.vmem [shape: f32[2,1,128], index: 10, kind: input, shape index: {}]   ;;  %s9133_s11 = inlined_call_operand.hbm [shape: bf16[2,128,128], index: 11, kind: input, shape index: {}]   ;;  %s9134_s12 = inlined_call_operand.vmem [shape: f32[2,1,128], index: 12, kind: input, shape index: {}]   ;;  %s9135_s13 = inlined_call_operand.vmem [shape: bf16[2,128,256], index: 13, kind: input, shape index: {}]   ;;  %s9136_s14 = inlined_call_operand.vmem [shape: f32[2,1,256], index: 14, kind: input, shape index: {}]   ;;  %s9137_s15 = inlined_call_operand.hbm [shape: bf16[2,256,128], index: 15, kind: input, shape index: {}]   ;;  %s9138_s16 = inlined_call_operand.vmem [shape: f32[2,1,128], index: 16, kind: input, shape index: {}]   ;;  %s9139_s17 = inlined_call_operand.vmem [shape: f32[2,1,128], index: 17, kind: input, shape index: {}]   ;;  %s9140_s18 = inlined_call_operand.vmem [shape: f32[2,1,128], index: 18, kind: input, shape index: {}]   ;;  %s9141_s19 = inlined_call_operand.vmem [shape: f32[2,1,128], index: 19, kind: input, shape index: {}]   ;;  %s9142_s20 = inlined_call_operand.vmem [shape: f32[2,1,128], index: 20, kind: input, shape index: {}]   ;;  %s9143_s21 = inlined_call_operand.vmem [shape: f32[2,9,128], index: 21, kind: output, shape index: {}]  }
   0x1   :  { %9161 = sst [smem:[#allocation19_spill]] %s9122_s0 }
   0x2   :  { %9162 = sst [smem:[#allocation20_spill]] %s9123_s1 }
   0x3   :  { %9163 = sst [smem:[#allocation21_spill]] %s9124_s2 }
   0x4   :  { %9164 = sst [smem:[#allocation22_spill]] %s9125_s3 }
   0x5   :  { %9165 = sst [smem:[#allocation23_spill]] %s9126_s4 }
   0x6   :  { %9166 = sst [smem:[#allocation24_spill]] %s9127_s5 }
   0x7   :  { %9167 = sst [smem:[#allocation25_spill]] %s9129_s7 }
   0x8   :  { %9168 = sst [smem:[#allocation26_spill]] %s9131_s9 }
   0x9   :  { %9169 = sst [smem:[#allocation27_spill]] %s9133_s11 }
   0xa   :  { %9170 = sst [smem:[#allocation28_spill]] %s9134_s12 }
   0xb   :  { %9171 = sst [smem:[#allocation29_spill]] %s9135_s13 }
   0xc   :  { %9172 = sst [smem:[#allocation30_spill]] %s9136_s14 }
   0xd   :  { %9173 = sst [smem:[#allocation31_spill]] %s9137_s15 }
   0xe   :  { %9174 = sst [smem:[#allocation32_spill]] %s9138_s16 }
   0xf   :  { %9175 = sst [smem:[#allocation33_spill]] %s9139_s17 }
  0x10   :  { %9176 = sst [smem:[#allocation34_spill]] %s9140_s18 }
  0x11   :  { %9177 = sst [smem:[#allocation35_spill]] %s9141_s19 }
  0x12   :  { %9178 = sst [smem:[#allocation36_spill]] %s9142_s20 }
  0x13   :  { %9179 = sst [smem:[#allocation37_spill]] %s9143_s21 }
  0x14   :  { %26 = vsyncpa [#allocation3], 0 }
  0x15   :  { %28 = vsyncpa [#allocation3 + $0x1], 0 }
  0x16   :  { %29 = vsyncpa [#allocation5], 0 }
  0x17   :  { %31 = vsyncpa [#allocation5 + $0x1], 0 }
  0x18   :  { %32 = vsyncpa [#allocation8], 0 }
  0x19   :  { %34 = vsyncpa [#allocation8 + $0x1], 0  ;;  %s7614_s2 = smov 0   ;;  %s7616_s25 = smov 0  }
  0x1a   :  { %s7618_s26 = smov 0   ;;  %s7620_s27 = smov 0  }
  0x1b LB: > { %9180 = sst [smem:[#allocation13_spill]] %s7479_s25  ;;  %s7633_s3 = sadd.s32 4294967295, %s7487_s27   ;;  %s7487_s27 = sphi %s7620_s27, %s9229_s27   ;;  %s7483_s26 = sphi %s7618_s26, %s9232_s26   ;;  %s7479_s25 = sphi %s7616_s25, %s9231_s25   ;;  %s7475_s2 = sphi %s7614_s2, %s9230_s2  }
  0x1c   : > { %9181 = sst [smem:[#allocation14_spill]] %s7483_s26  ;;  %s7636_s28 = sadd.s32 1, %s7487_s27  }
  0x1d   : > { %9182 = sst [smem:[#allocation15_spill]] %s7636_s28  ;;  %s149_s29 = ssub.s32 %s7487_s27, %s7636_s28 }
  0x1e   : > { %s152_s0 = sadd.s32 1, %s7483_s26  ;;  %p150_p0 = scmp.eq.s32.totalorder %s149_s29, 0 }
  0x1f   : > { %p159_p1 = scmp.ne.s32.totalorder %s7483_s26, %s7479_s25  ;;  %p160_p2 = scmp.eq.s32.totalorder %s7487_s27, 0 }
  0x20   : > { %p165_p3 = scmp.ne.s32.totalorder %s7479_s25, %s7475_s2  ;;  %p166_p5 = scmp.eq.s32.totalorder %s7633_s3, 0 }
  0x21   : > { %s7646_s4 = scalar_select %p150_p0, %s7483_s26, %s152_s0  }
  0x22   : > { %p161_p4 = por %p160_p2, %p159_p1  ;;  %p7117_p6 = scmp.lt.s32.totalorder %s7487_s27, 2 }
  0x23   : > { %9183 = sst [smem:[#allocation16_spill]] %s7646_s4  ;;  %p7650_p7 = por %p166_p5, %p165_p3 }
  0x24   : > { %s7655_s5 = sand.u32 1, %s7483_s26   ;;  %s7661_s23 = sshll.u32 %s7487_s27, 10 }
  0x25   : > { %s9184_s30 = scalar_select %p7650_p7, 1, 0 }
  0x26   : > { %s7658_s22 = sshll.u32 %s7655_s5, 6  ;;  %p7663_p8 = pnand %p7117_p6, %p161_p4 }
  0x27   : > { %s9151_s24 = sand.u32 1, %s7487_s27   ;;  %s9186_s7 = sld [smem:[#allocation25_spill]] }
  0x28   : > { %s646_s4 = scalar_lea.vmem [#allocation4], %s7658_s22  ;;  %s7681_s28 = scalar_lea.sflag [#allocation5], %s9151_s24 }
  0x29   : > { %s653_s26 = sshll.u32 %s646_s4, 4  ;;  %p7687_p12 = pneg %p7663_p8  ;;  %s7676_s26 = int_to_ptr.vmem [resolvable:$true] %s653_s26 }
  0x2d   : > { %s7672_s0 = scalar_lea.hbm %s9186_s7, %s7661_s23  ;;  %s7300_s20 = scalar_lea.hbm %s9186_s7, 2048 }
  0x2e   : > { %s7295_s21 = scalar_lea.hbm %s7672_s0, 1024  ;;  %p7301_p1 = scmp.lt.u32.totalorder %s7672_s0, %s9186_s7 }
  0x2f   : > { %p7296_p11 = scmp.ne.s32.totalorder %s7672_s0, %s7295_s21  ;;  %p7302_p2 = scmp.lt.u32.totalorder %s7300_s20, %s7295_s21 }
  0x30   : > { %p7304_p4 = scmp.lt.u32.totalorder %s7295_s21, %s7672_s0 }
  0x31   : > { %p7298_p13 = pnand %p7687_p12, %p7296_p11  ;;  %p7303_p3 = por %p7302_p2, %p7301_p1 }
  0x33   : > { %p7299_p0 = pneg %p7298_p13  ;;  %p7305_p5 = por %p7304_p4, %p7303_p3 }
  0x35   : > { %p7306_p6 = pnand %p7305_p5, %p7299_p0 }
  0x37   : > { %7309 = shalt.err (!%p7306_p6)
}
  0x38   : > { %s7310_s24 = scalar_lea.vmem %s7676_s26, 1024  ;;  %s7489_s29 = smov [#allocation4]  }
  0x39   : > { %p7311_p11 = scmp.ne.s32.totalorder %s7676_s26, %s7310_s24  ;;  %s7315_s4 = sshll.u32 %s7489_s29, 4  ;;  %s7316_s4 = int_to_ptr.vmem [resolvable:$false] %s7315_s4 }
  0x3a   : > { %s7317_s18 = scalar_lea.vmem %s7316_s4, 2048  ;;  %p7318_p10 = scmp.lt.s32.totalorder %s7676_s26, %s7316_s4 }
  0x3b   : > { %p7313_p13 = pnand %p7311_p11, %p7687_p12  ;;  %p7319_p7 = scmp.lt.s32.totalorder %s7317_s18, %s7310_s24 }
  0x3d   : > { %p7314_p9 = pneg %p7313_p13  ;;  %p7320_p1 = por %p7319_p7, %p7318_p10 }
  0x3f   : > { %p7321_p2 = pnand %p7320_p1, %p7314_p9 }
  0x41   : > { %7324 = shalt.err (!%p7321_p2)
}
  0x42   : > { %s9153_s19 = smov 64   ;;  %s9155_s20 = smov 4  }
  0x43   : > { %7107 = dma.hbm_to_vmem [thread:$0]  (!%p7663_p8), %s7672_s0, 1024, %s7676_s26, %s7681_s28, %s9153_s19, %s9153_s19, %s9155_s20  }
  0x44   : > { %p9188_p7 = scmp.lt.s32.totalorder %s7487_s27, 3  ;;  %p9189_p9 = scmp.ge.s32.totalorder %s7487_s27, 1 }
  0x45   : > { %s9191_s11 = sld [smem:[#allocation27_spill]]  ;;  %s700_s18 = scalar_lea.vmem [#allocation7], %s7658_s22 }
  0x46   : > { %p7718_p10 = pnand %p9189_p9, %p9188_p7  ;;  %s707_s7 = sshll.u32 %s700_s18, 4  ;;  %s7729_s7 = int_to_ptr.vmem [resolvable:$true] %s707_s7 }
  0x47   : > { %s9192_s26 = sand.u32 1, %s7487_s27  }
  0x48   : > { %s9190_s21 = scalar_select %p7718_p10, 1, 0 }
  0x49   : > { %s7733_s0 = scalar_lea.sflag [#allocation8], %s9192_s26 }
  0x4b   : > { %s7726_s4 = scalar_lea.hbm %s9191_s11, %s7661_s23  ;;  %s7330_s29 = scalar_lea.hbm %s9191_s11, 2048 }
  0x4c   : > { %s7325_s19 = scalar_lea.hbm %s7726_s4, 1024  ;;  %p7331_p5 = scmp.lt.u32.totalorder %s7726_s4, %s9191_s11 }
  0x4d   : > { %p7326_p0 = scmp.ne.s32.totalorder %s7726_s4, %s7325_s19  ;;  %p7332_p6 = scmp.lt.u32.totalorder %s7330_s29, %s7325_s19 }
  0x4e   : > { %p7334_p13 = scmp.lt.u32.totalorder %s7325_s19, %s7726_s4 }
  0x4f   : > { %p7328_p3 = pnand %p7326_p0, %p7687_p12  ;;  %p7333_p11 = por %p7332_p6, %p7331_p5 }
  0x51   : > { %p7329_p4 = pneg %p7328_p3  ;;  %p7335_p1 = por %p7334_p13, %p7333_p11 }
  0x53   : > { %p7336_p2 = pnand %p7335_p1, %p7329_p4 }
  0x55   : > { %7339 = shalt.err (!%p7336_p2)
}
  0x56   : > { %s7340_s18 = scalar_lea.vmem %s7729_s7, 1024  ;;  %s7492_s20 = smov [#allocation7]  }
  0x57   : > { %p7341_p7 = scmp.ne.s32.totalorder %s7729_s7, %s7340_s18  ;;  %s7345_s26 = sshll.u32 %s7492_s20, 4  ;;  %s7346_s26 = int_to_ptr.vmem [resolvable:$false] %s7345_s26 }
  0x58   : > { %s7347_s16 = scalar_lea.vmem %s7346_s26, 2048  ;;  %p7348_p3 = scmp.lt.s32.totalorder %s7729_s7, %s7346_s26 }
  0x59   : > { %p7343_p9 = pnand %p7341_p7, %p7687_p12  ;;  %p7349_p10 = scmp.lt.s32.totalorder %s7347_s16, %s7340_s18 }
  0x5b   : > { %p7344_p0 = pneg %p7343_p9  ;;  %p7350_p5 = por %p7349_p10, %p7348_p3 }
  0x5d   : > { %p7351_p6 = pnand %p7350_p5, %p7344_p0 }
  0x5f   : > { %7354 = shalt.err (!%p7351_p6)
}
  0x60   : > { %s9193_s17 = smov 4   ;;  %s9194_s19 = smov 64  }
  0x61   : > { %7113 = dma.hbm_to_vmem [thread:$0]  (!%p7663_p8), %s7726_s4, 1024, %s7729_s7, %s7733_s0, %s9194_s19, %s9194_s19, %s9193_s17  }
  0x62   : > { %s9195_s20 = sld [smem:[#allocation24_spill]]  ;;  %s619_s26 = scalar_lea.vmem [#allocation2], %s7658_s22 }
  0x63   : > { %s626_s16 = sshll.u32 %s619_s26, 4  ;;  %s616_s11 = scalar_lea.sflag [#allocation3], %s7655_s5  ;;  %s7767_s16 = int_to_ptr.vmem [resolvable:$true] %s626_s16 }
  0x68   : > { %s7764_s18 = scalar_lea.hbm %s9195_s20, %s7661_s23  ;;  %s7360_s24 = scalar_lea.hbm %s9195_s20, 2048 }
  0x69   : > { %s7355_s14 = scalar_lea.hbm %s7764_s18, 1024  ;;  %p7361_p13 = scmp.lt.u32.totalorder %s7764_s18, %s9195_s20 }
  0x6a   : > { %p7356_p10 = scmp.ne.s32.totalorder %s7764_s18, %s7355_s14  ;;  %p7362_p1 = scmp.lt.u32.totalorder %s7360_s24, %s7355_s14 }
  0x6b   : > { %p7364_p7 = scmp.lt.u32.totalorder %s7355_s14, %s7764_s18 }
  0x6c   : > { %p7358_p4 = pnand %p7356_p10, %p7687_p12  ;;  %p7363_p2 = por %p7362_p1, %p7361_p13 }
  0x6e   : > { %p7359_p11 = pneg %p7358_p4  ;;  %p7365_p9 = por %p7364_p7, %p7363_p2 }
  0x70   : > { %p7366_p0 = pnand %p7365_p9, %p7359_p11 }
  0x72   : > { %7369 = shalt.err (!%p7366_p0)
}
  0x73   : > { %s7370_s26 = scalar_lea.vmem %s7767_s16, 1024  ;;  %s7493_s7 = smov [#allocation2]  }
  0x74   : > { %p7371_p3 = scmp.ne.s32.totalorder %s7767_s16, %s7370_s26  ;;  %s7375_s4 = sshll.u32 %s7493_s7, 4  ;;  %s7376_s4 = int_to_ptr.vmem [resolvable:$false] %s7375_s4 }
  0x75   : > { %s7377_s13 = scalar_lea.vmem %s7376_s4, 2048  ;;  %p7378_p10 = scmp.lt.s32.totalorder %s7767_s16, %s7376_s4 }
  0x76   : > { %p7373_p5 = pnand %p7371_p3, %p7687_p12  ;;  %p7379_p4 = scmp.lt.s32.totalorder %s7377_s13, %s7370_s26 }
  0x78   : > { %p7374_p6 = pneg %p7373_p5  ;;  %p7380_p13 = por %p7379_p4, %p7378_p10 }
  0x7a   : > { %p7381_p1 = pnand %p7380_p13, %p7374_p6 }
  0x7c   : > { %7384 = shalt.err (!%p7381_p1)
}
  0x7d   : > { %7104 = dma.hbm_to_vmem [thread:$0]  (!%p7663_p8), %s7764_s18, 1024, %s7767_s16, %s616_s11, %s9194_s19, %s9194_s19, %s9193_s17  }
  0x7e   : > { %s9196_s9 = sld [smem:[#allocation26_spill]]  ;;  %s673_s26 = scalar_lea.vmem [#allocation6], %s7658_s22 }
  0x7f   : > { %s680_s7 = sshll.u32 %s673_s26, 4  ;;  %s6720_s4 = sshll.u32 %s7655_s5, 7  ;;  %s7803_s7 = int_to_ptr.vmem [resolvable:$true] %s680_s7 }
  0x84   : > { %s7800_s29 = scalar_lea.hbm %s9196_s9, %s7661_s23  ;;  %s7390_s16 = scalar_lea.hbm %s9196_s9, 2048 }
  0x85   : > { %s7385_s13 = scalar_lea.hbm %s7800_s29, 1024  ;;  %p7391_p9 = scmp.lt.u32.totalorder %s7800_s29, %s9196_s9 }
  0x86   : > { %p7386_p11 = scmp.ne.s32.totalorder %s7800_s29, %s7385_s13  ;;  %p7392_p0 = scmp.lt.u32.totalorder %s7390_s16, %s7385_s13 }
  0x87   : > { %p7394_p5 = scmp.lt.u32.totalorder %s7385_s13, %s7800_s29 }
  0x88   : > { %p7388_p2 = pnand %p7386_p11, %p7687_p12  ;;  %p7393_p3 = por %p7392_p0, %p7391_p9 }
  0x8a   : > { %p7389_p7 = pneg %p7388_p2  ;;  %p7395_p6 = por %p7394_p5, %p7393_p3 }
  0x8c   : > { %p7396_p10 = pnand %p7395_p6, %p7389_p7 }
  0x8e   : > { %7399 = shalt.err (!%p7396_p10)
}
  0x8f   : > { %s7400_s22 = scalar_lea.vmem %s7803_s7, 1024  ;;  %s7494_s24 = smov [#allocation6]  }
  0x90   : > { %p7401_p4 = scmp.ne.s32.totalorder %s7803_s7, %s7400_s22  ;;  %s7405_s26 = sshll.u32 %s7494_s24, 4  ;;  %s7406_s26 = int_to_ptr.vmem [resolvable:$false] %s7405_s26 }
  0x91   : > { %s7407_s11 = scalar_lea.vmem %s7406_s26, 2048  ;;  %p7408_p11 = scmp.lt.s32.totalorder %s7803_s7, %s7406_s26 }
  0x92   : > { %p7403_p13 = pnand %p7401_p4, %p7687_p12  ;;  %p7409_p2 = scmp.lt.s32.totalorder %s7407_s11, %s7400_s22 }
  0x94   : > { %p7404_p1 = pneg %p7403_p13  ;;  %p7410_p9 = por %p7409_p2, %p7408_p11 }
  0x96   : > { %p7411_p0 = pnand %p7410_p9, %p7404_p1 }
  0x98   : > { %7414 = shalt.err (!%p7411_p0)
}
  0x99   : > { %7110 = dma.hbm_to_vmem [thread:$0]  (!%p7663_p8), %s7800_s29, 1024, %s7803_s7, %s7681_s28, %s9194_s19, %s9194_s19, %s9193_s17  }
  0x9a   : > { %s6877_s13 = sshll.u32 %s7487_s27, 11  ;;  %s9197_s15 = sld [smem:[#allocation31_spill]] }
  0x9b   : > { %s742_s14 = scalar_lea.vmem [#allocation9], %s6720_s4 }
  0x9c   : > { %s749_s22 = sshll.u32 %s742_s14, 4  ;;  %s7839_s22 = int_to_ptr.vmem [resolvable:$true] %s749_s22 }
  0xa0   : > { %s7835_s23 = scalar_lea.hbm %s9197_s15, %s6877_s13  ;;  %s7420_s29 = scalar_lea.hbm %s9197_s15, 4096 }
  0xa1   : > { %s7415_s24 = scalar_lea.hbm %s7835_s23, 2048  ;;  %p7421_p6 = scmp.lt.u32.totalorder %s7835_s23, %s9197_s15 }
  0xa2   : > { %p7416_p7 = scmp.ne.s32.totalorder %s7835_s23, %s7415_s24  ;;  %p7422_p10 = scmp.lt.u32.totalorder %s7420_s29, %s7415_s24 }
  0xa3   : > { %p7424_p13 = scmp.lt.u32.totalorder %s7415_s24, %s7835_s23 }
  0xa4   : > { %p7418_p3 = pnand %p7416_p7, %p7687_p12  ;;  %p7423_p4 = por %p7422_p10, %p7421_p6 }
  0xa6   : > { %p7419_p5 = pneg %p7418_p3  ;;  %p7425_p1 = por %p7424_p13, %p7423_p4 }
  0xa8   : > { %p7426_p11 = pnand %p7425_p1, %p7419_p5 }
  0xaa   : > { %7429 = shalt.err (!%p7426_p11)
}
  0xab   : > { %s7430_s5 = scalar_lea.vmem %s7839_s22, 2048  ;;  %s7495_s4 = smov [#allocation9]  }
  0xac   : > { %p7431_p2 = scmp.ne.s32.totalorder %s7839_s22, %s7430_s5  ;;  %s7435_s11 = sshll.u32 %s7495_s4, 4  ;;  %s7436_s11 = int_to_ptr.vmem [resolvable:$false] %s7435_s11 }
  0xad   : > { %s7437_s13 = scalar_lea.vmem %s7436_s11, 4096  ;;  %p7438_p7 = scmp.lt.s32.totalorder %s7839_s22, %s7436_s11 }
  0xae   : > { %p7433_p9 = pnand %p7431_p2, %p7687_p12  ;;  %p7439_p3 = scmp.lt.s32.totalorder %s7437_s13, %s7430_s5 }
  0xb0   : > { %p7434_p0 = pneg %p7433_p9  ;;  %p7440_p6 = por %p7439_p3, %p7438_p7 }
  0xb2   : > { %p7441_p10 = pnand %p7440_p6, %p7434_p0 }
  0xb4   : > { %7444 = shalt.err (!%p7441_p10)
}
  0xb5   : > { %7116 = dma.hbm_to_vmem [thread:$0]  (!%p7663_p8), %s7835_s23, 2048, %s7839_s22, %s7733_s0, %s9194_s19, %s9194_s19, %s9193_s17  }
  0xb6   : > { %p9198_p12 = scmp.ne.s32.totalorder %s9190_s21, 0 }
  0xb8   : > { %791 = sbr.rel (%p9198_p12) target bundleno = 2714 (0xa9a), region = 104 }
  0xbf   : > { %s7869_s2 = sand.u32 1, %s7479_s25   ;;  %p9199_p5 = scmp.ne.s32.totalorder %s9184_s30, 0 }
  0xc0   : > { %s6724_s18 = sshll.u32 %s7869_s2, 6  ;;  %s794_s16 = scalar_lea.sflag [#allocation3], %s7869_s2 }
  0xc1   : > { %s7873_s14 = scalar_lea.vmem [#allocation2], %s6724_s18 }
  0xc2   : > { %7462 = dma.done.wait (%p9199_p5), %s794_s16, 1024  }
  0xc3   : > { %7464 = vsyncadd (%p9199_p5), %s794_s16, 4294966272  ;;  %s802_s1 = sand.u32 1, %s7633_s3   ;;  %s7880_s0 = scalar_lea.vmem [#allocation4], %s6724_s18 }
  0xc4   : > { %s803_s21 = scalar_lea.sflag [#allocation5], %s802_s1 }
  0xc5   : > { %7466 = dma.done.wait (%p9199_p5), %s803_s21, 2048  }
  0xc6   : > { %7468 = vsyncadd (%p9199_p5), %s803_s21, 4294965248  ;;  %s7886_s17 = scalar_lea.vmem [#allocation6], %s6724_s18  ;;  %s821_s19 = scalar_lea.sflag [#allocation8], %s802_s1 }
  0xc7   : > { %s7888_s23 = scalar_lea.vmem [#allocation7], %s6724_s18 }
  0xc8   : > { %9200 = sst [smem:[#allocation17_spill]] %s7888_s23 }
  0xc9   : > { %7470 = dma.done.wait (%p9199_p5), %s821_s19, 3072  }
  0xca   : > { %7472 = vsyncadd (%p9199_p5), %s821_s19, 4294964224  ;;  %s6728_s22 = sshll.u32 %s7869_s2, 7  ;;  %p943_p8 = scmp.lt.s32.totalorder %s7633_s3, 1 }
  0xcb   : > { %s9202_s27 = sld [smem:[#allocation29_spill]]  ;;  %s9204_s15 = sld [smem:[#allocation30_spill]] }
  0xcc   : > { %s7897_s24 = scalar_select %p943_p8, %s7633_s3, 1 }
  0xcd   : > { %s9205_s5 = sld [smem:[#allocation32_spill]]  ;;  %s9206_s13 = sld [smem:[#allocation33_spill]] }
  0xce   : > { %s6878_s16 = sshll.u32 %s7897_s24, 7  ;;  %s6731_s1 = sshll.u32 %s7897_s24, 1 }
  0xcf   : > { %s9207_s12 = sld [smem:[#allocation34_spill]]  ;;  %s9208_s19 = sld [smem:[#allocation35_spill]] }
  0xd0   : > { %p6732_p4 = scmp.ne.s32.totalorder %s7633_s3, 0 }
  0xd1   : > { %s7920_s28 = scalar_lea.vmem %s9202_s27, %s6878_s16  ;;  %s7925_s29 = scalar_lea.vmem %s9204_s15, %s6731_s1  ;;  %vm988_vm0 = vcmask (!%p6732_p4), 15360   ;;  %vm990_vm1 = vcmask (!%p6732_p4), 8192   ;;  %v7496_v2 = vmov (!%p6732_p4), 0   ;;  %v7497_v61 = vmov (!%p6732_p4), 1  }
  0xd2   : > { %9203 = sst [smem:[#allocation18_spill]] %s7920_s28  ;;  %s9209_s15 = sld [smem:[#allocation36_spill]]  ;;  %7161 = vset.pattern.permute.xlu1 (!%p6732_p4), %v7496_v2  ;;  %7160 = vset.pattern.permute.xlu0 (!%p6732_p4), %v7496_v2  ;;  %v1059_v62 = vlaneseq (!%p6732_p4) }
  0xd3   : > { %s966_s4 = scalar_lea.vmem %s9205_s5, %s7897_s24  ;;  %s969_s2 = scalar_lea.vmem %s9206_s13, %s7897_s24 }
  0xd4   : > { %s7947_s1 = scalar_lea.vmem [#allocation9], %s6728_s22  ;;  %983 = sbr.rel (%p6732_p4) target bundleno = 420 (0x1a4), region = 128  ;;  %v1060_v63 = vshrl.u32 (!%p6732_p4), %v1059_v62, 7 }
  0xd5   : > { %s972_s23 = scalar_lea.vmem %s9207_s12, %s7897_s24  ;;  %s975_s27 = scalar_lea.vmem %s9208_s19, %s7897_s24 }
  0xd6   : > { %s9210_s11 = sld [smem:[#allocation19_spill]] (!%p6732_p4)  ;;  %s9211_s13 = sld [smem:[#allocation20_spill]] (!%p6732_p4) }
  0xd7   : > { %s9212_s19 = sld [smem:[#allocation22_spill]] (!%p6732_p4)  ;;  %s9213_s26 = sld [smem:[#allocation21_spill]] (!%p6732_p4) }
  0xd8   : > { %s978_s30 = scalar_lea.vmem %s9209_s15, %s7897_s24  ;;  %s9214_s25 = sld [smem:[#allocation23_spill]] (!%p6732_p4) }
  0xd9   : > { %s9215_s22 = sld [smem:[#allocation37_spill]] (!%p6732_p4) }
  0xdc   : > { %v984_v0 = vld [vmem:[%s9210_s11] sm:$0xff]  ;;  %v985_v1 = vld [vmem:[%s9210_s11 + $0x8] sm:$0x1]  ;;  %v986_v5 = vld [vmem:[%s9210_s11 + $0x10] sm:$0xff] }
  0xdd   : > { %v989_v3 = vsel %vm988_vm0, %v984_v0, 0.0  ;;  %v991_v4 = vsel %vm990_vm1, %v985_v1, 0.0  ;;  %v987_v6 = vld [vmem:[%s9210_s11 + $0x18] sm:$0x1]  ;;  %v999_v8 = vsel %vm988_vm0, %v986_v5, 0.0 }
  0xde   : > { %v992_v7 = vadd.f32 %v991_v4, %v989_v3  ;;  %v1000_v9 = vsel %vm990_vm1, %v987_v6, 0.0 }
  0xdf   : > { %v1001_v10 = vadd.f32 %v1000_v9, %v999_v8  ;;  %v1048_v9 = vld [vmem:[%s9212_s19] sm:$0x3] }
  0xe0   : > { %v993_v11 = vrot.slane %v992_v7, 4 }
  0xe1   : > { %v1002_v12 = vrot.slane %v1001_v10, 4 }
  0xe2   : > { %v994_v13 = vadd.f32 %v993_v11, %v992_v7 }
  0xe3   : > { %v1003_v14 = vadd.f32 %v1002_v12, %v1001_v10  ;;  %v6733_v10 = vld [vmem:[%s9213_s26] ss:$0 sm:$0xff] }
  0xe4   : > { %v995_v15 = vrot.slane %v994_v13, 2 }
  0xe5   : > { %v1004_v16 = vrot.slane %v1003_v14, 2 }
  0xe6   : > { %v996_v17 = vadd.f32 %v995_v15, %v994_v13 }
  0xe7   : > { %v1005_v18 = vadd.f32 %v1004_v16, %v1003_v14 }
  0xe8   : > { %v997_v19 = vrot.slane %v996_v17, 1 }
  0xe9   : > { %v1006_v20 = vrot.slane %v1005_v18, 1 }
  0xea   : > { %v998_v21 = vadd.f32 %v997_v19, %v996_v17  ;;  %v1114_v17 = vrot.slane %v1048_v9, 1 }
  0xeb   : > { %v1007_v22 = vadd.f32 %v1006_v20, %v1005_v18 }
  0xec   : > { %v1009_v23 = vmul.f32 0.11111111, %v998_v21 }
  0xed   : > { %v1010_v24 = vmul.f32 0.11111111, %v1007_v22  ;;  %v1086_v22 = vld [vmem:[%s9214_s25] sm:$0x1] }
  0xee   : > { %v1011_v25 = vsub.f32 %v984_v0, %v1009_v23  ;;  %v1012_v26 = vsub.f32 %v985_v1, %v1009_v23  ;;  %v1061_v0 = vsub.s32 0, %v1060_v63  ;;  %v1047_v1 = vld [vmem:[%s9211_s13] sm:$0x3] }
  0xef   : > { %v1013_v27 = vsub.f32 %v986_v5, %v1010_v24  ;;  %v1014_v28 = vsub.f32 %v987_v6, %v1010_v24  ;;  %v1099_v5 = vsub.s32 1, %v1060_v63 }
  0xf0   : > { %v1015_v29 = vmul.f32 %v1011_v25, %v1011_v25  ;;  %v1016_v30 = vmul.f32 %v1012_v26, %v1012_v26  ;;  %v1062_v4 = vrot.slane %v1047_v1, %v1061_v0 }
  0xf1   : > { %v1017_v31 = vmul.f32 %v1013_v27, %v1013_v27  ;;  %v1018_v32 = vmul.f32 %v1014_v28, %v1014_v28  ;;  %v1100_v12 = vrot.slane %v1047_v1, %v1099_v5 }
  0xf2   : > { %v1019_v33 = vsel %vm988_vm0, %v1015_v29, 0.0  ;;  %v1020_v34 = vsel %vm990_vm1, %v1016_v30, 0.0 }
  0xf3   : > { %v1021_v35 = vadd.f32 %v1020_v34, %v1019_v33  ;;  %v1028_v36 = vsel %vm988_vm0, %v1017_v31, 0.0  ;;  %v1029_v37 = vsel %vm990_vm1, %v1018_v32, 0.0 }
  0xf4   : > { %v1030_v38 = vadd.f32 %v1029_v37, %v1028_v36 }
  0xf5   : > { %v1022_v39 = vrot.slane %v1021_v35, 4 }
  0xf6   : > { %v1031_v40 = vrot.slane %v1030_v38, 4 }
  0xf7   : > { %v1023_v41 = vadd.f32 %v1022_v39, %v1021_v35 }
  0xf8   : > { %v1032_v42 = vadd.f32 %v1031_v40, %v1030_v38 }
  0xf9   : > { %v1024_v43 = vrot.slane %v1023_v41, 2 }
  0xfa   : > { %v1033_v44 = vrot.slane %v1032_v42, 2 }
  0xfb   : > { %v1025_v45 = vadd.f32 %v1024_v43, %v1023_v41 }
  0xfc   : > { %v1034_v46 = vadd.f32 %v1033_v44, %v1032_v42 }
  0xfd   : > { %v1026_v47 = vrot.slane %v1025_v45, 1 }
  0xfe   : > { %v1035_v48 = vrot.slane %v1034_v46, 1 }
  0xff   : > { %v1027_v49 = vadd.f32 %v1026_v47, %v1025_v45 }
 0x100   : > { %v1036_v50 = vadd.f32 %v1035_v48, %v1034_v46 }
 0x101   : > { %v1037_v51 = vmul.f32 0.11111111, %v1027_v49 }
 0x102   : > { %v1038_v52 = vmul.f32 0.11111111, %v1036_v50 }
 0x103   : > { %v1039_v53 = vadd.f32 1e-06, %v1037_v51 }
 0x104   : > { %v1040_v54 = vadd.f32 1e-06, %v1038_v52 }
 0x105   : > { %7164 = vrsqrt.f32 %v1039_v53 }
 0x106   : > { %7166 = vrsqrt.f32 %v1040_v54 }
 0x10f   : > { %v7165_v55 = vpop.eup %7164 }
 0x110   : > { %v7167_v56 = vpop.eup %7166  ;;  %v1044_v57 = vmul.f32 %v7165_v55, %v1012_v26  ;;  %v1043_v58 = vmul.f32 %v7165_v55, %v1011_v25 }
 0x111   : > { %v1046_v59 = vmul.f32 %v7167_v56, %v1014_v28  ;;  %v1045_v60 = vmul.f32 %v7167_v56, %v1013_v27 }
 0x112   : > { %1076 = vperm.xlu1 %7161, %v1044_v57   ;;  %1051 = vperm.xlu0 %7160, %v1043_v58  }
 0x116   : > { %1081 = vperm.xlu1 %7161, %v1046_v59   ;;  %1056 = vperm.xlu0 %7160, %v1045_v60  }
 0x11a   : > { %7163 = vset.pattern.permute.xlu1 %v7497_v61  ;;  %7162 = vset.pattern.permute.xlu0 %v7497_v61 }
 0x11b   : > { %1094 = vperm.xlu1 %7163, %v1045_v60   ;;  %1090 = vperm.xlu0 %7162, %v1043_v58  }
 0x11f   : > { %1106 = vperm.xlu1 %7163, %v1044_v57   ;;  %1110 = vperm.xlu0 %7162, %v1046_v59  }
 0x191   : > { %v1077_v2 = vpop.permute.xlu1 %1076  ;;  %v1052_v3 = vpop.permute.xlu0 %1051 }
 0x192   : > { %v1063_v8 = vmul.f32 %v1062_v4, %v1052_v3  ;;  %v1084_v13 = vmul.f32 %v1077_v2, %v1048_v9 }
 0x194   : > { %v1072_v14 = vadd.f32 %v6733_v10, %v1063_v8  ;;  %v1087_v27 = vadd.f32 %v1086_v22, %v1084_v13 }
 0x195   : > { %v1082_v6 = vpop.permute.xlu1 %1081  ;;  %v1057_v7 = vpop.permute.xlu0 %1056 }
 0x196   : > { %v1064_v11 = vmul.f32 %v1062_v4, %v1057_v7  ;;  %v1085_v18 = vmul.f32 %v1082_v6, %v1048_v9 }
 0x198   : > { %v1073_v19 = vadd.f32 %v6733_v10, %v1064_v11  ;;  %v1088_v28 = vadd.f32 %v1086_v22, %v1085_v18 }
 0x19a   : > { %v1095_v15 = vpop.permute.xlu1 %1094  ;;  %v1091_v16 = vpop.permute.xlu0 %1090 }
 0x19b   : > { %v1102_v20 = vmul.f32 %v1100_v12, %v1095_v15  ;;  %v1101_v21 = vmul.f32 %v1100_v12, %v1091_v16 }
 0x19d   : > { %v1104_v23 = vadd.f32 %v1102_v20, %v1073_v19  ;;  %v1103_v24 = vadd.f32 %v1101_v21, %v1072_v14 }
 0x19e   : > { %v1107_v25 = vpop.permute.xlu1 %1106  ;;  %v1111_v26 = vpop.permute.xlu0 %1110 }
 0x19f   : > { %1121 = vst [vmem:[%s9215_s22 + $0x10] sm:$0xff] %v1104_v23  ;;  %1120 = vst [vmem:[%s9215_s22] sm:$0xff] %v1103_v24  ;;  %v1116_v29 = vmul.f32 %v1114_v17, %v1107_v25  ;;  %v1117_v30 = vmul.f32 %v1114_v17, %v1111_v26 }
 0x1a1   : > { %v1118_v31 = vadd.f32 %v1116_v29, %v1087_v27  ;;  %v1119_v32 = vadd.f32 %v1117_v30, %v1088_v28 }
 0x1a3   : > { %1122 = vst [vmem:[%s9215_s22 + $0x8] sm:$0x1] %v1118_v31  ;;  %1123 = vst [vmem:[%s9215_s22 + $0x18] sm:$0x1] %v1119_v32 }
 0x1a4 PF: > { %v7183_v33 = vld [vmem:[%s7873_s14] sm:$0xff]   ;;  %v7185_v35 = vld [vmem:[%s7873_s14 + $0x8] sm:$0xff]   ;;  %v7187_v37 = vld [vmem:[%s7873_s14 + $0x10] sm:$0xff]   ;;  %v1158_v41 = vlaneseq  ;;  %s9216_s15 = sld [smem:[#allocation37_spill]]  ;;  %v7498_v51 = vmov 1966171168   ;;  %s9217_s22 = scalar_lea.vmem %s9128_s6, %s7897_s24 }
 0x1a5   : > { %v7184_v34 = vld [vmem:[%s7880_s0] sm:$0xff]   ;;  %6963 = vmatprep.subr.bf16.mxu0 %v7183_v33  ;;  %v7186_v36 = vld [vmem:[%s7880_s0 + $0x8] sm:$0xff]   ;;  %v7188_v38 = vld [vmem:[%s7880_s0 + $0x10] sm:$0xff]   ;;  %v1156_v52 = vunpack.c.l.s4 %v7498_v51  ;;  %vm7500_vm2 = vmmov 0   ;;  %s7501_s5 = smov 64   ;;  %vm3420_vm3 = vcmask 523264   ;;  %s9219_s16 = scalar_lea.vmem %s9132_s10, %s7897_s24 }
 0x1a6   : > { %6983 = vmatprep.subr.bf16.mxu1 %v7184_v34  ;;  %6964 = vmatpush3.bf16.msra.mxu0 %v7183_v33  ;;  %v7189_v39 = vld [vmem:[%s7873_s14 + $0x18] sm:$0xff]   ;;  %v7191_v42 = vld [vmem:[%s7873_s14 + $0x20] sm:$0xff]   ;;  %v7193_v44 = vld [vmem:[%s7873_s14 + $0x28] sm:$0xff]   ;;  %v8006_v46 = vshrl.u32 %v1158_v41, 7  ;;  %vm3706_vm4 = vcmask 1043456   ;;  %vm3707_vm5 = vcmask 1044480  }
 0x1a7   : > { %6984 = vmatpush3.bf16.msra.mxu1 %v7184_v34  ;;  %6965 = vmatprep.subr.bf16.mxu0 %v7185_v35  ;;  %v7190_v40 = vld [vmem:[%s7880_s0 + $0x18] sm:$0xff]   ;;  %v7192_v43 = vld [vmem:[%s7880_s0 + $0x20] sm:$0xff]   ;;  %v7194_v45 = vld [vmem:[%s7880_s0 + $0x28] sm:$0xff]   ;;  %v1157_v56 = vunpack.c.0.s8 %v1156_v52  ;;  %vm3609_vm6 = vcmask 72704   ;;  %vm3613_vm7 = vcmask 65536   ;;  %s9220_s19 = sld [smem:[#allocation17_spill]] }
 0x1a8   : > { %6985 = vmatprep.subr.bf16.mxu1 %v7186_v36  ;;  %v7195_v57 = vld [vmem:[%s7873_s14 + $0x30] sm:$0xff]   ;;  %v7197_v0 = vld [vmem:[%s7873_s14 + $0x38] sm:$0xff]   ;;  %v7199_v8 = vld [vmem:[%s7886_s17] sm:$0xff]   ;;  %s9221_s9 = sld [smem:[#allocation18_spill]]  ;;  %s9222_s7 = sld [smem:[#allocation28_spill]]  ;;  %vm4629_vm8 = vcmask 1040384  }
 0x1a9   : > { %v7196_v59 = vld [vmem:[%s7880_s0 + $0x30] sm:$0xff]   ;;  %v8023_v60 = vsub.s32 %v1157_v56, %v8006_v46  ;;  %v7198_v2 = vld [vmem:[%s7880_s0 + $0x38] sm:$0xff]   ;;  %v7203_v41 = vld [vmem:[%s7886_s17 + $0x20] sm:$0xff]  }
 0x1aa   : > { %6966 = vmatpush3.bf16.msra.mxu0 %v7185_v35  ;;  %v1124_v47 = vld [vmem:[%s9216_s15] sm:$0xff]  ;;  %v1125_v48 = vld [vmem:[%s9216_s15 + $0x8] sm:$0x1]  ;;  %v1126_v49 = vld [vmem:[%s9216_s15 + $0x10] sm:$0xff] }
 0x1ab   : > { %6986 = vmatpush3.bf16.msra.mxu1 %v7186_v36  ;;  %6967 = vmatprep.subr.bf16.mxu0 %v7187_v37  ;;  %v1127_v50 = vld [vmem:[%s9216_s15 + $0x18] sm:$0x1]  ;;  %v1128_v53 = vpack.c.bf16 %v1125_v48, %v1124_v47  ;;  %v6735_v55 = vpack.c.bf16 %v1125_v48, %v1125_v48  ;;  %v6734_v47 = vld [vmem:[%s9217_s22] ss:$0 sm:$0xff] }
 0x1ac   : > { %6987 = vmatprep.subr.bf16.mxu1 %v7188_v38  ;;  %v1129_v54 = vpack.c.bf16 %v1127_v50, %v1126_v49  ;;  %v6736_v58 = vpack.c.bf16 %v1127_v50, %v1127_v50  ;;  %v1250_v49 = vcombine.high %v6734_v47, %v6734_v47  ;;  %v1257_v51 = vrot.slane %v6734_v47, %v8023_v60 }
 0x1ad   : > { %v1161_v61 = vrot.slane %v1128_v53, %v8023_v60  ;;  %v1168_v62 = vrot.slane %v6735_v55, %v8023_v60 }
 0x1ae   : > { %6968 = vmatpush3.bf16.msra.mxu0 %v7187_v37  ;;  %v1200_v63 = vrot.slane %v1129_v54, %v8023_v60  ;;  %v1207_v1 = vrot.slane %v6736_v58, %v8023_v60  ;;  %v7200_v37 = vld [vmem:[%s7886_s17 + $0x8] sm:$0xff]   ;;  %v1264_v52 = vrot.slane %v1250_v49, %v8023_v60  ;;  %v1265_v55 = vcombine.high %v1257_v51, %v1257_v51  ;;  %s9223_s25 = scalar_lea.vmem %s9222_s7, %s7897_s24 }
 0x1af   : > { %6988 = vmatpush3.bf16.msra.mxu1 %v7188_v38  ;;  %6969 = vmatprep.subr.bf16.mxu0 %v7189_v39  ;;  %v1169_v3 = vcombine.high %v1161_v61, %v1161_v61  ;;  %v1176_v4 = vrot.slane %v1161_v61, %v8023_v60  ;;  %v1183_v5 = vrot.slane %v1168_v62, %v8023_v60 }
 0x1b0   : > { %6989 = vmatprep.subr.bf16.mxu1 %v7190_v40  ;;  %v1208_v6 = vcombine.high %v1200_v63, %v1200_v63  ;;  %v1215_v7 = vrot.slane %v1200_v63, %v8023_v60  ;;  %v1222_v14 = vrot.slane %v1207_v1, %v8023_v60  ;;  %v1266_v56 = vcombine.high %v1264_v52, %v1264_v52 }
 0x1b1   : > { %v1190_v9 = vrot.slane %v1169_v3, %v8023_v60  ;;  %v1287_v61 = vrot.slane %v1265_v55, %v8023_v60  ;;  %v1280_v63 = vrot.slane %v1264_v52, %v8023_v60 }
 0x1b2   : > { %6970 = vmatpush3.bf16.msra.mxu0 %v7189_v39  ;;  %v1229_v10 = vrot.slane %v1208_v6, %v8023_v60  ;;  %v1230_v11 = vcombine.high %v1215_v7, %v1215_v7  ;;  %v1242_v12 = vunpack.i.h.s16 %v1215_v7  ;;  %v6737_v13 = vpack.i.b16 %v1215_v7, %v1183_v5  ;;  %v7201_v39 = vld [vmem:[%s7886_s17 + $0x10] sm:$0xff]  }
 0x1b3   : > { %6990 = vmatpush3.bf16.msra.mxu1 %v7190_v40  ;;  %6971 = vmatprep.subr.bf16.mxu0 %v7191_v42  ;;  %v1308_v17 = vcombine.low %v1176_v4, %v1190_v9  ;;  %v6742_v18 = vcombine.high %v1176_v4, %v1190_v9  ;;  %v7202_v40 = vld [vmem:[%s7886_s17 + $0x18] sm:$0xff]   ;;  %v1294_v62 = vrot.slane %v1266_v56, %v8023_v60 }
 0x1b4   : > { %6991 = vmatprep.subr.bf16.mxu1 %v7192_v43  ;;  %v1231_v15 = vcombine.high %v1229_v10, %v1229_v10  ;;  %v1244_v16 = vunpack.i.h.s16 %v1229_v10  ;;  %v1246_v19 = vunpack.i.h.s16 %v1230_v11  ;;  %v6738_v20 = vpack.i.b16 %v1229_v10, %v1242_v12 }
 0x1b5   : > { %v1318_v22 = vrot.slane %v1308_v17, %v8023_v60  ;;  %v1325_v23 = vrot.slane %v6742_v18, %v8023_v60  ;;  %v1423_v7 = vcombine.low %v1280_v63, %v1294_v62  ;;  %v1296_v9 = vcombine.high %v1280_v63, %v1280_v63 }
 0x1b6   : > { %6972 = vmatpush3.bf16.msra.mxu0 %v7191_v42  ;;  %v6739_v21 = vpack.i.b16 %v1230_v11, %v1244_v16  ;;  %v1248_v24 = vunpack.i.h.s16 %v1231_v15  ;;  %v6740_v25 = vpack.i.b16 %v1231_v15, %v1246_v19  ;;  %v1310_v26 = vcombine.low %v6737_v13, %v6738_v20  ;;  %v7204_v42 = vld [vmem:[%s7886_s17 + $0x28] sm:$0xff]  }
 0x1b7   : > { %6992 = vmatpush3.bf16.msra.mxu1 %v7192_v43  ;;  %6973 = vmatprep.subr.bf16.mxu0 %v7193_v44  ;;  %v1340_v30 = vcombine.low %v1318_v22, %v1325_v23  ;;  %v7205_v43 = vld [vmem:[%s7886_s17 + $0x30] sm:$0xff]   ;;  %v1297_v10 = vcombine.high %v1287_v61, %v1287_v61  ;;  %v1298_v15 = vcombine.high %v1294_v62, %v1294_v62 }
 0x1b8   : > { %6993 = vmatprep.subr.bf16.mxu1 %v7194_v45  ;;  %v6741_v27 = vpack.i.b16 %v1222_v14, %v1248_v24  ;;  %v1311_v28 = vcombine.low %v6739_v21, %v6740_v25  ;;  %v1332_v29 = vrot.slane %v1310_v26, %v8023_v60  ;;  %v1445_v20 = vrot.slane %v1423_v7, %v8023_v60 }
 0x1b9   : > { %v1348_v34 = vrot.slane %v1340_v30, %v8023_v60  ;;  %v1472_v22 = vcombine.low %v1297_v10, %v1280_v63  ;;  %v1473_v23 = vcombine.low %v1294_v62, %v1296_v9 }
 0x1ba   : > { %6974 = vmatpush3.bf16.msra.mxu0 %v7193_v44  ;;  %v1339_v31 = vrot.slane %v1311_v28, %v8023_v60  ;;  %v1363_v32 = vrot.slane %v6741_v27, %v8023_v60  ;;  %v7206_v44 = vld [vmem:[%s7886_s17 + $0x38] sm:$0xff]   ;;  %s9218_s17 = scalar_lea.vmem %s9130_s8, %s7897_s24 }
 0x1bb   : > { %6994 = vmatpush3.bf16.msra.mxu1 %v7194_v45  ;;  %6975 = vmatprep.subr.bf16.mxu0 %v7195_v57  ;;  %v7499_v45 = vmov 0.0   ;;  %v6753_v48 = vld [vmem:[%s9218_s17] ss:$0 sm:$0xff] }
 0x1bc   : > { %6995 = vmatprep.subr.bf16.mxu1 %v7196_v59  ;;  %v1341_v33 = vcombine.low %v1332_v29, %v1339_v31  ;;  %v1370_v36 = vrot.slane %v1363_v32, %v8023_v60  ;;  %v1730_v50 = vcombine.high %v6753_v48, %v6753_v48  ;;  %v1737_v53 = vrot.slane %v6753_v48, %v8023_v60 }
 0x1be   : > { %6976 = vmatpush3.bf16.msra.mxu0 %v7195_v57  ;;  %v1355_v35 = vrot.slane %v1341_v33, %v8023_v60  ;;  %v1744_v54 = vrot.slane %v1730_v50, %v8023_v60  ;;  %v1745_v58 = vcombine.high %v1737_v53, %v1737_v53  ;;  %v1494_v33 = vrot.slane %v1472_v22, %v8023_v60 }
 0x1bf   : > { %6996 = vmatpush3.bf16.msra.mxu1 %v7196_v59  ;;  %6977 = vmatprep.subr.bf16.mxu0 %v7197_v0  ;;  %v1273_v59 = vrot.slane %v1257_v51, %v8023_v60 }
 0x1c0   : > { %6997 = vmatprep.subr.bf16.mxu1 %v7198_v2  ;;  %v1356_v38 = vcombine.low %v1348_v34, %v1355_v35  ;;  %v1746_v57 = vcombine.high %v1744_v54, %v1744_v54  ;;  %v1767_v3 = vrot.slane %v1745_v58, %v8023_v60  ;;  %v1501_v34 = vrot.slane %v1473_v23, %v8023_v60 }
 0x1c1   : > { %v1421_v4 = vcombine.low %v1273_v59, %v1287_v61  ;;  %v6751_v5 = vcombine.high %v1273_v59, %v1287_v61  ;;  %v1295_v6 = vcombine.high %v1273_v59, %v1273_v59  ;;  %v1470_v18 = vcombine.low %v1273_v59, %v1273_v59 }
 0x1c2   : > { %6978 = vmatpush3.bf16.msra.mxu0 %v7197_v0  ;;  %6979 = vmatprep.mubr.bf16.mxu0 %v1356_v38  ;;  %v1753_v0 = vrot.slane %v1737_v53, %v8023_v60  ;;  %v1774_v1 = vrot.slane %v1746_v57, %v8023_v60  ;;  %v1519_v28 = vcombine.low %v1298_v15, %v1273_v59 }
 0x1c3   : > { %6998 = vmatpush3.bf16.msra.mxu1 %v7198_v2  ;;  %7003 = vmatprep.subr.bf16.mxu0 %v7199_v8  ;;  %v1760_v2 = vrot.slane %v1744_v54, %v8023_v60  ;;  %v1431_v16 = vrot.slane %v1421_v4, %v8023_v60  ;;  %v1438_v17 = vrot.slane %v6751_v5, %v8023_v60 }
 0x1c4   : > { %6999 = vmatprep.mubr.bf16.mxu1 %v1356_v38  ;;  %7023 = vmatprep.subr.bf16.mxu1 %v7499_v45  ;;  %v1827_v11 = vcombine.low %v1753_v0, %v1767_v3  ;;  %v6762_v12 = vcombine.high %v1753_v0, %v1767_v3  ;;  %v1471_v19 = vcombine.low %v1287_v61, %v1295_v6 }
 0x1c5   : > { %6980 = vmatmul.mubr.bf16.vlgmr.msra.gmra.mrb[0].mxu0 %v1370_v36  ;;  %v1829_v13 = vcombine.low %v1760_v2, %v1774_v1  ;;  %v6763_v14 = vcombine.high %v1760_v2, %v1774_v1  ;;  %v1778_v29 = vcombine.high %v1774_v1, %v1774_v1  ;;  %v1480_v30 = vrot.slane %v1470_v18, %v8023_v60 }
 0x1c6   : > { %7000 = vmatmul.mubr.bf16.vlgmr.msra.gmra.mrb[0].mxu1 %v1370_v36  ;;  %7004 = vmatpush3.bf16.msra.mxu0 %v7199_v8  ;;  %v6752_v8 = vcombine.high %v1280_v63, %v1294_v62  ;;  %v1837_v24 = vrot.slane %v1827_v11, %v8023_v60  ;;  %v1844_v25 = vrot.slane %v6762_v12, %v8023_v60 }
 0x1c7   : > { %7019 = vmatprep.mubr.bf16.mxu0 %v1356_v38  ;;  %7005 = vmatprep.subr.bf16.mxu0 %v7200_v37  ;;  %v1851_v26 = vrot.slane %v1829_v13, %v8023_v60  ;;  %v1858_v27 = vrot.slane %v6763_v14, %v8023_v60  ;;  %v1487_v31 = vrot.slane %v1471_v19, %v8023_v60 }
 0x1c8   : > { %7025 = vmatprep.mubr.msk.bf16.mxu1 %vm7500_vm2, %v7499_v45  ;;  %v1452_v21 = vrot.slane %v6752_v8, %v8023_v60  ;;  %v1775_v32 = vcombine.high %v1753_v0, %v1753_v0  ;;  %v1776_v35 = vcombine.high %v1760_v2, %v1760_v2  ;;  %v1503_v47 = vcombine.low %v1494_v33, %v1501_v34 }
 0x1ca   : > { %7006 = vmatpush3.bf16.msra.mxu0 %v7200_v37  ;;  %v1453_v37 = vcombine.low %v1431_v16, %v1438_v17  ;;  %v1454_v38 = vcombine.low %v1445_v20, %v1452_v21  ;;  %v1877_v48 = vcombine.low %v1767_v3, %v1775_v32  ;;  %v1879_v50 = vcombine.low %v1774_v1, %v1776_v35 }
 0x1cb   : > { %7007 = vmatprep.subr.bf16.mxu0 %v7201_v39  ;;  %v1517_v59 = vrot.slane %v1503_v47, %v8023_v60 }
 0x1cc   : > { %v1461_v51 = vrot.slane %v1453_v37, %v8023_v60  ;;  %v1468_v52 = vrot.slane %v1454_v38, %v8023_v60  ;;  %v1893_v61 = vrot.slane %v1877_v48, %v8023_v60  ;;  %v1907_v63 = vrot.slane %v1879_v50, %v8023_v60 }
 0x1ce   : > { %7008 = vmatpush3.bf16.msra.mxu0 %v7201_v39  ;;  %v1859_v39 = vcombine.low %v1837_v24, %v1844_v25 }
 0x1cf   : > { %7009 = vmatprep.subr.bf16.mxu0 %v7202_v40 }
 0x1d0   : > { %v1867_v53 = vrot.slane %v1859_v39, %v8023_v60 }
 0x1d2   : > { %7010 = vmatpush3.bf16.msra.mxu0 %v7202_v40  ;;  %v1860_v40 = vcombine.low %v1851_v26, %v1858_v27 }
 0x1d3   : > { %7011 = vmatprep.subr.bf16.mxu0 %v7203_v41 }
 0x1d4   : > { %v1874_v54 = vrot.slane %v1860_v40, %v8023_v60 }
 0x1d6   : > { %7012 = vmatpush3.bf16.msra.mxu0 %v7203_v41  ;;  %v1526_v41 = vrot.slane %v1519_v28, %v8023_v60  ;;  %v1875_v1 = vcombine.low %v1867_v53, %v1874_v54 }
 0x1d7   : > { %7013 = vmatprep.subr.bf16.mxu0 %v7204_v42 }
 0x1d8   : > { %v1533_v55 = vrot.slane %v1526_v41, %v8023_v60 }
 0x1da   : > { %7014 = vmatpush3.bf16.msra.mxu0 %v7204_v42  ;;  %v1925_v42 = vcombine.low %v1778_v29, %v1753_v0 }
 0x1db   : > { %7015 = vmatprep.subr.bf16.mxu0 %v7205_v43 }
 0x1dc   : > { %v1932_v56 = vrot.slane %v1925_v42, %v8023_v60 }
 0x1de   : > { %7016 = vmatpush3.bf16.msra.mxu0 %v7205_v43  ;;  %v1502_v43 = vcombine.low %v1480_v30, %v1487_v31 }
 0x1df   : > { %7017 = vmatprep.subr.bf16.mxu0 %v7206_v44 }
 0x1e0   : > { %v1510_v57 = vrot.slane %v1502_v43, %v8023_v60 }
 0x1e2   : > { %7018 = vmatpush3.bf16.msra.mxu0 %v7206_v44  ;;  %v1876_v44 = vcombine.low %v1753_v0, %v1753_v0  ;;  %v1469_v0 = vcombine.low %v1461_v51, %v1468_v52  ;;  %v1518_v8 = vcombine.low %v1510_v57, %v1517_v59 }
 0x1e4   : > { %v1886_v58 = vrot.slane %v1876_v44, %v8023_v60 }
 0x1e5   : > { %7020 = vmatmul.mubr.bf16.vlgmr.msra.gmra.mrb[4].mxu0 %v1370_v36  ;;  %v1777_v36 = vcombine.high %v1767_v3, %v1767_v3  ;;  %v1939_v3 = vrot.slane %v1932_v56, %v8023_v60 }
 0x1e6   : > { %v1908_v9 = vcombine.low %v1886_v58, %v1893_v61 }
 0x1e7   : > { %v1878_v49 = vcombine.low %v1777_v36, %v1760_v2 }
 0x1e8   : > { %v1916_v24 = vrot.slane %v1908_v9, %v8023_v60 }
 0x1e9   : > { %v1900_v62 = vrot.slane %v1878_v49, %v8023_v60 }
 0x1eb   : > { %v1909_v10 = vcombine.low %v1900_v62, %v1907_v63 }
 0x1ed   : > { %v1923_v25 = vrot.slane %v1909_v10, %v8023_v60 }
 0x1ef   : > { %v1924_v42 = vcombine.low %v1916_v24, %v1923_v25 }
 0x298   : > { %v6981_v2 = vpop.f32.mrb[0].mxu0 }
 0x299   : > { %v7001_v4 = vpop.f32.mrb[0].mxu1  ;;  %v1580_v5 = vadd.f32 %v6981_v2, %v1533_v55  ;;  %v1571_v6 = vpop.f32.mrb[1].mxu0 }
 0x29a   : > { %v1977_v7 = vpop.f32.mrb[1].mxu1  ;;  %v1572_v11 = vadd.f32 %v1571_v6, %v1469_v0  ;;  %v6982_v13 = vpop.f32.mrb[2].mxu0  ;;  %v1986_v22 = vadd.f32 %v7001_v4, %v1939_v3 }
 0x29b   : > { %v1978_v12 = vadd.f32 %v1977_v7, %v1875_v1  ;;  %v7002_v14 = vpop.f32.mrb[2].mxu1  ;;  %v1692_v15 = vrot.slane %v1580_v5, %v8023_v60  ;;  %v1574_v16 = vpop.f32.mrb[3].mxu0 }
 0x29c   : > { %v1980_v17 = vpop.f32.mrb[3].mxu1  ;;  %v1588_v18 = vcombine.high %v1572_v11, %v1572_v11  ;;  %v1595_v19 = vrot.slane %v1572_v11, %v8023_v60  ;;  %v1575_v23 = vadd.f32 %v1574_v16, %v1518_v8  ;;  %v2098_v36 = vrot.slane %v1986_v22, %v8023_v60 }
 0x29d   : > { %v1994_v20 = vcombine.high %v1978_v12, %v1978_v12  ;;  %v2001_v21 = vrot.slane %v1978_v12, %v8023_v60  ;;  %v1693_v30 = vcombine.high %v1692_v15, %v1692_v15  ;;  %v8133_v43 = vrot.slane %v1692_v15, %v8023_v60 }
 0x29e   : > { %v1602_v26 = vrot.slane %v1588_v18, %v8023_v60  ;;  %v1603_v27 = vcombine.high %v1595_v19, %v1595_v19  ;;  %v8111_v28 = vrot.slane %v1595_v19, %v8023_v60  ;;  %v1637_v32 = vcombine.high %v1575_v23, %v1575_v23 }
 0x29f   : > { %v2008_v29 = vrot.slane %v1994_v20, %v8023_v60  ;;  %v2009_v31 = vcombine.high %v2001_v21, %v2001_v21  ;;  %v8121_v37 = vrot.slane %v2001_v21, %v8023_v60  ;;  %v1644_v39 = vrot.slane %v1575_v23, %v8023_v60 }
 0x2a0   : > { %v1604_v33 = vcombine.high %v1602_v26, %v1602_v26  ;;  %v8115_v34 = vrot.slane %v1603_v27, %v8023_v60  ;;  %2520 = vrot.lane.b32.xlu1 %v8111_v28, %s7501_s5  ;;  %v8136_v44 = vrot.slane %v1693_v30, %v8023_v60  ;;  %v2099_v47 = vcombine.high %v2098_v36, %v2098_v36 }
 0x2a1   : > { %v2010_v35 = vcombine.high %v2008_v29, %v2008_v29  ;;  %v8124_v38 = vrot.slane %v2009_v31, %v8023_v60  ;;  %v1651_v48 = vrot.slane %v1637_v32, %v8023_v60  ;;  %v8140_v49 = vrot.slane %v1602_v26, %v8023_v60 }
 0x2a2   : > { %v8128_v40 = vrot.slane %v1604_v33, %v8023_v60  ;;  %v2556_v41 = vcombine.low %v8111_v28, %v8115_v34  ;;  %v6775_v50 = vcombine.high %v8111_v28, %v8115_v34  ;;  %v8145_v51 = vrot.slane %v2008_v29, %v8023_v60 }
 0x2a3   : > { %v8148_v52 = vrot.slane %v2010_v35, %v8023_v60  ;;  %v2856_v53 = vcombine.low %v8121_v37, %v8124_v38  ;;  %v6777_v54 = vcombine.high %v8121_v37, %v8124_v38  ;;  %v1652_v55 = vcombine.high %v1644_v39, %v1644_v39 }
 0x2a4   : > { %v1653_v56 = vcombine.high %v1651_v48, %v1651_v48  ;;  %v2558_v57 = vcombine.low %v8140_v49, %v8128_v40  ;;  %v6776_v58 = vcombine.high %v8140_v49, %v8128_v40  ;;  %v8159_v59 = vrot.slane %v2556_v41, %v8023_v60 }
 0x2a5   : > { %v8162_v61 = vrot.slane %v1644_v39, %v8023_v60  ;;  %v8165_v62 = vrot.slane %v1651_v48, %v8023_v60  ;;  %v8168_v63 = vrot.slane %v1652_v55, %v8023_v60  ;;  %v1981_v1 = vadd.f32 %v1980_v17, %v1924_v42 }
 0x2a6   : > { %v8171_v0 = vrot.slane %v1653_v56, %v8023_v60  ;;  %v8174_v2 = vrot.slane %v6775_v50, %v8023_v60  ;;  %v2858_v3 = vcombine.low %v8145_v51, %v8148_v52  ;;  %v2106_v4 = vrot.slane %v2098_v36, %v8023_v60 }
 0x2a7   : > { %v8180_v5 = vrot.slane %v2099_v47, %v8023_v60  ;;  %v8184_v6 = vcombine.high %v8165_v62, %v8165_v62  ;;  %v8188_v7 = vcombine.high %v8168_v63, %v8168_v63  ;;  %v2043_v9 = vcombine.high %v1981_v1, %v1981_v1 }
 0x2a8   : > { %v8192_v8 = vcombine.high %v8171_v0, %v8171_v0  ;;  %v8195_v10 = vrot.slane %v2558_v57, %v8023_v60  ;;  %v6778_v11 = vcombine.high %v8145_v51, %v8148_v52  ;;  %v8201_v12 = vcombine.high %v8162_v61, %v8162_v61  ;;  %2852 = vrot.lane.b32.xlu0 %v2106_v4, %s7501_s5 }
 0x2a9   : > { %v2050_v13 = vrot.slane %v1981_v1, %v8023_v60  ;;  %v2620_v14 = vcombine.low %v8188_v7, %v8165_v62  ;;  %v2621_v15 = vcombine.low %v8171_v0, %v8184_v6  ;;  %v2057_v17 = vrot.slane %v2043_v9, %v8023_v60  ;;  %2854 = vrot.lane.b32.xlu1 %v8180_v5, %s7501_s5 }
 0x2aa   : > { %v2622_v16 = vcombine.low %v8192_v8, %v8133_v43  ;;  %v2587_v18 = vrot.slane %v6776_v58, %v8023_v60  ;;  %v2611_v19 = vrot.slane %v8162_v61, %v8023_v60  ;;  %v2039_v25 = vcombine.high %v8121_v37, %v8121_v37 }
 0x2ab   : > { %v2058_v20 = vcombine.high %v2050_v13, %v2050_v13  ;;  %v2066_v21 = vrot.slane %v2050_v13, %v8023_v60  ;;  %v2643_v22 = vrot.slane %v2621_v15, %v8023_v60  ;;  %v2059_v24 = vcombine.high %v2057_v17, %v2057_v17 }
 0x2ac   : > { %v2650_v23 = vrot.slane %v2622_v16, %v8023_v60  ;;  %v2619_v26 = vcombine.low %v8168_v63, %v8201_v12  ;;  %v8225_v27 = vrot.slane %v2057_v17, %v8023_v60  ;;  %2820 = vrot.lane.b32.xlu0 %v8121_v37, %s7501_s5  ;;  %v2636_v31 = vrot.slane %v2620_v14, %v8023_v60 }
 0x2ad   : > { %v8228_v29 = vrot.slane %v2058_v20, %v8023_v60  ;;  %v8230_v30 = vcombine.high %v2066_v21, %v2066_v21  ;;  %v8236_v33 = vrot.slane %v2059_v24, %v8023_v60  ;;  %2824 = vrot.lane.b32.xlu1 %v2039_v25, %s7501_s5  ;;  %v1633_v35 = vcombine.high %v8111_v28, %v8111_v28 }
 0x2ae   : > { %v2652_v32 = vcombine.low %v2643_v22, %v2650_v23  ;;  %v8243_v36 = vcombine.high %v8225_v27, %v8225_v27  ;;  %v7168_v41 = vpack.i.bf16 %v8162_v61, %v2066_v21  ;;  %v2866_v47 = vrot.slane %v2856_v53, %v8023_v60 }
 0x2af   : > { %v8247_v39 = vcombine.high %v8228_v29, %v8228_v29  ;;  %v2919_v37 = vcombine.low %v8228_v29, %v8230_v30  ;;  %v8254_v42 = vcombine.high %v8236_v33, %v8236_v33  ;;  %v2873_v28 = vrot.slane %v6777_v54, %v8023_v60 }
 0x2b0   : > { %v2880_v48 = vrot.slane %v2858_v3, %v8023_v60  ;;  %v2629_v50 = vrot.slane %v2619_v26, %v8023_v60  ;;  %v2921_v56 = vcombine.low %v8236_v33, %v8243_v36  ;;  %2822 = vrot.lane.b32.xlu0 %v8124_v38, %s7501_s5  ;;  %v2887_v57 = vrot.slane %v6778_v11, %v8023_v60 }
 0x2b1   : > { %v2920_v55 = vcombine.low %v8247_v39, %v8225_v27  ;;  %v2588_v53 = vcombine.low %v8159_v59, %v8174_v2  ;;  %v2911_v54 = vrot.slane %v2066_v21, %v8023_v60  ;;  %v2922_v58 = vcombine.low %v8254_v42, %v2106_v4  ;;  %2524 = vrot.lane.b32.xlu1 %v1633_v35, %s7501_s5 }
 0x2b2   : > { %v2888_v61 = vcombine.low %v2866_v47, %v2873_v28  ;;  %v2651_v1 = vcombine.low %v2629_v50, %v2636_v31  ;;  %v2929_v3 = vrot.slane %v2919_v37, %v8023_v60  ;;  %v2889_v13 = vcombine.low %v2880_v48, %v2887_v57 }
 0x2b3   : > { %v2936_v9 = vrot.slane %v2920_v55, %v8023_v60  ;;  %v2674_v14 = vrot.slane %v8136_v44, %v8023_v60  ;;  %v2943_v11 = vrot.slane %v2921_v56, %v8023_v60  ;;  %v2950_v59 = vrot.slane %v2922_v58, %v8023_v60 }
 0x2b4   : > { %v2589_v2 = vcombine.low %v8195_v10, %v2587_v18  ;;  %v2618_v4 = vrot.slane %v2611_v19, %v8023_v60  ;;  %2828 = vrot.lane.b32.xlu0 %v8145_v51, %s7501_s5  ;;  %v2896_v15 = vrot.slane %v2888_v61, %v8023_v60  ;;  %v2903_v16 = vrot.slane %v2889_v13, %v8023_v60 }
 0x2b5   : > { %v2951_v17 = vcombine.low %v2929_v3, %v2936_v9  ;;  %v2952_v20 = vcombine.low %v2943_v11, %v2950_v59  ;;  %v2974_v21 = vrot.slane %v8180_v5, %v8023_v60  ;;  %2528 = vrot.lane.b32.xlu1 %v8140_v49, %s7501_s5  ;;  %v2596_v22 = vrot.slane %v2588_v53, %v8023_v60 }
 0x2b6   : > { %v2603_v10 = vrot.slane %v2589_v2, %v8023_v60  ;;  %v2904_v18 = vcombine.low %v2896_v15, %v2903_v16  ;;  %v2918_v19 = vrot.slane %v2911_v54, %v8023_v60  ;;  %v2659_v23 = vrot.slane %v2651_v1, %v8023_v60 }
 0x2b7   : > { %v2666_v24 = vrot.slane %v2652_v32, %v8023_v60  ;;  %v2041_v25 = vcombine.high %v8124_v38, %v8124_v38  ;;  %v2959_v5 = vrot.slane %v2951_v17, %v8023_v60  ;;  %v2966_v31 = vrot.slane %v2952_v20, %v8023_v60 }
 0x2b8   : > { %v2604_v26 = vcombine.low %v2596_v22, %v2603_v10  ;;  %v2681_v35 = vrot.slane %v2674_v14, %v8023_v60  ;;  %7169 = vrot.lane.b32.xlu0 %v7168_v41, %s7501_s5  ;;  %v3116_v37 = vpack.c.bf16 %v2918_v19, %v2904_v18  ;;  %v2981_v32 = vrot.slane %v2974_v21, %v8023_v60  ;;  %v8387_v9 = vpop.f32.mrb[4].mxu0 }
 0x2b9   : > { %v2667_v47 = vcombine.low %v2659_v23, %v2666_v24  ;;  %2826 = vrot.lane.b32.xlu1 %v2041_v25, %s7501_s5  ;;  %v2967_v48 = vcombine.low %v2959_v5, %v2966_v31  ;;  %v2040_v41 = vcombine.high %v8145_v51, %v8145_v51  ;;  %v1634_v56 = vcombine.high %v8140_v49, %v8140_v49  ;;  %v6764_v49 = vld [vmem:[%s9219_s16] ss:$0 sm:$0xff]  ;;  %v2383_v11 = vpop.f32.mrb[5].mxu0 }
 0x2ba   : > { %v2816_v28 = vpack.c.bf16 %v2618_v4, %v2604_v26  ;;  %v3425_v50 = vsel %vm3420_vm3, %v3116_v37, 0  ;;  %v1635_v53 = vcombine.high %v8115_v34, %v8115_v34  ;;  %v1636_v51 = vcombine.high %v8128_v40, %v8128_v40  ;;  %v7022_v59 = vpop.f32.mrb[6].mxu0 }
 0x2bb   : > { %v2817_v38 = vpack.c.bf16 %v2681_v35, %v2667_v47  ;;  %7024 = vmatpush3.bf16.xpose.msra.mxu1 %v3425_v50  ;;  %v3117_v55 = vpack.c.bf16 %v2981_v32, %v2967_v48  ;;  %v8421_v35 = vpop.f32.mrb[7].mxu0 }
 0x2bc   : > { %2522 = vrot.lane.b32.xlu0 %v8115_v34, %s7501_s5  ;;  %7029 = vmatprep.subr.bf16.mxu1 %v7499_v45  ;;  %v2042_v34 = vcombine.high %v8148_v52, %v8148_v52 }
 0x2bd   : > { %2830 = vrot.lane.b32.xlu1 %v8148_v52, %s7501_s5  ;;  %v3472_v57 = vsel %vm3420_vm3, %v3117_v55, 0  ;;  %v2136_v52 = vcombine.high %v6764_v49, %v6764_v49 }
 0x2c0   : > { %2832 = vrot.lane.b32.xlu0 %v2040_v41, %s7501_s5 }
 0x2c1   : > { %2532 = vrot.lane.b32.xlu1 %v1634_v56, %s7501_s5 }
 0x2c2   : > { %7026 = vmatmul.mubr.msk.bf16.vlgmr.msra.gmra.mrb[4].mxu1 %vm3420_vm3, %v2816_v28 }
 0x2c3   : > { %7030 = vmatpush3.bf16.xpose.msra.mxu1 %v3472_v57  ;;  %7031 = vmatprep.mubr.msk.bf16.mxu1 %vm7500_vm2, %v7499_v45 }
 0x2c4   : > { %2526 = vrot.lane.b32.xlu0 %v1635_v53, %s7501_s5  ;;  %7035 = vmatprep.subr.bf16.mxu1 %v7499_v45 }
 0x2c5   : > { %2838 = vrot.lane.b32.xlu1 %v8228_v29, %s7501_s5 }
 0x2c8   : > { %2530 = vrot.lane.b32.xlu0 %v8128_v40, %s7501_s5 }
 0x2c9   : > { %2540 = vrot.lane.b32.xlu1 %v8201_v12, %s7501_s5  ;;  %v2150_v12 = vrot.slane %v2136_v52, %v8023_v60 }
 0x2ca   : > { %7032 = vmatmul.mubr.msk.bf16.vlgmr.msra.gmra.mrb[8].mxu1 %vm3420_vm3, %v2817_v38 }
 0x2cb   : > { %7037 = vmatprep.mubr.msk.bf16.mxu1 %vm7500_vm2, %v7499_v45 }
 0x2cc   : > { %2840 = vrot.lane.b32.xlu0 %v8230_v30, %s7501_s5  ;;  %v8364_v30 = vrot.slane %v2150_v12, %v8023_v60 }
 0x2cd   : > { %2544 = vrot.lane.b32.xlu1 %v8165_v62, %s7501_s5  ;;  %v2143_v62 = vrot.slane %v6764_v49, %v8023_v60 }
 0x2cf   : > { %v8358_v29 = vrot.slane %v2143_v62, %v8023_v60 }
 0x2d0   : > { %2844 = vrot.lane.b32.xlu0 %v8225_v27, %s7501_s5  ;;  %v2151_v27 = vcombine.high %v2143_v62, %v2143_v62 }
 0x2d1   : > { %2834 = vrot.lane.b32.xlu1 %v2042_v34, %s7501_s5 }
 0x2d4   : > { %2538 = vrot.lane.b32.xlu0 %v8168_v63, %s7501_s5  ;;  %v2152_v63 = vcombine.high %v2150_v12, %v2150_v12 }
 0x2d5   : > { %2842 = vrot.lane.b32.xlu1 %v8247_v39, %s7501_s5  ;;  %v8367_v39 = vrot.slane %v2151_v27, %v8023_v60 }
 0x2d6   : > { %v8361_v40 = vrot.slane %v2152_v63, %v8023_v60 }
 0x2d8   : > { %2534 = vrot.lane.b32.xlu0 %v1636_v51, %s7501_s5  ;;  %v2235_v54 = vcombine.low %v8364_v30, %v8361_v40  ;;  %v6774_v58 = vcombine.high %v8364_v30, %v8361_v40 }
 0x2d9   : > { %2846 = vrot.lane.b32.xlu1 %v8236_v33, %s7501_s5  ;;  %v2233_v33 = vcombine.low %v8358_v29, %v8367_v39 }
 0x2da   : > { %v2264_v3 = vrot.slane %v6774_v58, %v8023_v60 }
 0x2db   : > { %v2243_v61 = vrot.slane %v2233_v33, %v8023_v60 }
 0x2dc   : > { %2848 = vrot.lane.b32.xlu0 %v8243_v36, %s7501_s5  ;;  %v6773_v36 = vcombine.high %v8358_v29, %v8367_v39 }
 0x2dd   : > { %2850 = vrot.lane.b32.xlu1 %v8254_v42, %s7501_s5  ;;  %v2257_v42 = vrot.slane %v2235_v54, %v8023_v60  ;;  %v2181_v54 = vcombine.high %v8358_v29, %v8358_v29 }
 0x2de   : > { %v2250_v1 = vrot.slane %v6773_v36, %v8023_v60 }
 0x2df   : > { %v2266_v14 = vcombine.low %v2257_v42, %v2264_v3  ;;  %v2183_v42 = vcombine.high %v8367_v39, %v8367_v39 }
 0x2e0   : > { %2542 = vrot.lane.b32.xlu0 %v8188_v7, %s7501_s5  ;;  %v2265_v13 = vcombine.low %v2243_v61, %v2250_v1  ;;  %v2182_v1 = vcombine.high %v8364_v30, %v8364_v30 }
 0x2e1   : > { %2548 = vrot.lane.b32.xlu1 %v8184_v6, %s7501_s5  ;;  %v2280_v2 = vrot.slane %v2266_v14, %v8023_v60  ;;  %v2283_v14 = vcombine.low %v8367_v39, %v2181_v54 }
 0x2e2   : > { %v2273_v7 = vrot.slane %v2265_v13, %v8023_v60  ;;  %v2282_v13 = vcombine.low %v8358_v29, %v8358_v29 }
 0x2e4   : > { %2546 = vrot.lane.b32.xlu0 %v8171_v0, %s7501_s5  ;;  %v2281_v4 = vcombine.low %v2273_v7, %v2280_v2  ;;  %v2284_v7 = vcombine.low %v2183_v42, %v8364_v30  ;;  %v2285_v2 = vcombine.low %v8361_v40, %v2182_v1 }
 0x2e5   : > { %2552 = vrot.lane.b32.xlu1 %v8133_v43, %s7501_s5 }
 0x2e6   : > { %v2384_v6 = vadd.f32 %v2383_v11, %v2281_v4  ;;  %v2313_v39 = vrot.slane %v2285_v2, %v8023_v60 }
 0x2e8   : > { %2550 = vrot.lane.b32.xlu0 %v8192_v8, %s7501_s5  ;;  %v2400_v15 = vcombine.high %v2384_v6, %v2384_v6  ;;  %v2407_v16 = vrot.slane %v2384_v6, %v8023_v60 }
 0x2ea   : > { %v2415_v17 = vcombine.high %v2407_v16, %v2407_v16  ;;  %v2423_v0 = vrot.slane %v2407_v16, %v8023_v60  ;;  %v2414_v20 = vrot.slane %v2400_v15, %v8023_v60  ;;  %v2292_v15 = vrot.slane %v2282_v13, %v8023_v60 }
 0x2eb   : > { %v2299_v16 = vrot.slane %v2283_v14, %v8023_v60 }
 0x2ec   : > { %2554 = vrot.lane.b32.xlu0 %v8136_v44, %s7501_s5  ;;  %v2437_v21 = vrot.slane %v2415_v17, %v8023_v60  ;;  %v2416_v22 = vcombine.high %v2414_v20, %v2414_v20  ;;  %v2445_v8 = vcombine.high %v2423_v0, %v2423_v0  ;;  %v2430_v19 = vrot.slane %v2414_v20, %v8023_v60 }
 0x2ee   : > { %v3156_v43 = vcombine.low %v2423_v0, %v2437_v21  ;;  %v6779_v10 = vcombine.high %v2423_v0, %v2437_v21  ;;  %3122 = vrot.lane.b32.xlu1 %v2437_v21, %s7501_s5  ;;  %v2447_v18 = vcombine.high %v2437_v21, %v2437_v21  ;;  %v8409_v44 = vrot.slane %v2416_v22, %v8023_v60 }
 0x2ef   : > { %v2446_v23 = vcombine.high %v2430_v19, %v2430_v19  ;;  %v2306_v21 = vrot.slane %v2284_v7, %v8023_v60 }
 0x2f0   : > { %3120 = vrot.lane.b32.xlu0 %v2423_v0, %s7501_s5  ;;  %v3166_v41 = vrot.slane %v3156_v43, %v8023_v60  ;;  %v3173_v56 = vrot.slane %v6779_v10, %v8023_v60  ;;  %v3158_v57 = vcombine.low %v2430_v19, %v8409_v44  ;;  %v6780_v53 = vcombine.high %v2430_v19, %v8409_v44 }
 0x2f2   : > { %3124 = vrot.lane.b32.xlu1 %v2445_v8, %s7501_s5  ;;  %v3180_v51 = vrot.slane %v3158_v57, %v8023_v60  ;;  %v3187_v52 = vrot.slane %v6780_v53, %v8023_v60  ;;  %v3188_v62 = vcombine.low %v3166_v41, %v3173_v56 }
 0x2f4   : > { %3126 = vrot.lane.b32.xlu0 %v2447_v18, %s7501_s5  ;;  %v3189_v12 = vcombine.low %v3180_v51, %v3187_v52  ;;  %v8436_v63 = vrot.slane %v3188_v62, %v8023_v60  ;;  %v2314_v18 = vcombine.low %v2292_v15, %v2299_v16 }
 0x2f6   : > { %3128 = vrot.lane.b32.xlu1 %v2430_v19, %s7501_s5  ;;  %v8441_v36 = vrot.slane %v3189_v12, %v8023_v60 }
 0x2f8   : > { %3130 = vrot.lane.b32.xlu0 %v8409_v44, %s7501_s5  ;;  %v3204_v58 = vcombine.low %v8436_v63, %v8441_v36 }
 0x2fa   : > { %3132 = vrot.lane.b32.xlu1 %v2446_v23, %s7501_s5 }
 0x312   : > { %v8415_v24 = vpop.permute.xlu1 %2520 }
 0x31a   : > { %v8417_v25 = vpop.permute.xlu0 %2852 }
 0x31b   : > { %v8419_v26 = vpop.permute.xlu1 %2854 }
 0x31e   : > { %v2821_v5 = vpop.permute.xlu0 %2820 }
 0x31f   : > { %v2825_v31 = vpop.permute.xlu1 %2824 }
 0x322   : > { %v2823_v37 = vpop.permute.xlu0 %2822 }
 0x323   : > { %v2525_v47 = vpop.permute.xlu1 %2524  ;;  %v2982_v6 = vcombine.low %v2821_v5, %v2823_v37  ;;  %v2315_v37 = vcombine.low %v2306_v21, %v2313_v39 }
 0x325   : > { %v2992_v30 = vrot.slane %v2982_v6, %v8023_v60  ;;  %v2329_v62 = vrot.slane %v2315_v37, %v8023_v60 }
 0x326   : > { %v2829_v28 = vpop.permute.xlu0 %2828 }
 0x327   : > { %v8423_v48 = vpop.permute.xlu1 %2528 }
 0x32a   : > { %v8425_v32 = vpop.permute.xlu0 %7169 }
 0x32b   : > { %v2827_v50 = vpop.permute.xlu1 %2826  ;;  %v7171_v43 = vunpack.i.l.bf16 %v8425_v32 }
 0x32c   : > { %v2983_v11 = vcombine.low %v2825_v31, %v2827_v50 }
 0x32e   : > { %v2523_v38 = vpop.permute.xlu0 %2522  ;;  %v2999_v17 = vrot.slane %v2983_v11, %v8023_v60 }
 0x32f   : > { %v2831_v55 = vpop.permute.xlu1 %2830 }
 0x330   : > { %v2984_v0 = vcombine.low %v2829_v28, %v2831_v55  ;;  %v3014_v19 = vcombine.low %v2992_v30, %v2999_v17  ;;  %v2682_v28 = vcombine.low %v8415_v24, %v2523_v38  ;;  %v3037_v55 = vrot.slane %v7171_v43, %v8023_v60 }
 0x332   : > { %v2833_v34 = vpop.permute.xlu0 %2832  ;;  %v3006_v23 = vrot.slane %v2984_v0, %v8023_v60  ;;  %v3022_v53 = vrot.slane %v3014_v19, %v8023_v60  ;;  %v2692_v24 = vrot.slane %v2682_v28, %v8023_v60  ;;  %v3044_v54 = vrot.slane %v3037_v55, %v8023_v60 }
 0x333   : > { %v8431_v49 = vpop.permute.xlu1 %2532 }
 0x336   : > { %v2527_v27 = vpop.permute.xlu0 %2526 }
 0x337   : > { %v8438_v33 = vpop.permute.xlu1 %2838  ;;  %v2683_v8 = vcombine.low %v2525_v47, %v2527_v27  ;;  %v2322_v47 = vrot.slane %v2314_v18, %v8023_v60  ;;  %v7172_v27 = vunpack.i.h.bf16 %v8425_v32 }
 0x339   : > { %v2699_v56 = vrot.slane %v2683_v8, %v8023_v60  ;;  %v2330_v2 = vcombine.low %v2322_v47, %v2329_v62  ;;  %v2737_v32 = vrot.slane %v7172_v27, %v8023_v60  ;;  %v7502_v27 = vmov 65535  }
 0x33a   : > { %v2531_v61 = vpop.permute.xlu0 %2530 }
 0x33b   : > { %v8451_v3 = vpop.permute.xlu1 %2540  ;;  %v2684_v57 = vcombine.low %v8423_v48, %v2531_v61  ;;  %v2714_v1 = vcombine.low %v2692_v24, %v2699_v56  ;;  %v8497_v30 = vadd.f32 %v8421_v35, %v2330_v2  ;;  %v2744_v8 = vrot.slane %v2737_v32, %v8023_v60 }
 0x33d   : > { %v2706_v42 = vrot.slane %v2684_v57, %v8023_v60  ;;  %v2722_v17 = vrot.slane %v2714_v1, %v8023_v60  ;;  %v8504_v19 = vrot.slane %v8497_v30, %v8023_v60 }
 0x33e   : > { %v2841_v59 = vpop.permute.xlu0 %2840 }
 0x33f   : > { %v8458_v4 = vpop.permute.xlu1 %2544  ;;  %v3045_v48 = vcombine.low %v8438_v33, %v2841_v59 }
 0x341   : > { %v3055_v16 = vrot.slane %v3045_v48, %v8023_v60 }
 0x342   : > { %v2845_v20 = vpop.permute.xlu0 %2844 }
 0x343   : > { %v2835_v22 = vpop.permute.xlu1 %2834 }
 0x344   : > { %v2985_v10 = vcombine.low %v2833_v34, %v2835_v22 }
 0x346   : > { %v8468_v5 = vpop.permute.xlu0 %2538  ;;  %v3013_v31 = vrot.slane %v2985_v10, %v8023_v60  ;;  %v3100_v10 = vrot.slane %v8419_v26, %v8023_v60 }
 0x347   : > { %v2843_v50 = vpop.permute.xlu1 %2842  ;;  %v2745_v26 = vcombine.low %v8468_v5, %v8451_v3 }
 0x348   : > { %v3015_v41 = vcombine.low %v3006_v23, %v3013_v31  ;;  %v3046_v52 = vcombine.low %v2843_v50, %v2845_v20  ;;  %v8511_v50 = vrot.slane %v8504_v19, %v8023_v60  ;;  %v3107_v55 = vrot.slane %v3100_v10, %v8023_v60 }
 0x34a   : > { %v3029_v34 = vrot.slane %v3015_v41, %v8023_v60  ;;  %v2535_v51 = vpop.permute.xlu0 %2534  ;;  %v3062_v14 = vrot.slane %v3046_v52, %v8023_v60 }
 0x34b   : > { %v2685_v38 = vcombine.low %v8431_v49, %v2535_v51  ;;  %v2847_v12 = vpop.permute.xlu1 %2846  ;;  %v2755_v51 = vrot.slane %v2745_v26, %v8023_v60 }
 0x34c   : > { %v3030_v61 = vcombine.low %v3022_v53, %v3029_v34  ;;  %v3077_v20 = vcombine.low %v3055_v16, %v3062_v14 }
 0x34d   : > { %v2713_v13 = vrot.slane %v2685_v38, %v8023_v60 }
 0x34e   : > { %v2849_v11 = vpop.permute.xlu0 %2848  ;;  %v3118_v7 = vpack.c.bf16 %v3044_v54, %v3030_v61  ;;  %v3085_v37 = vrot.slane %v3077_v20, %v8023_v60  ;;  %v3708_v54 = vsel %vm3706_vm4, 4294967295, %v7502_v27 }
 0x34f   : > { %v2715_v6 = vcombine.low %v2706_v42, %v2713_v13  ;;  %v3047_v49 = vcombine.low %v2847_v12, %v2849_v11  ;;  %v2851_v15 = vpop.permute.xlu1 %2850  ;;  %v8534_v14 = vsel %vm3707_vm5, %v3708_v54, 0 }
 0x350   : > { %v3048_v33 = vcombine.low %v2851_v15, %v8417_v25  ;;  %v3519_v59 = vsel %vm3420_vm3, %v3118_v7, 0 }
 0x351   : > { %v2729_v0 = vrot.slane %v2715_v6, %v8023_v60  ;;  %7036 = vmatpush3.bf16.xpose.msra.mxu1 %v3519_v59  ;;  %v3069_v21 = vrot.slane %v3047_v49, %v8023_v60 }
 0x352   : > { %v2543_v39 = vpop.permute.xlu0 %2542  ;;  %v3076_v22 = vrot.slane %v3048_v33, %v8023_v60  ;;  %7041 = vmatprep.subr.bf16.mxu1 %v7499_v45 }
 0x353   : > { %v2730_v43 = vcombine.low %v2722_v17, %v2729_v0  ;;  %v2549_v25 = vpop.permute.xlu1 %2548  ;;  %v2746_v23 = vcombine.low %v2543_v39, %v8458_v4  ;;  %v3211_v4 = vrot.slane %v8511_v50, %v8023_v60 }
 0x354   : > { %v3078_v18 = vcombine.low %v3069_v21, %v3076_v22 }
 0x355   : > { %v2818_v31 = vpack.c.bf16 %v2744_v8, %v2730_v43  ;;  %v2762_v57 = vrot.slane %v2746_v23, %v8023_v60  ;;  %v3218_v52 = vrot.slane %v3211_v4, %v8023_v60  ;;  %v2449_v4 = vcombine.high %v8497_v30, %v8497_v30 }
 0x356   : > { %v3092_v35 = vrot.slane %v3078_v18, %v8023_v60  ;;  %v2547_v28 = vpop.permute.xlu0 %2546 }
 0x357   : > { %v2553_v41 = vpop.permute.xlu1 %2552  ;;  %v2747_v47 = vcombine.low %v2547_v28, %v2549_v25  ;;  %v2777_v62 = vcombine.low %v2755_v51, %v2762_v57  ;;  %v3416_v1 = vpack.c.bf16 %v3218_v52, %v3204_v58  ;;  %v2448_v51 = vcombine.high %v8409_v44, %v8409_v44 }
 0x358   : > { %7038 = vmatmul.mubr.msk.bf16.vlgmr.msra.gmra.mrb[12].mxu1 %vm3420_vm3, %v2818_v31  ;;  %v3093_v56 = vcombine.low %v3085_v37, %v3092_v35 }
 0x359   : > { %7043 = vmatprep.mubr.msk.bf16.mxu1 %vm7500_vm2, %v7499_v45  ;;  %v2769_v24 = vrot.slane %v2747_v47, %v8023_v60  ;;  %v2785_v42 = vrot.slane %v2777_v62, %v8023_v60  ;;  %v3711_v15 = vand.u32 %v8534_v14, %v3416_v1 }
 0x35a   : > { %v2551_v53 = vpop.permute.xlu0 %2550  ;;  %v3119_v34 = vpack.c.bf16 %v3107_v55, %v3093_v56 }
 0x35b   : > { %v2748_v3 = vcombine.low %v2551_v53, %v2553_v41  ;;  %v8575_v53 = vcombine.high %v8511_v50, %v8511_v50 }
 0x35c   : > { %v3566_v5 = vsel %vm3420_vm3, %v3119_v34, 0  ;;  %v2463_v34 = vrot.slane %v2449_v4, %v8023_v60 }
 0x35d   : > { %v2776_v38 = vrot.slane %v2748_v3, %v8023_v60  ;;  %7042 = vmatpush3.bf16.xpose.msra.mxu1 %v3566_v5  ;;  %v2464_v5 = vcombine.high %v8504_v19, %v8504_v19 }
 0x35e   : > { %v2555_v12 = vpop.permute.xlu0 %2554  ;;  %7047 = vmatprep.subr.bf16.mxu1 %v7499_v45  ;;  %v8583_v3 = vrot.slane %v2463_v34, %v8023_v60 }
 0x35f   : > { %v2778_v48 = vcombine.low %v2769_v24, %v2776_v38  ;;  %v2800_v61 = vrot.slane %v2555_v12, %v8023_v60  ;;  %v8595_v44 = vrot.slane %v2464_v5, %v8023_v60  ;;  %v2465_v38 = vcombine.high %v2463_v34, %v2463_v34 }
 0x360   : > { %v3123_v11 = vpop.permute.xlu1 %3122  ;;  %v8599_v52 = vcombine.high %v8583_v3, %v8583_v3 }
 0x361   : > { %v2792_v13 = vrot.slane %v2778_v48, %v8023_v60  ;;  %v2807_v6 = vrot.slane %v2800_v61, %v8023_v60  ;;  %v8607_v24 = vcombine.high %v8595_v44, %v8595_v44  ;;  %v8612_v27 = vrot.slane %v2465_v38, %v8023_v60 }
 0x362   : > { %v3121_v7 = vpop.permute.xlu0 %3120 }
 0x363   : > { %v2793_v2 = vcombine.low %v2785_v42, %v2792_v13  ;;  %v3282_v49 = vcombine.low %v3121_v7, %v3123_v11  ;;  %v8618_v54 = vcombine.high %v8612_v27, %v8612_v27 }
 0x364   : > { %v3125_v16 = vpop.permute.xlu1 %3124 }
 0x365   : > { %v2819_v32 = vpack.c.bf16 %v2807_v6, %v2793_v2  ;;  %v8540_v63 = vrot.slane %v3282_v49, %v8023_v60 }
 0x366   : > { %v3127_v33 = vpop.permute.xlu0 %3126 }
 0x367   : > { %7044 = vmatmul.mubr.msk.bf16.vlgmr.msra.gmra.mrb[16].mxu1 %vm3420_vm3, %v2819_v32  ;;  %v3283_v36 = vcombine.low %v3125_v16, %v3127_v33 }
 0x368   : > { %7048 = vmatpush3.bf16.msra.mxu1 %v3711_v15  ;;  %7049 = vmatprep.mubr.msk.bf16.mxu1 %vm7500_vm2, %v7499_v45  ;;  %v3129_v62 = vpop.permute.xlu1 %3128 }
 0x369   : > { %v8545_v58 = vrot.slane %v3283_v36, %v8023_v60  ;;  %7053 = vmatprep.subr.bf16.mxu1 %v7499_v45 }
 0x36a   : > { %v3131_v12 = vpop.permute.xlu0 %3130 }
 0x36b   : > { %v3314_v59 = vcombine.low %v8540_v63, %v8545_v58 }
 0x36c   : > { %v3133_v19 = vpop.permute.xlu1 %3132 }
 0x395   : > { %v8550_v17 = vpop.f32.mrb[4].mxu1 }
 0x396   : > { %v7027_v0 = vpop.f32.mrb[5].mxu1  ;;  %v3610_v20 = vsel %vm3609_vm6, %v8550_v17, -inf }
 0x397   : > { %3611 = vmax.xlane.f32.xlu1 %v3610_v20  ;;  %v3464_v21 = vpop.f32.mrb[6].mxu1 }
 0x398   : > { %v7028_v39 = vpop.f32.mrb[7].mxu1  ;;  %v3614_v22 = vsel %vm3613_vm7, %v3464_v21, -inf }
 0x399   : > { %3615 = vmax.xlane.f32.xlu0 %v3614_v22 }
 0x39d   : > { %v3508_v43 = vpop.f32.mrb[8].mxu1 }
 0x39e   : > { %v7033_v25 = vpop.f32.mrb[9].mxu1  ;;  %v3617_v10 = vsel %vm3609_vm6, %v3508_v43, -inf }
 0x39f   : > { %v3511_v8 = vpop.f32.mrb[10].mxu1  ;;  %3618 = vmax.xlane.f32.xlu0 %v3617_v10 }
 0x3a0   : > { %v7034_v18 = vpop.f32.mrb[11].mxu1  ;;  %v3620_v23 = vsel %vm3613_vm7, %v3511_v8, -inf }
 0x3a1   : > { %3621 = vmax.xlane.f32.xlu1 %v3620_v23 }
 0x3b2   : > { %3136 = vrot.lane.b32.xlu1 %v8511_v50, %s7501_s5 }
 0x424   : > { %v3612_v48 = vpop.xlane.xlu1 %3611 }
 0x425   : > { %v3635_v7 = vsub.f32 %v8550_v17, %v3612_v48 }
 0x426   : > { %v3616_v61 = vpop.xlane.xlu0 %3615 }
 0x427   : > { %v3636_v1 = vsub.f32 %v3464_v21, %v3616_v61  ;;  %v3643_v49 = vmul.f32 1.442695, %v3635_v7 }
 0x429   : > { %v3645_v13 = vmul.f32 1.442695, %v3636_v1 }
 0x42b   : > { %v8559_v31 = vpop.f32.mrb[12].mxu1  ;;  %7255 = vpow2.f32 %v3645_v13  ;;  %v2184_v13 = vcombine.high %v8361_v40, %v8361_v40 }
 0x42c   : > { %v7039_v37 = vpop.f32.mrb[13].mxu1  ;;  %v3623_v35 = vsel %vm3609_vm6, %v8559_v31, -inf  ;;  %v3619_v2 = vpop.xlane.xlu0 %3618 }
 0x42d   : > { %3624 = vmax.xlane.f32.xlu0 %v3623_v35  ;;  %v8563_v28 = vpop.f32.mrb[14].mxu1  ;;  %v3637_v15 = vsub.f32 %v3508_v43, %v3619_v2  ;;  %v2331_v40 = vcombine.low %v2184_v13, %v8358_v29 }
 0x42e   : > { %v7040_v26 = vpop.f32.mrb[15].mxu1  ;;  %v3626_v55 = vsel %vm3613_vm7, %v8563_v28, -inf  ;;  %v3622_v42 = vpop.xlane.xlu1 %3621 }
 0x42f   : > { %3627 = vmax.xlane.f32.xlu1 %v3626_v55  ;;  %v3638_v11 = vsub.f32 %v3511_v8, %v3622_v42  ;;  %v3647_v32 = vmul.f32 1.442695, %v3637_v15  ;;  %v3284_v8 = vcombine.low %v3129_v62, %v3131_v12 }
 0x431   : > { %v3649_v6 = vmul.f32 1.442695, %v3638_v11  ;;  %v3306_v55 = vrot.slane %v3284_v8, %v8023_v60  ;;  %v3219_v8 = vcombine.low %v8595_v44, %v8575_v53 }
 0x432   : > { %v8639_v22 = vpop.permute.xlu1 %3136 }
 0x433   : > { %7257 = vpow2.f32 %v3649_v6 }
 0x434   : > { %7259 = vpow2.f32 %v3643_v49 }
 0x435   : > { %v8623_v16 = vpop.eup %7255  ;;  %7261 = vpow2.f32 %v3647_v32  ;;  %v2338_v32 = vrot.slane %v2331_v40, %v8023_v60 }
 0x436   : > { %v3662_v33 = vsel %vm3613_vm7, %v8623_v16, 0.0 }
 0x43a   : > { %v8567_v41 = vpop.f32.mrb[16].mxu1 }
 0x43b   : > { %v7045_v56 = vpop.f32.mrb[17].mxu1  ;;  %v3629_v30 = vsel %vm3609_vm6, %v8567_v41, -inf }
 0x43c   : > { %v8571_v57 = vpop.f32.mrb[18].mxu1 }
 0x43d   : > { %v7046_v47 = vpop.f32.mrb[19].mxu1  ;;  %v3632_v50 = vsel %vm3613_vm7, %v8571_v57, -inf  ;;  %v8627_v36 = vpop.eup %7257 }
 0x43e   : > { %v8629_v0 = vpop.eup %7259  ;;  %v3668_v17 = vsel %vm3613_vm7, %v8627_v36, 0.0 }
 0x43f   : > { %v3659_v20 = vsel %vm3609_vm6, %v8629_v0, 0.0  ;;  %v8635_v21 = vpop.eup %7261 }
 0x440   : > { %3140 = vrot.lane.b32.xlu1 %v8575_v53, %s7501_s5  ;;  %v3665_v39 = vsel %vm3609_vm6, %v8635_v21, 0.0 }
 0x443   : > { %3134 = vrot.lane.b32.xlu0 %v2448_v51, %s7501_s5 }
 0x444   : > { %3144 = vrot.lane.b32.xlu1 %v8583_v3, %s7501_s5 }
 0x462   : > { %3630 = vmax.xlane.f32.xlu0 %v3629_v30 }
 0x468   : > { %3633 = vmax.xlane.f32.xlu1 %v3632_v50 }
 0x478   : > { %3138 = vrot.lane.b32.xlu0 %v8595_v44, %s7501_s5 }
 0x479   : > { %3148 = vrot.lane.b32.xlu1 %v8599_v52, %s7501_s5 }
 0x47c   : > { %3142 = vrot.lane.b32.xlu0 %v8607_v24, %s7501_s5 }
 0x480   : > { %3146 = vrot.lane.b32.xlu0 %v8612_v27, %s7501_s5 }
 0x484   : > { %3150 = vrot.lane.b32.xlu0 %v8618_v54, %s7501_s5 }
 0x49d   : > { %3663 = vadd.xlane.f32.xlu1 %v3662_v33 }
 0x4a1   : > { %3669 = vadd.xlane.f32.xlu1 %v3668_v17 }
 0x4a3   : > { %3660 = vadd.xlane.f32.xlu0 %v3659_v20  ;;  %v2345_v20 = vrot.slane %v2338_v32, %v8023_v60 }
 0x4a7   : > { %3666 = vadd.xlane.f32.xlu0 %v3665_v39  ;;  %v2392_v39 = vadd.f32 %v8387_v9, %v2345_v20  ;;  %v3221_v9 = vcombine.low %v8612_v27, %v8599_v52 }
 0x4ba   : > { %v3625_v43 = vpop.xlane.xlu0 %3624 }
 0x4bb   : > { %v3639_v25 = vsub.f32 %v8559_v31, %v3625_v43  ;;  %v8649_v31 = vrot.slane %v3314_v59, %v8023_v60  ;;  %v2504_v43 = vrot.slane %v2392_v39, %v8023_v60 }
 0x4bc   : > { %v3628_v10 = vpop.xlane.xlu1 %3627 }
 0x4bd   : > { %v3651_v18 = vmul.f32 1.442695, %v3639_v25  ;;  %v3640_v23 = vsub.f32 %v8563_v28, %v3628_v10  ;;  %v2505_v25 = vcombine.high %v2504_v43, %v2504_v43  ;;  %v2512_v10 = vrot.slane %v2504_v43, %v8023_v60 }
 0x4be   : > { %v3135_v37 = vpop.permute.xlu0 %3134 }
 0x4bf   : > { %7263 = vpow2.f32 %v3651_v18  ;;  %v3653_v35 = vmul.f32 1.442695, %v3640_v23  ;;  %v3285_v26 = vcombine.low %v3133_v19, %v3135_v37  ;;  %v2519_v29 = vrot.slane %v2505_v25, %v8023_v60 }
 0x4c0   : > { %v3141_v63 = vpop.permute.xlu1 %3140  ;;  %v3220_v18 = vcombine.low %v8607_v24, %v8583_v3  ;;  %v3222_v23 = vcombine.low %v8618_v54, %v2512_v10  ;;  %v3229_v37 = vrot.slane %v3219_v8, %v8023_v60 }
 0x4c1   : > { %7265 = vpow2.f32 %v3653_v35  ;;  %v3313_v56 = vrot.slane %v3285_v26, %v8023_v60  ;;  %v3243_v26 = vrot.slane %v3221_v9, %v8023_v60  ;;  %v3274_v52 = vrot.slane %v2519_v29, %v8023_v60 }
 0x4c2   : > { %v3236_v35 = vrot.slane %v3220_v18, %v8023_v60 }
 0x4c3   : > { %v3315_v4 = vcombine.low %v3306_v55, %v3313_v56  ;;  %v3250_v55 = vrot.slane %v3222_v23, %v8023_v60 }
 0x4c4   : > { %v3145_v5 = vpop.permute.xlu1 %3144 }
 0x4c5   : > { %v8652_v47 = vrot.slane %v3315_v4, %v8023_v60  ;;  %v3252_v53 = vcombine.low %v3243_v26, %v3250_v55 }
 0x4c7   : > { %v3330_v28 = vcombine.low %v8649_v31, %v8652_v47  ;;  %v3266_v24 = vrot.slane %v3252_v53, %v8023_v60 }
 0x4c9   : > { %v8656_v34 = vpop.eup %7263 }
 0x4ca   : > { %v3671_v51 = vsel %vm3609_vm6, %v8656_v34, 0.0 }
 0x4cb   : > { %v8660_v30 = vpop.eup %7265  ;;  %3672 = vadd.xlane.f32.xlu0 %v3671_v51  ;;  %v3251_v51 = vcombine.low %v3229_v37, %v3236_v35 }
 0x4cc   : > { %v3674_v50 = vsel %vm3613_vm7, %v8660_v30, 0.0 }
 0x4cd   : > { %3675 = vadd.xlane.f32.xlu1 %v3674_v50  ;;  %v3259_v3 = vrot.slane %v3251_v51, %v8023_v60  ;;  %v3281_v50 = vrot.slane %v3274_v52, %v8023_v60 }
 0x4ef   : > { %v3631_v58 = vpop.xlane.xlu0 %3630 }
 0x4f0   : > { %v3641_v59 = vsub.f32 %v8567_v41, %v3631_v58 }
 0x4f2   : > { %v3655_v62 = vmul.f32 1.442695, %v3641_v59 }
 0x4f3   : > { %v3139_v38 = vpop.permute.xlu0 %3138 }
 0x4f4   : > { %7267 = vpow2.f32 %v3655_v62  ;;  %v3345_v19 = vcombine.low %v3139_v38, %v3141_v63  ;;  %v3267_v63 = vcombine.low %v3259_v3, %v3266_v24  ;;  %v7208_v3 = vld [vmem:[%s9220_s19 + $0x8] sm:$0xff]  }
 0x4f5   : > { %v3634_v12 = vpop.xlane.xlu1 %3633 }
 0x4f6   : > { %v3642_v48 = vsub.f32 %v8571_v57, %v3634_v12  ;;  %v8669_v11 = vrot.slane %v3345_v19, %v8023_v60  ;;  %v3337_v19 = vrot.slane %v8639_v22, %v8023_v60 }
 0x4f7   : > { %v3143_v61 = vpop.permute.xlu0 %3142 }
 0x4f8   : > { %v3657_v1 = vmul.f32 1.442695, %v3642_v48  ;;  %v3346_v42 = vcombine.low %v3143_v61, %v3145_v5  ;;  %v3417_v5 = vpack.c.bf16 %v3281_v50, %v3267_v63  ;;  %v7209_v50 = vld [vmem:[%s9220_s19 + $0x10] sm:$0xff]   ;;  %v7210_v63 = vld [vmem:[%s9220_s19 + $0x18] sm:$0xff]  }
 0x4f9   : > { %v8674_v7 = vpop.permute.xlu1 %3148 }
 0x4fa   : > { %7269 = vpow2.f32 %v3657_v1  ;;  %v8672_v41 = vrot.slane %v3346_v42, %v8023_v60  ;;  %v3758_v61 = vand.u32 %v8534_v14, %v3417_v5  ;;  %v3344_v42 = vrot.slane %v3337_v19, %v8023_v60  ;;  %v7213_v19 = vld [vmem:[%s9220_s19 + $0x30] sm:$0xff]  }
 0x4fb   : > { %v8676_v2 = vpop.permute.xlu0 %3146 }
 0x4fc   : > { %v3377_v57 = vcombine.low %v8669_v11, %v8672_v41  ;;  %v3347_v6 = vcombine.low %v8676_v2, %v8674_v7 }
 0x4fe   : > { %v8682_v49 = vpop.eup %7267 }
 0x4ff   : > { %v3677_v15 = vsel %vm3609_vm6, %v8682_v49, 0.0  ;;  %v3151_v56 = vpop.permute.xlu0 %3150 }
 0x500   : > { %3678 = vadd.xlane.f32.xlu0 %v3677_v15 }
 0x504   : > { %v8688_v33 = vpop.eup %7269 }
 0x505   : > { %v3680_v17 = vsel %vm3613_vm7, %v8688_v33, 0.0 }
 0x506   : > { %3681 = vadd.xlane.f32.xlu1 %v3680_v17 }
 0x516   : > { %3154 = vrot.lane.b32.xlu0 %v2519_v29, %s7501_s5 }
 0x517   : > { %3152 = vrot.lane.b32.xlu1 %v2512_v10, %s7501_s5 }
 0x52a   : > { %v3664_v4 = vpop.xlane.xlu1 %3663 }
 0x52b   : > { %7271 = vrcp.f32 %v3664_v4 }
 0x52e   : > { %v3670_v27 = vpop.xlane.xlu1 %3669 }
 0x530   : > { %v3661_v44 = vpop.xlane.xlu0 %3660 }
 0x531   : > { %7273 = vrcp.f32 %v3661_v44 }
 0x534   : > { %v3667_v54 = vpop.xlane.xlu0 %3666 }
 0x535   : > { %7275 = vrcp.f32 %v3667_v54  ;;  %v7272_v58 = vpop.eup %7271 }
 0x536   : > { %7277 = vrcp.f32 %v3670_v27  ;;  %v3692_v62 = vmul.f32 %v7272_v58, %v8623_v16 }
 0x53b   : > { %v7274_v59 = vpop.eup %7273 }
 0x53c   : > { %v3691_v38 = vmul.f32 %v7274_v59, %v8629_v0  ;;  %v3418_v0 = vpack.c.bf16 %v3344_v42, %v3330_v28 }
 0x53e   : > { %v3699_v12 = vpack.c.bf16 %v3692_v62, %v3691_v38  ;;  %v3805_v40 = vand.u32 %v8534_v14, %v3418_v0  ;;  %v7211_v62 = vld [vmem:[%s9220_s19 + $0x20] sm:$0xff]   ;;  %v7212_v38 = vld [vmem:[%s9220_s19 + $0x28] sm:$0xff]  }
 0x53f   : > { %v7276_v48 = vpop.eup %7275 }
 0x540   : > { %7050 = vmatmul.mubr.msk.bf16.vlgmr.msra.gmra.mrb[20].mxu1 %vm3609_vm6, %v3699_v12  ;;  %v7278_v1 = vpop.eup %7277  ;;  %v3693_v16 = vmul.f32 %v7276_v48, %v8635_v21  ;;  %v7214_v12 = vld [vmem:[%s9220_s19 + $0x38] sm:$0xff]  }
 0x541   : > { %7054 = vmatpush3.bf16.msra.mxu1 %v3758_v61  ;;  %7055 = vmatprep.mubr.msk.bf16.mxu1 %vm7500_vm2, %v7499_v45  ;;  %v3694_v22 = vmul.f32 %v7278_v1, %v8627_v36 }
 0x542   : > { %7059 = vmatprep.subr.bf16.mxu1 %v7499_v45 }
 0x543   : > { %v3700_v13 = vpack.c.bf16 %v3694_v22, %v3693_v16 }
 0x548   : > { %7056 = vmatmul.mubr.msk.bf16.vlgmr.msra.gmra.mrb[24].mxu1 %vm3609_vm6, %v3700_v13 }
 0x549   : > { %7060 = vmatpush3.bf16.msra.mxu1 %v3805_v40  ;;  %7061 = vmatprep.mubr.msk.bf16.mxu1 %vm7500_vm2, %v7499_v45 }
 0x54a   : > { %7065 = vmatprep.subr.bf16.mxu1 %v7499_v45 }
 0x558   : > { %v3673_v21 = vpop.xlane.xlu0 %3672 }
 0x559   : > { %7279 = vrcp.f32 %v3673_v21 }
 0x55a   : > { %v3676_v15 = vpop.xlane.xlu1 %3675 }
 0x55b   : > { %7281 = vrcp.f32 %v3676_v15 }
 0x563   : > { %v7280_v32 = vpop.eup %7279 }
 0x564   : > { %v3695_v47 = vmul.f32 %v7280_v32, %v8656_v34  ;;  %v3369_v34 = vrot.slane %v3347_v6, %v8023_v60 }
 0x565   : > { %v7282_v31 = vpop.eup %7281 }
 0x566   : > { %v3696_v36 = vmul.f32 %v7282_v31, %v8660_v30 }
 0x568   : > { %v3701_v28 = vpack.c.bf16 %v3696_v36, %v3695_v47 }
 0x56a   : > { %7062 = vmatmul.mubr.msk.bf16.vlgmr.msra.gmra.mrb[28].mxu1 %vm3609_vm6, %v3701_v28 }
 0x56b   : > { %7067 = vmatprep.mubr.msk.bf16.mxu1 %vm7500_vm2, %v7499_v45  ;;  %v3385_v45 = vrot.slane %v3377_v57, %v8023_v60 }
 0x58d   : > { %v3679_v17 = vpop.xlane.xlu0 %3678 }
 0x591   : > { %v3155_v25 = vpop.permute.xlu0 %3154 }
 0x592   : > { %v3400_v29 = vrot.slane %v3155_v25, %v8023_v60 }
 0x593   : > { %v3682_v20 = vpop.xlane.xlu1 %3681 }
 0x594   : > { %7283 = vrcp.f32 %v3682_v20  ;;  %v3407_v9 = vrot.slane %v3400_v29, %v8023_v60 }
 0x595   : > { %7285 = vrcp.f32 %v3679_v17 }
 0x597   : > { %v3153_v39 = vpop.permute.xlu1 %3152 }
 0x598   : > { %v3348_v43 = vcombine.low %v3151_v56, %v3153_v39 }
 0x59a   : > { %v3376_v30 = vrot.slane %v3348_v43, %v8023_v60 }
 0x59c   : > { %v3378_v10 = vcombine.low %v3369_v34, %v3376_v30 }
 0x59e   : > { %v3392_v8 = vrot.slane %v3378_v10, %v8023_v60  ;;  %v7284_v18 = vpop.eup %7283 }
 0x59f   : > { %v7286_v37 = vpop.eup %7285  ;;  %v3698_v7 = vmul.f32 %v7284_v18, %v8688_v33 }
 0x5a0   : > { %v3393_v23 = vcombine.low %v3385_v45, %v3392_v8  ;;  %v3697_v6 = vmul.f32 %v7286_v37, %v8682_v49 }
 0x5a2   : > { %v3419_v35 = vpack.c.bf16 %v3407_v9, %v3393_v23  ;;  %v3702_v26 = vpack.c.bf16 %v3698_v7, %v3697_v6 }
 0x5a4   : > { %v3852_v2 = vand.u32 %v8534_v14, %v3419_v35  ;;  %v7207_v14 = vld [vmem:[%s9220_s19] sm:$0xff]  }
 0x5a5   : > { %7071 = vmatprep.subr.bf16.mxu0 %v7207_v14 }
 0x5a6   : > { %7066 = vmatpush3.bf16.msra.mxu1 %v3852_v2  ;;  %7072 = vmatpush3.bf16.msra.mxu0 %v7207_v14 }
 0x5a7   : > { %7073 = vmatprep.subr.bf16.mxu0 %v7208_v3 }
 0x5a9   : > { %7068 = vmatmul.mubr.msk.bf16.vlgmr.msra.gmra.mrb[32].mxu1 %vm3609_vm6, %v3702_v26 }
 0x5aa   : > { %7074 = vmatpush3.bf16.msra.mxu0 %v7208_v3 }
 0x5ab   : > { %7075 = vmatprep.subr.bf16.mxu0 %v7209_v50 }
 0x5ae   : > { %7076 = vmatpush3.bf16.msra.mxu0 %v7209_v50  ;;  %v7215_v50 = vld [vmem:[%s9221_s9] ss:$8 sps:$4 sm:$0xff]  }
 0x5af   : > { %7077 = vmatprep.subr.bf16.mxu0 %v7210_v63 }
 0x5b2   : > { %7078 = vmatpush3.bf16.msra.mxu0 %v7210_v63  ;;  %v7217_v63 = vld [vmem:[%s9221_s9 + $0x4] ss:$8 sps:$4 sm:$0xff]  }
 0x5b3   : > { %7079 = vmatprep.subr.bf16.mxu0 %v7211_v62  ;;  %5182 = vmatprep.subr.bf16.mxu1 %v7217_v63 }
 0x5b4   : > { %5183 = vmatpush1.bf16.msra.mxu1 %v7215_v50 }
 0x5b6   : > { %7080 = vmatpush3.bf16.msra.mxu0 %v7211_v62  ;;  %v7223_v62 = vld [vmem:[%s9221_s9 + $0x24] ss:$8 sps:$4 sm:$0xff]  }
 0x5b7   : > { %7081 = vmatprep.subr.bf16.mxu0 %v7212_v38 }
 0x5ba   : > { %7082 = vmatpush3.bf16.msra.mxu0 %v7212_v38 }
 0x5bb   : > { %7083 = vmatprep.subr.bf16.mxu0 %v7213_v19 }
 0x5be   : > { %7084 = vmatpush3.bf16.msra.mxu0 %v7213_v19  ;;  %v7503_v19 = vmov 0  }
 0x5bf   : > { %7085 = vmatprep.subr.bf16.mxu0 %v7214_v12  ;;  %5214 = vmatprep.mubr.bf16.mxu1 %v7503_v19 }
 0x5c2   : > { %7086 = vmatpush3.bf16.msra.mxu0 %v7214_v12 }
 0x613   : > { %v3747_v11 = vpop.f32.mrb[20].mxu1 }
 0x614   : > { %v7051_v41 = vpop.f32.mrb[21].mxu1 }
 0x615   : > { %v3750_v57 = vpop.f32.mrb[22].mxu1 }
 0x616   : > { %v7052_v55 = vpop.f32.mrb[23].mxu1 }
 0x61b   : > { %v3794_v56 = vpop.f32.mrb[24].mxu1 }
 0x61c   : > { %v7057_v4 = vpop.f32.mrb[25].mxu1 }
 0x61d   : > { %v3797_v51 = vpop.f32.mrb[26].mxu1 }
 0x61e   : > { %v7058_v53 = vpop.f32.mrb[27].mxu1 }
 0x63d   : > { %v3841_v33 = vpop.f32.mrb[28].mxu1 }
 0x63e   : > { %v7063_v44 = vpop.f32.mrb[29].mxu1 }
 0x63f   : > { %v3844_v52 = vpop.f32.mrb[30].mxu1 }
 0x640   : > { %v7178_v49 = vpack.i.bf16 %v3844_v52, %v3841_v33  ;;  %v7064_v24 = vpop.f32.mrb[31].mxu1 }
 0x642   : > { %7179 = vrot.lane.b32.xlu0 %v7178_v49, %s7501_s5 }
 0x67c   : > { %v3888_v27 = vpop.f32.mrb[32].mxu1 }
 0x67d   : > { %v7069_v54 = vpop.f32.mrb[33].mxu1 }
 0x67e   : > { %v3891_v58 = vpop.f32.mrb[34].mxu1  ;;  %v6789_v54 = vld [vmem:[%s9223_s25] ss:$0 sm:$0xff] }
 0x67f   : > { %v7173_v59 = vpack.i.bf16 %v3891_v58, %v3888_v27  ;;  %v7070_v5 = vpop.f32.mrb[35].mxu1  ;;  %v7220_v58 = vld [vmem:[%s9221_s9 + $0x14] ss:$8 sps:$4 sm:$0xff]   ;;  %v4044_v38 = vrot.slane %v6789_v54, %v8023_v60 }
 0x680   : > { %v7218_v5 = vld [vmem:[%s9221_s9 + $0x10] ss:$8 sps:$4 sm:$0xff]   ;;  %5184 = vmatprep.subr.bf16.mxu1 %v7220_v58 }
 0x681   : > { %7174 = vrot.lane.b32.xlu1 %v7173_v59, %s7501_s5  ;;  %v4037_v59 = vcombine.high %v6789_v54, %v6789_v54  ;;  %5185 = vmatpush1.bf16.msra.mxu1 %v7218_v5 }
 0x682   : > { %5186 = vmatprep.subr.bf16.mxu1 %v7223_v62 }
 0x683   : > { %v4051_v12 = vrot.slane %v4037_v59, %v8023_v60 }
 0x6b4   : > { %v7180_v48 = vpop.permute.xlu0 %7179 }
 0x6b5   : > { %v7182_v61 = vunpack.i.h.bf16 %v7180_v48  ;;  %v7181_v1 = vunpack.i.l.bf16 %v7180_v48  ;;  %v7221_v48 = vld [vmem:[%s9221_s9 + $0x20] ss:$8 sps:$4 sm:$0xff]  }
 0x6b6   : > { %5187 = vmatpush1.bf16.msra.mxu1 %v7221_v48 }
 0x6b7   : > { %v3912_v42 = vsel %vm3420_vm3, %v3750_v57, %v7182_v61  ;;  %v3911_v16 = vsel %vm3420_vm3, %v3747_v11, %v7181_v1  ;;  %v7226_v61 = vld [vmem:[%s9221_s9 + $0x34] ss:$8 sps:$4 sm:$0xff]   ;;  %v4052_v1 = vcombine.high %v4044_v38, %v4044_v38 }
 0x6b8   : > { %v3915_v0 = vpack.c.bf16 %v3912_v42, %v3911_v16  ;;  %v6790_v13 = vpack.c.bf16 %v3912_v42, %v3912_v42  ;;  %v4053_v42 = vcombine.high %v4051_v12, %v4051_v12  ;;  %v7224_v16 = vld [vmem:[%s9221_s9 + $0x30] ss:$8 sps:$4 sm:$0xff]   ;;  %5188 = vmatprep.subr.bf16.mxu1 %v7226_v61 }
 0x6ba   : > { %v3948_v22 = vrot.slane %v3915_v0, %v8023_v60  ;;  %v3955_v36 = vrot.slane %v6790_v13, %v8023_v60  ;;  %v7229_v0 = vld [vmem:[%s9221_s9 + $0x44] ss:$8 sps:$4 sm:$0xff]   ;;  %v4067_v13 = vrot.slane %v4051_v12, %v8023_v60  ;;  %5189 = vmatpush1.bf16.msra.mxu1 %v7224_v16 }
 0x6bb   : > { %5190 = vmatprep.subr.bf16.mxu1 %v7229_v0 }
 0x6bc   : > { %v3956_v21 = vcombine.high %v3948_v22, %v3948_v22  ;;  %v3963_v43 = vrot.slane %v3948_v22, %v8023_v60  ;;  %v3970_v25 = vrot.slane %v3955_v36, %v8023_v60  ;;  %v4060_v22 = vrot.slane %v4044_v38, %v8023_v60 }
 0x6be   : > { %v3977_v17 = vrot.slane %v3956_v21, %v8023_v60  ;;  %v4081_v21 = vrot.slane %v4053_v42, %v8023_v60 }
 0x6c0   : > { %v4095_v10 = vcombine.low %v3963_v43, %v3977_v17  ;;  %v6797_v45 = vcombine.high %v3963_v43, %v3977_v17  ;;  %v7230_v43 = vld [vmem:[%s9221_s9 + $0x50] ss:$8 sps:$4 sm:$0xff]  }
 0x6c2   : > { %v4105_v26 = vrot.slane %v4095_v10, %v8023_v60  ;;  %v4112_v11 = vrot.slane %v6797_v45, %v8023_v60  ;;  %v4085_v45 = vcombine.high %v4081_v21, %v4081_v21 }
 0x6c4   : > { %v4127_v44 = vcombine.low %v4105_v26, %v4112_v11  ;;  %v4306_v11 = vcombine.low %v4085_v45, %v4060_v22 }
 0x6c6   : > { %v4135_v52 = vrot.slane %v4127_v44, %v8023_v60 }
 0x6f3   : > { %v7175_v40 = vpop.permute.xlu1 %7174 }
 0x6f4   : > { %v7177_v15 = vunpack.i.h.bf16 %v7175_v40  ;;  %v7176_v32 = vunpack.i.l.bf16 %v7175_v40  ;;  %v4074_v40 = vrot.slane %v4052_v1, %v8023_v60 }
 0x6f6   : > { %v3914_v31 = vsel %vm3420_vm3, %v3797_v51, %v7177_v15  ;;  %v3913_v47 = vsel %vm3420_vm3, %v3794_v56, %v7176_v32  ;;  %v7227_v15 = vld [vmem:[%s9221_s9 + $0x40] ss:$8 sps:$4 sm:$0xff]   ;;  %v7232_v32 = vld [vmem:[%s9221_s9 + $0x54] ss:$8 sps:$4 sm:$0xff]   ;;  %v4084_v36 = vcombine.high %v4074_v40, %v4074_v40  ;;  %v6806_v17 = vcombine.high %v4060_v22, %v4074_v40 }
 0x6f7   : > { %v3916_v28 = vpack.c.bf16 %v3914_v31, %v3913_v47  ;;  %v6791_v20 = vpack.c.bf16 %v3914_v31, %v3914_v31  ;;  %v4082_v31 = vcombine.high %v4060_v22, %v4060_v22  ;;  %v4083_v47 = vcombine.high %v4067_v13, %v4067_v13  ;;  %5191 = vmatpush1.bf16.msra.mxu1 %v7227_v15 }
 0x6f8   : > { %5192 = vmatprep.subr.bf16.mxu1 %v7232_v32 }
 0x6f9   : > { %v3987_v39 = vrot.slane %v3916_v28, %v8023_v60  ;;  %v3994_v29 = vrot.slane %v6791_v20, %v8023_v60  ;;  %v4208_v28 = vcombine.low %v4060_v22, %v4074_v40  ;;  %v4210_v20 = vcombine.low %v4067_v13, %v4081_v21 }
 0x6fa   : > { %v4260_v10 = vcombine.low %v4081_v21, %v4083_v47 }
 0x6fb   : > { %v3995_v34 = vcombine.high %v3987_v39, %v3987_v39  ;;  %v4002_v30 = vrot.slane %v3987_v39, %v8023_v60  ;;  %v4009_v6 = vrot.slane %v3994_v29, %v8023_v60  ;;  %v6807_v39 = vcombine.high %v4067_v13, %v4081_v21  ;;  %5193 = vmatpush1.bf16.msra.mxu1 %v7230_v43 }
 0x6fc   : > { %v4259_v29 = vcombine.low %v4084_v36, %v4067_v13  ;;  %v4288_v26 = vrot.slane %v4260_v10, %v8023_v60 }
 0x6fd   : > { %v4016_v8 = vrot.slane %v3995_v34, %v8023_v60  ;;  %v4017_v18 = vcombine.high %v4002_v30, %v4002_v30  ;;  %v4029_v9 = vunpack.i.h.s16 %v4002_v30  ;;  %v6792_v23 = vpack.i.b16 %v4002_v30, %v3970_v25  ;;  %v7235_v25 = vld [vmem:[%s9221_s9 + $0x64] ss:$8 sps:$4 sm:$0xff]  }
 0x6fe   : > { %v4257_v34 = vcombine.low %v4060_v22, %v4060_v22  ;;  %v4258_v30 = vcombine.low %v4074_v40, %v4082_v31  ;;  %5194 = vmatprep.subr.bf16.mxu1 %v7235_v25 }
 0x6ff   : > { %v4018_v37 = vcombine.high %v4016_v8, %v4016_v8  ;;  %v4031_v35 = vunpack.i.h.s16 %v4016_v8  ;;  %v4033_v7 = vunpack.i.h.s16 %v4017_v18  ;;  %v6793_v2 = vpack.i.b16 %v4016_v8, %v4029_v9 }
 0x700   : > { %v4218_v8 = vrot.slane %v4208_v28, %v8023_v60  ;;  %v4232_v9 = vrot.slane %v4210_v20, %v8023_v60 }
 0x701   : > { %v6794_v41 = vpack.i.b16 %v4017_v18, %v4031_v35  ;;  %v6795_v57 = vpack.i.b16 %v4018_v37, %v4033_v7  ;;  %v4097_v55 = vcombine.low %v6792_v23, %v6793_v2  ;;  %v4035_v56 = vunpack.i.h.s16 %v4018_v37  ;;  %v7233_v37 = vld [vmem:[%s9221_s9 + $0x60] ss:$8 sps:$4 sm:$0xff]   ;;  %v7238_v35 = vld [vmem:[%s9221_s9 + $0x74] ss:$8 sps:$4 sm:$0xff]  }
 0x702   : > { %v4225_v18 = vrot.slane %v6806_v17, %v8023_v60  ;;  %v4239_v23 = vrot.slane %v6807_v39, %v8023_v60  ;;  %v4267_v7 = vrot.slane %v4257_v34, %v8023_v60  ;;  %v4274_v2 = vrot.slane %v4258_v30, %v8023_v60  ;;  %5195 = vmatpush1.bf16.msra.mxu1 %v7233_v37 }
 0x703   : > { %v4098_v4 = vcombine.low %v6794_v41, %v6795_v57  ;;  %v6796_v51 = vpack.i.b16 %v4009_v6, %v4035_v56  ;;  %v4119_v53 = vrot.slane %v4097_v55, %v8023_v60  ;;  %v4281_v6 = vrot.slane %v4259_v29, %v8023_v60  ;;  %v7236_v55 = vld [vmem:[%s9221_s9 + $0x70] ss:$8 sps:$4 sm:$0xff]   ;;  %5196 = vmatprep.subr.bf16.mxu1 %v7238_v35 }
 0x704   : > { %v4240_v41 = vcombine.low %v4218_v8, %v4225_v18  ;;  %v4241_v57 = vcombine.low %v4232_v9, %v4239_v23  ;;  %v4289_v56 = vcombine.low %v4267_v7, %v4274_v2 }
 0x705   : > { %v4126_v33 = vrot.slane %v4098_v4, %v8023_v60  ;;  %v4150_v3 = vrot.slane %v6796_v51, %v8023_v60  ;;  %v4290_v4 = vcombine.low %v4281_v6, %v4288_v26  ;;  %v4313_v51 = vrot.slane %v4306_v11, %v8023_v60 }
 0x706   : > { %5197 = vmatpush1.bf16.msra.mxu1 %v7236_v55  ;;  %v4297_v44 = vrot.slane %v4289_v56, %v8023_v60 }
 0x707   : > { %v4128_v14 = vcombine.low %v4119_v53, %v4126_v33  ;;  %v4157_v27 = vrot.slane %v4150_v3, %v8023_v60  ;;  %v4248_v53 = vrot.slane %v4240_v41, %v8023_v60  ;;  %v4255_v33 = vrot.slane %v4241_v57, %v8023_v60 }
 0x708   : > { %v4320_v3 = vrot.slane %v4313_v51, %v8023_v60 }
 0x709   : > { %v4142_v49 = vrot.slane %v4128_v14, %v8023_v60  ;;  %v4304_v14 = vrot.slane %v4290_v4, %v8023_v60 }
 0x70b   : > { %v4143_v24 = vcombine.low %v4135_v52, %v4142_v49  ;;  %v4256_v52 = vcombine.low %v4248_v53, %v4255_v33 }
 0x70d   : > { %7087 = vmatprep.mubr.bf16.mxu0 %v4143_v24  ;;  %v4305_v24 = vcombine.low %v4297_v44, %v4304_v14  ;;  %v7291_v14 = vld [vmem:[%s9216_s15 + $0x8] sm:$0x1] }
 0x70e   : > { %7088 = vmatmul.mubr.bf16.vlgmr.msra.gmra.mrb[8].mxu0 %v4157_v27 }
 0x7e1   : > { %v7089_v49 = vpop.f32.mrb[8].mxu0 }
 0x7e2   : > { %v4367_v27 = vadd.f32 %v7089_v49, %v4320_v3  ;;  %v4358_v54 = vpop.f32.mrb[9].mxu0 }
 0x7e3   : > { %v4359_v50 = vadd.f32 %v4358_v54, %v4256_v52  ;;  %v7090_v63 = vpop.f32.mrb[10].mxu0 }
 0x7e4   : > { %v4361_v58 = vpop.f32.mrb[11].mxu0  ;;  %v4479_v38 = vrot.slane %v4367_v27, %v8023_v60  ;;  %v7292_v27 = vld [vmem:[%s9216_s15] sm:$0xff] }
 0x7e5   : > { %v4375_v59 = vcombine.high %v4359_v50, %v4359_v50  ;;  %v4382_v5 = vrot.slane %v4359_v50, %v8023_v60  ;;  %v4362_v62 = vadd.f32 %v4361_v58, %v4305_v24 }
 0x7e6   : > { %v4480_v13 = vcombine.high %v4479_v38, %v4479_v38  ;;  %v4487_v37 = vrot.slane %v4479_v38, %v8023_v60 }
 0x7e7   : > { %v4389_v12 = vrot.slane %v4375_v59, %v8023_v60  ;;  %v4390_v48 = vcombine.high %v4382_v5, %v4382_v5  ;;  %v4424_v61 = vcombine.high %v4362_v62, %v4362_v62  ;;  %v4431_v1 = vrot.slane %v4362_v62, %v8023_v60  ;;  %v7293_v62 = vld [vmem:[%s9216_s15 + $0x18] sm:$0x1] }
 0x7e8   : > { %v4398_v16 = vrot.slane %v4382_v5, %v8023_v60  ;;  %v4494_v30 = vrot.slane %v4480_v13, %v8023_v60 }
 0x7e9   : > { %v4391_v42 = vcombine.high %v4389_v12, %v4389_v12  ;;  %v4412_v0 = vrot.slane %v4390_v48, %v8023_v60  ;;  %v4438_v22 = vrot.slane %v4424_v61, %v8023_v60  ;;  %v4405_v40 = vrot.slane %v4389_v12, %v8023_v60  ;;  %v7294_v12 = vld [vmem:[%s9216_s15 + $0x10] sm:$0xff] }
 0x7ea   : > { %v4439_v21 = vcombine.high %v4431_v1, %v4431_v1  ;;  %v4447_v15 = vrot.slane %v4431_v1, %v8023_v60  ;;  %v4613_v56 = vrot.slane %v4494_v30, %v8023_v60 }
 0x7eb   : > { %v4419_v32 = vrot.slane %v4391_v42, %v8023_v60  ;;  %v4495_v31 = vcombine.low %v4398_v16, %v4412_v0  ;;  %v6808_v47 = vcombine.high %v4398_v16, %v4412_v0  ;;  %v4440_v36 = vcombine.high %v4438_v22, %v4438_v22 }
 0x7ec   : > { %v4454_v28 = vrot.slane %v4438_v22, %v8023_v60  ;;  %v4461_v17 = vrot.slane %v4439_v21, %v8023_v60  ;;  %v4469_v20 = vcombine.high %v4447_v15, %v4447_v15  ;;  %v4550_v23 = vrot.slane %v4447_v15, %v8023_v60 }
 0x7ed   : > { %v4497_v39 = vcombine.low %v4405_v40, %v4419_v32  ;;  %v6809_v43 = vcombine.high %v4405_v40, %v4419_v32  ;;  %v4505_v25 = vrot.slane %v4495_v31, %v8023_v60  ;;  %v4512_v34 = vrot.slane %v6808_v47, %v8023_v60 }
 0x7ee   : > { %v4468_v29 = vrot.slane %v4440_v36, %v8023_v60  ;;  %v4470_v10 = vcombine.high %v4454_v28, %v4454_v28  ;;  %v4471_v45 = vcombine.high %v4461_v17, %v4461_v17  ;;  %v4558_v7 = vcombine.low %v4461_v17, %v4469_v20 }
 0x7ef   : > { %v4519_v8 = vrot.slane %v4497_v39, %v8023_v60  ;;  %v4526_v18 = vrot.slane %v6809_v43, %v8023_v60  ;;  %v4527_v9 = vcombine.low %v4505_v25, %v4512_v34  ;;  %v4557_v26 = vrot.slane %v4550_v23, %v8023_v60 }
 0x7f0   : > { %v4472_v35 = vcombine.high %v4468_v29, %v4468_v29  ;;  %v4559_v2 = vcombine.low %v4471_v45, %v4454_v28  ;;  %v4560_v11 = vcombine.low %v4468_v29, %v4470_v10  ;;  %v4568_v57 = vrot.slane %v4558_v7, %v8023_v60 }
 0x7f1   : > { %v4528_v6 = vcombine.low %v4519_v8, %v4526_v18  ;;  %v4535_v4 = vrot.slane %v4527_v9, %v8023_v60  ;;  %v4626_v3 = vadd.f32 %v7291_v14, %v4557_v26  ;;  %v4620_v24 = vrot.slane %v4613_v56, %v8023_v60 }
 0x7f2   : > { %v4561_v41 = vcombine.low %v4472_v35, %v4487_v37  ;;  %v4575_v55 = vrot.slane %v4559_v2, %v8023_v60  ;;  %v4582_v53 = vrot.slane %v4560_v11, %v8023_v60  ;;  %v6810_v2 = vld [vmem:[%s969_s2] ss:$0 sm:$0xff] }
 0x7f3   : > { %v4542_v51 = vrot.slane %v4528_v6, %v8023_v60  ;;  %v4630_v58 = vsel %vm4629_vm8, %v4626_v3, 0.0  ;;  %v4628_v38 = vadd.f32 %v7293_v62, %v4620_v24 }
 0x7f4   : > { %v4589_v33 = vrot.slane %v4561_v41, %v8023_v60  ;;  %v4590_v44 = vcombine.low %v4568_v57, %v4575_v55  ;;  %v6811_v57 = vld [vmem:[%s972_s23] ss:$0 sm:$0xff] }
 0x7f5   : > { %v4543_v52 = vcombine.low %v4535_v4, %v4542_v51  ;;  %v4633_v1 = vsel %vm4629_vm8, %v4628_v38, 0.0 }
 0x7f6   : > { %v4591_v49 = vcombine.low %v4582_v53, %v4589_v33  ;;  %v4598_v50 = vrot.slane %v4590_v44, %v8023_v60 }
 0x7f7   : > { %v4625_v54 = vadd.f32 %v7292_v27, %v4543_v52 }
 0x7f8   : > { %v4605_v63 = vrot.slane %v4591_v49, %v8023_v60 }
 0x7f9   : > { %v4631_v59 = vadd.f32 %v4630_v58, %v4625_v54 }
 0x7fa   : > { %v4606_v5 = vcombine.low %v4598_v50, %v4605_v63 }
 0x7fc   : > { %v4627_v48 = vadd.f32 %v7294_v12, %v4606_v5 }
 0x7fe   : > { %v4632_v61 = vadd.f32 %v4631_v59, %v4627_v48 }
 0x800   : > { %v4634_v42 = vadd.f32 %v4633_v1, %v4632_v61 }
 0x802   : > { %v4635_v16 = vrot.slane %v4634_v42, 4 }
 0x804   : > { %v4636_v0 = vadd.f32 %v4635_v16, %v4634_v42 }
 0x806   : > { %v4637_v22 = vrot.slane %v4636_v0, 2 }
 0x808   : > { %v4638_v13 = vadd.f32 %v4637_v22, %v4636_v0 }
 0x80a   : > { %v4639_v40 = vrot.slane %v4638_v13, 1 }
 0x80c   : > { %v4640_v21 = vadd.f32 %v4639_v40, %v4638_v13 }
 0x80e   : > { %v4642_v15 = vmul.f32 0.055555556, %v4640_v21 }
 0x810   : > { %v4643_v32 = vsub.f32 %v4625_v54, %v4642_v15  ;;  %v4644_v31 = vsub.f32 %v4626_v3, %v4642_v15  ;;  %v4645_v47 = vsub.f32 %v4627_v48, %v4642_v15  ;;  %v4646_v36 = vsub.f32 %v4628_v38, %v4642_v15 }
 0x812   : > { %v4647_v28 = vmul.f32 %v4643_v32, %v4643_v32  ;;  %v4648_v17 = vmul.f32 %v4644_v31, %v4644_v31  ;;  %v4650_v20 = vmul.f32 %v4646_v36, %v4646_v36  ;;  %v4649_v43 = vmul.f32 %v4645_v47, %v4645_v47 }
 0x814   : > { %v4651_v39 = vsel %vm4629_vm8, %v4648_v17, 0.0  ;;  %v4654_v30 = vsel %vm4629_vm8, %v4650_v20, 0.0 }
 0x815   : > { %v4652_v25 = vadd.f32 %v4651_v39, %v4647_v28 }
 0x817   : > { %v4653_v34 = vadd.f32 %v4652_v25, %v4649_v43 }
 0x819   : > { %v4655_v29 = vadd.f32 %v4654_v30, %v4653_v34 }
 0x81b   : > { %v4656_v10 = vrot.slane %v4655_v29, 4 }
 0x81d   : > { %v4657_v45 = vadd.f32 %v4656_v10, %v4655_v29 }
 0x81f   : > { %v4658_v8 = vrot.slane %v4657_v45, 2 }
 0x821   : > { %v4659_v18 = vadd.f32 %v4658_v8, %v4657_v45 }
 0x823   : > { %v4660_v9 = vrot.slane %v4659_v18, 1 }
 0x825   : > { %v4661_v23 = vadd.f32 %v4660_v9, %v4659_v18  ;;  %v7239_v9 = vld [vmem:[%s7947_s1 + $0x40] sm:$0xff]  }
 0x826   : > { %6935 = vmatprep.subr.bf16.mxu0 %v7239_v9 }
 0x827   : > { %v4662_v37 = vmul.f32 0.055555556, %v4661_v23  ;;  %v7240_v23 = vld [vmem:[%s7947_s1] sm:$0xff]  }
 0x828   : > { %6936 = vmatpush3.bf16.msra.mxu0 %v7240_v23 }
 0x829   : > { %v4663_v35 = vadd.f32 1e-05, %v4662_v37  ;;  %v7241_v37 = vld [vmem:[%s7947_s1 + $0x48] sm:$0xff]  }
 0x82a   : > { %6937 = vmatprep.subr.bf16.mxu0 %v7241_v37 }
 0x82b   : > { %7287 = vrsqrt.f32 %v4663_v35  ;;  %v7242_v35 = vld [vmem:[%s7947_s1 + $0x8] sm:$0xff]  }
 0x82c   : > { %6938 = vmatpush3.bf16.msra.mxu0 %v7242_v35 }
 0x835   : > { %v7288_v7 = vpop.eup %7287 }
 0x836   : > { %v4665_v6 = vmul.f32 %v7288_v7, %v4643_v32  ;;  %v4666_v26 = vmul.f32 %v7288_v7, %v4644_v31  ;;  %v4667_v11 = vmul.f32 %v7288_v7, %v4645_v47  ;;  %v4668_v41 = vmul.f32 %v7288_v7, %v4646_v36  ;;  %v7244_v7 = vld [vmem:[%s7947_s1 + $0x10] sm:$0xff]  }
 0x838   : > { %v4676_v55 = vmul.f32 %v6810_v2, %v4665_v6  ;;  %v4677_v56 = vmul.f32 %v6810_v2, %v4666_v26  ;;  %v4678_v4 = vmul.f32 %v6810_v2, %v4667_v11  ;;  %v4679_v51 = vmul.f32 %v6810_v2, %v4668_v41  ;;  %v7245_v2 = vld [vmem:[%s7947_s1 + $0x58] sm:$0xff]   ;;  %v7247_v26 = vld [vmem:[%s7947_s1 + $0x60] sm:$0xff]   ;;  %v7249_v41 = vld [vmem:[%s7947_s1 + $0x68] sm:$0xff]  }
 0x839   : > { %v7246_v6 = vld [vmem:[%s7947_s1 + $0x18] sm:$0xff]   ;;  %v7248_v11 = vld [vmem:[%s7947_s1 + $0x20] sm:$0xff]  }
 0x83a   : > { %v8886_v53 = vadd.f32 %v6811_v57, %v4677_v56  ;;  %v8888_v33 = vadd.f32 %v6811_v57, %v4678_v4  ;;  %v8890_v44 = vadd.f32 %v6811_v57, %v4679_v51  ;;  %v8892_v14 = vadd.f32 %v6811_v57, %v4676_v55  ;;  %v7250_v57 = vld [vmem:[%s7947_s1 + $0x28] sm:$0xff]   ;;  %v7251_v55 = vld [vmem:[%s7947_s1 + $0x70] sm:$0xff]   ;;  %v7253_v4 = vld [vmem:[%s7947_s1 + $0x78] sm:$0xff]  }
 0x83b   : > { %v7252_v56 = vld [vmem:[%s7947_s1 + $0x30] sm:$0xff]   ;;  %v7254_v51 = vld [vmem:[%s7947_s1 + $0x38] sm:$0xff]  }
 0x83c   : > { %v6812_v3 = vpack.c.bf16 %v8886_v53, %v8886_v53  ;;  %v4691_v52 = vpack.c.bf16 %v8886_v53, %v8892_v14  ;;  %v4692_v49 = vpack.c.bf16 %v8890_v44, %v8888_v33  ;;  %v6813_v21 = vpack.c.bf16 %v8890_v44, %v8890_v44 }
 0x83e   : > { %v4728_v24 = vrot.slane %v4691_v52, %v8023_v60  ;;  %v4735_v27 = vrot.slane %v6812_v3, %v8023_v60  ;;  %v4767_v54 = vrot.slane %v4692_v49, %v8023_v60  ;;  %v4774_v39 = vrot.slane %v6813_v21, %v8023_v60  ;;  %v4709_v49 = vld [vmem:[%s7925_s29] sm:$0x3] }
 0x83f   : > { %v4713_v3 = vsub.s32 0, %v8006_v46  ;;  %v4717_v52 = vsub.s32 1, %v8006_v46 }
 0x840   : > { %v4736_v50 = vcombine.high %v4728_v24, %v4728_v24  ;;  %v4775_v63 = vcombine.high %v4767_v54, %v4767_v54  ;;  %v4750_v58 = vrot.slane %v4735_v27, %v8023_v60  ;;  %v4782_v59 = vrot.slane %v4767_v54, %v8023_v60 }
 0x841   : > { %v4743_v5 = vrot.slane %v4728_v24, %v8023_v60  ;;  %v4789_v29 = vrot.slane %v4774_v39, %v8023_v60  ;;  %v4714_v24 = vrot.slane %v4709_v49, %v4713_v3  ;;  %v4718_v27 = vrot.slane %v4709_v49, %v4717_v52 }
 0x842   : > { %v4757_v62 = vrot.slane %v4736_v50, %v8023_v60  ;;  %v4796_v38 = vrot.slane %v4775_v63, %v8023_v60  ;;  %v4797_v12 = vcombine.high %v4782_v59, %v4782_v59  ;;  %v4809_v48 = vunpack.i.h.s16 %v4782_v59 }
 0x843   : > { %v6814_v22 = vpack.i.b16 %v4782_v59, %v4750_v58  ;;  %v4817_v54 = vcombine.low %v4714_v24, %v4718_v27  ;;  %v4818_v50 = vcombine.high %v4714_v24, %v4718_v27 }
 0x844   : > { %v4798_v61 = vcombine.high %v4796_v38, %v4796_v38  ;;  %v4811_v1 = vunpack.i.h.s16 %v4796_v38  ;;  %v4876_v42 = vcombine.low %v4743_v5, %v4757_v62  ;;  %v6819_v16 = vcombine.high %v4743_v5, %v4757_v62 }
 0x845   : > { %v4813_v0 = vunpack.i.h.s16 %v4797_v12  ;;  %v6815_v13 = vpack.i.b16 %v4796_v38, %v4809_v48  ;;  %v4825_v63 = vrot.slane %v4817_v54, %v8023_v60  ;;  %v4832_v58 = vrot.slane %v4818_v50, %v8023_v60 }
 0x846   : > { %v6816_v40 = vpack.i.b16 %v4797_v12, %v4811_v1  ;;  %v4886_v31 = vrot.slane %v4876_v42, %v8023_v60  ;;  %v4893_v47 = vrot.slane %v6819_v16, %v8023_v60  ;;  %v4815_v25 = vunpack.i.h.s16 %v4798_v61 }
 0x847   : > { %v6817_v15 = vpack.i.b16 %v4798_v61, %v4813_v0  ;;  %v4878_v32 = vcombine.low %v6814_v22, %v6815_v13  ;;  %v4833_v59 = vcombine.high %v4825_v63, %v4825_v63  ;;  %v4834_v5 = vcombine.high %v4832_v58, %v4832_v58 }
 0x848   : > { %v4908_v20 = vcombine.low %v4886_v31, %v4893_v47  ;;  %v6818_v45 = vpack.i.b16 %v4789_v29, %v4815_v25  ;;  %v4841_v62 = vrot.slane %v4825_v63, %v8023_v60  ;;  %v4848_v38 = vrot.slane %v4832_v58, %v8023_v60 }
 0x849   : > { %v4879_v36 = vcombine.low %v6816_v40, %v6817_v15  ;;  %v4900_v28 = vrot.slane %v4878_v32, %v8023_v60  ;;  %v4855_v12 = vrot.slane %v4833_v59, %v8023_v60  ;;  %v4862_v48 = vrot.slane %v4834_v5, %v8023_v60 }
 0x84a   : > { %v4916_v34 = vrot.slane %v4908_v20, %v8023_v60  ;;  %v4931_v8 = vrot.slane %v6818_v45, %v8023_v60  ;;  %v4863_v46 = vcombine.high %v4841_v62, %v4841_v62  ;;  %v4864_v61 = vcombine.high %v4848_v38, %v4848_v38 }
 0x84b   : > { %v4907_v17 = vrot.slane %v4879_v36, %v8023_v60  ;;  %v4865_v1 = vcombine.high %v4855_v12, %v4855_v12  ;;  %v5021_v42 = vcombine.low %v4841_v62, %v4855_v12  ;;  %v6836_v16 = vcombine.high %v4841_v62, %v4855_v12 }
 0x84c   : > { %v4938_v18 = vrot.slane %v4931_v8, %v8023_v60  ;;  %v5023_v0 = vcombine.low %v4848_v38, %v4862_v48  ;;  %v6837_v22 = vcombine.high %v4848_v38, %v4862_v48  ;;  %v5087_v13 = vcombine.low %v4841_v62, %v4841_v62 }
 0x84d   : > { %v4909_v43 = vcombine.low %v4900_v28, %v4907_v17  ;;  %v5088_v40 = vcombine.low %v4855_v12, %v4863_v46  ;;  %v5089_v21 = vcombine.low %v4865_v1, %v4848_v38  ;;  %v5090_v15 = vcombine.low %v4862_v48, %v4864_v61 }
 0x84e   : > { %v5031_v32 = vrot.slane %v5021_v42, %v8023_v60  ;;  %v5038_v31 = vrot.slane %v6836_v16, %v8023_v60  ;;  %v5045_v47 = vrot.slane %v5023_v0, %v8023_v60  ;;  %v5052_v36 = vrot.slane %v6837_v22, %v8023_v60 }
 0x84f   : > { %v4923_v30 = vrot.slane %v4909_v43, %v8023_v60  ;;  %v5097_v28 = vrot.slane %v5087_v13, %v8023_v60  ;;  %v5104_v17 = vrot.slane %v5088_v40, %v8023_v60  ;;  %v5111_v20 = vrot.slane %v5089_v21, %v8023_v60 }
 0x850   : > { %v5118_v39 = vrot.slane %v5090_v15, %v8023_v60  ;;  %v5053_v43 = vcombine.low %v5031_v32, %v5038_v31  ;;  %v5055_v25 = vcombine.low %v5045_v47, %v5052_v36  ;;  %v4866_v49 = vcombine.high %v4862_v48, %v4862_v48 }
 0x851   : > { %v4924_v10 = vcombine.low %v4916_v34, %v4923_v30  ;;  %v5054_v34 = vcombine.high %v5031_v32, %v5038_v31  ;;  %v5056_v30 = vcombine.high %v5045_v47, %v5052_v36  ;;  %v5119_v29 = vcombine.low %v5097_v28, %v5104_v17 }
 0x852   : > { %v5120_v45 = vcombine.high %v5097_v28, %v5104_v17  ;;  %v5122_v8 = vcombine.high %v5111_v20, %v5118_v39  ;;  %v5077_v9 = vrot.slane %v5055_v25, %v8023_v60  ;;  %v5153_v5 = vcombine.low %v4866_v49, %v4841_v62 }
 0x853   : > { %5215 = vmatmul.mubr.bf16.vlgmr.msra.gmra.mrb[36].mxu1 %v4924_v10  ;;  %v5121_v10 = vcombine.low %v5111_v20, %v5118_v39  ;;  %v5070_v23 = vrot.slane %v5054_v34, %v8023_v60  ;;  %v5084_v37 = vrot.slane %v5056_v30, %v8023_v60  ;;  %v5129_v35 = vrot.slane %v5119_v29, %v8023_v60 }
 0x854   : > { %5224 = vmatprep.mubr.bf16.mxu1 %v7503_v19  ;;  %v7243_v19 = vld [vmem:[%s7947_s1 + $0x50] sm:$0xff]   ;;  %v5160_v32 = vrot.slane %v5153_v5, %v8023_v60 }
 0x855   : > { %6939 = vmatprep.subr.bf16.mxu0 %v7243_v19  ;;  %v5143_v19 = vrot.slane %v5121_v10, %v8023_v60 }
 0x856   : > { %6940 = vmatpush3.bf16.msra.mxu0 %v7244_v7  ;;  %v5136_v7 = vrot.slane %v5120_v45, %v8023_v60 }
 0x857   : > { %6941 = vmatprep.subr.bf16.mxu0 %v7245_v2  ;;  %v5150_v2 = vrot.slane %v5122_v8, %v8023_v60 }
 0x85a   : > { %6942 = vmatpush3.bf16.msra.mxu0 %v7246_v6 }
 0x85b   : > { %5225 = vmatmul.mubr.bf16.gmra.mrb[40].mxu1 %v4938_v18  ;;  %6943 = vmatprep.subr.bf16.mxu0 %v7247_v26  ;;  %v5063_v18 = vrot.slane %v5053_v43, %v8023_v60  ;;  %v5086_v26 = vcombine.low %v5070_v23, %v5084_v37 }
 0x85d   : > { %v5085_v6 = vcombine.low %v5063_v18, %v5077_v9  ;;  %v5161_v9 = vcombine.high %v5160_v32, %v5160_v32 }
 0x85e   : > { %6944 = vmatpush3.bf16.msra.mxu0 %v7248_v11  ;;  %v5151_v11 = vcombine.low %v5129_v35, %v5143_v19 }
 0x85f   : > { %6945 = vmatprep.subr.bf16.mxu0 %v7249_v41 }
 0x862   : > { %6946 = vmatpush3.bf16.msra.mxu0 %v7250_v57  ;;  %v5152_v57 = vcombine.low %v5136_v7, %v5150_v2 }
 0x863   : > { %6947 = vmatprep.subr.bf16.mxu0 %v7251_v55 }
 0x866   : > { %6948 = vmatpush3.bf16.msra.mxu0 %v7252_v56 }
 0x867   : > { %6949 = vmatprep.subr.bf16.mxu0 %v7253_v4 }
 0x86a   : > { %6950 = vmatpush3.bf16.msra.mxu0 %v7254_v51 }
 0x926   : > { %v5216_v41 = vpop.f32.mrb[36].mxu1 }
 0x927   : > { %v5217_v55 = vadd.f32 %v5216_v41, %v5085_v6  ;;  %v5218_v56 = vpop.f32.mrb[37].mxu1  ;;  %v5168_v6 = vrot.slane %v5160_v32, %v8023_v60 }
 0x928   : > { %v5219_v4 = vadd.f32 %v5218_v56, %v5086_v26  ;;  %v5220_v51 = vpop.f32.mrb[38].mxu1 }
 0x929   : > { %v5221_v3 = vadd.f32 %v5220_v51, %v5151_v11  ;;  %v5222_v52 = vpop.f32.mrb[39].mxu1 }
 0x92a   : > { %v5239_v24 = vcombine.low %v5217_v55, %v5219_v4  ;;  %v5240_v27 = vcombine.high %v5217_v55, %v5219_v4  ;;  %v5223_v54 = vadd.f32 %v5222_v52, %v5152_v57  ;;  %v5175_v4 = vrot.slane %v5161_v9, %v8023_v60 }
 0x92c   : > { %v5247_v50 = vrot.slane %v5239_v24, %v8023_v60  ;;  %v5254_v63 = vrot.slane %v5240_v27, %v8023_v60  ;;  %v5289_v58 = vcombine.low %v5221_v3, %v5223_v54  ;;  %v5290_v59 = vcombine.high %v5221_v3, %v5223_v54 }
 0x92e   : > { %v5255_v38 = vcombine.high %v5247_v50, %v5247_v50  ;;  %v5256_v12 = vcombine.high %v5254_v63, %v5254_v63  ;;  %v5263_v46 = vrot.slane %v5247_v50, %v8023_v60  ;;  %v5270_v61 = vrot.slane %v5254_v63, %v8023_v60  ;;  %v5226_v1 = vpop.f32.mrb[40].mxu1 }
 0x92f   : > { %v5297_v42 = vrot.slane %v5289_v58, %v8023_v60  ;;  %v5228_v48 = vpop.f32.mrb[41].mxu1  ;;  %v5304_v62 = vrot.slane %v5290_v59, %v8023_v60  ;;  %v5227_v54 = vadd.f32 %v5226_v1, %v5168_v6 }
 0x930   : > { %v5277_v16 = vrot.slane %v5255_v38, %v8023_v60  ;;  %v5284_v0 = vrot.slane %v5256_v12, %v8023_v60  ;;  %v5285_v22 = vcombine.high %v5263_v46, %v5263_v46  ;;  %v5286_v13 = vcombine.high %v5270_v61, %v5270_v61  ;;  %v5230_v40 = vpop.f32.mrb[42].mxu1 }
 0x931   : > { %v5380_v21 = vmax.f32 %v5263_v46, 0.0  ;;  %v5305_v15 = vcombine.high %v5297_v42, %v5297_v42  ;;  %v5231_v31 = vpop.f32.mrb[43].mxu1  ;;  %v5384_v17 = vmax.f32 %v5270_v61, 0.0  ;;  %v5313_v25 = vrot.slane %v5297_v42, %v8023_v60 }
 0x932   : > { %v5287_v47 = vcombine.high %v5277_v16, %v5277_v16  ;;  %v5288_v36 = vcombine.high %v5284_v0, %v5284_v0  ;;  %v5381_v28 = vmax.f32 %v5277_v16, 0.0  ;;  %v5382_v20 = vmax.f32 %v5285_v22, 0.0 }
 0x933   : > { %v5385_v39 = vmax.f32 %v5284_v0, 0.0  ;;  %v5386_v43 = vmax.f32 %v5286_v13, 0.0  ;;  %v5327_v10 = vrot.slane %v5305_v15, %v8023_v60  ;;  %v5320_v8 = vrot.slane %v5304_v62, %v8023_v60 }
 0x934   : > { %v5383_v34 = vmax.f32 %v5287_v47, 0.0  ;;  %v5387_v30 = vmax.f32 %v5288_v36, 0.0  ;;  %v5416_v29 = vcombine.low %v5380_v21, %v5381_v28  ;;  %v5335_v18 = vcombine.high %v5313_v25, %v5313_v25 }
 0x935   : > { %v5418_v45 = vcombine.low %v5384_v17, %v5385_v39  ;;  %v5337_v35 = vcombine.high %v5327_v10, %v5327_v10  ;;  %v5389_v2 = vmax.f32 %v5327_v10, 0.0  ;;  %v5306_v55 = vcombine.high %v5304_v62, %v5304_v62 }
 0x936   : > { %v5417_v23 = vcombine.low %v5382_v20, %v5383_v34  ;;  %v5419_v37 = vcombine.low %v5386_v43, %v5387_v30  ;;  %v5426_v19 = vrot.slane %v5416_v29, %v8023_v60  ;;  %v5390_v41 = vmax.f32 %v5335_v18, 0.0 }
 0x937   : > { %v5440_v7 = vrot.slane %v5418_v45, %v8023_v60  ;;  %v5391_v57 = vmax.f32 %v5337_v35, 0.0  ;;  %v5392_v56 = vmax.f32 %v5320_v8, 0.0  ;;  %v5334_v5 = vrot.slane %v5306_v55, %v8023_v60 }
 0x938   : > { %v5433_v26 = vrot.slane %v5417_v23, %v8023_v60  ;;  %v5447_v11 = vrot.slane %v5419_v37, %v8023_v60  ;;  %v5504_v24 = vcombine.low %v5389_v2, %v5390_v41  ;;  %v5388_v38 = vmax.f32 %v5313_v25, 0.0 }
 0x939   : > { %v5505_v27 = vcombine.low %v5391_v57, %v5392_v56  ;;  %v5336_v16 = vcombine.high %v5320_v8, %v5320_v8  ;;  %v5229_v0 = vadd.f32 %v5228_v48, %v5175_v4  ;;  %v5338_v62 = vcombine.high %v5334_v5, %v5334_v5 }
 0x93a   : > { %v5448_v51 = vcombine.low %v5426_v19, %v5433_v26  ;;  %v5449_v3 = vcombine.high %v5426_v19, %v5433_v26  ;;  %v5450_v52 = vcombine.low %v5440_v7, %v5447_v11  ;;  %v5451_v49 = vcombine.high %v5440_v7, %v5447_v11 }
 0x93b   : > { %v5514_v12 = vrot.slane %v5504_v24, %v8023_v60  ;;  %v5521_v46 = vrot.slane %v5505_v27, %v8023_v60  ;;  %v5339_v13 = vcombine.low %v5227_v54, %v5229_v0  ;;  %v5488_v21 = vrot.slane %v5388_v38, %v8023_v60 }
 0x93c   : > { %v5458_v50 = vrot.slane %v5448_v51, %v8023_v60  ;;  %v5465_v63 = vrot.slane %v5449_v3, %v8023_v60  ;;  %v5472_v58 = vrot.slane %v5450_v52, %v8023_v60  ;;  %v5479_v59 = vrot.slane %v5451_v49, %v8023_v60 }
 0x93d   : > { %v5536_v1 = vcombine.low %v5514_v12, %v5521_v46  ;;  %v5537_v22 = vcombine.high %v5514_v12, %v5521_v46  ;;  %v5393_v15 = vmax.f32 %v5334_v5, 0.0  ;;  %v5394_v32 = vmax.f32 %v5336_v16, 0.0 }
 0x93e   : > { %v5480_v61 = vcombine.low %v5458_v50, %v5472_v58  ;;  %v5481_v42 = vcombine.low %v5465_v63, %v5479_v59  ;;  %v5346_v31 = vrot.slane %v5339_v13, %v8023_v60  ;;  %v5489_v28 = vcombine.high %v5488_v21, %v5488_v21 }
 0x93f   : > { %v5506_v17 = vcombine.low %v5393_v15, %v5394_v32  ;;  %v5395_v39 = vmax.f32 %v5338_v62, 0.0  ;;  %v5496_v45 = vrot.slane %v5488_v21, %v8023_v60  ;;  %v5546_v35 = vrot.slane %v5536_v1, %v8023_v60 }
 0x940   : > { %v6839_v40 = vpack.c.bf16 %v5481_v42, %v5480_v61  ;;  %v5347_v47 = vcombine.high %v5346_v31, %v5346_v31  ;;  %v5354_v36 = vrot.slane %v5346_v31, %v8023_v60  ;;  %v5503_v34 = vrot.slane %v5489_v28, %v8023_v60 }
 0x941   : > { %v5528_v30 = vrot.slane %v5506_v17, %v8023_v60  ;;  %v5553_v19 = vrot.slane %v5537_v22, %v8023_v60 }
 0x942   : > { %v5361_v20 = vrot.slane %v5347_v47, %v8023_v60  ;;  %v5396_v48 = vmax.f32 %v5354_v36, 0.0  ;;  %v5654_v8 = vrot.slane %v6839_v40, %v8023_v60  ;;  %v6840_v37 = vpack.c.bf16 %v5503_v34, %v5496_v45 }
 0x944   : > { %v5397_v43 = vmax.f32 %v5361_v20, 0.0  ;;  %v5507_v25 = vcombine.low %v5395_v39, %v5396_v48  ;;  %v5662_v26 = vcombine.high %v5654_v8, %v5654_v8  ;;  %v5661_v55 = vrot.slane %v6840_v37, %v8023_v60 }
 0x945   : > { %v5669_v52 = vrot.slane %v5654_v8, %v8023_v60  ;;  %v6838_v8 = vld [vmem:[%s966_s4] ss:$0 sm:$0xff] }
 0x946   : > { %v5535_v29 = vrot.slane %v5507_v25, %v8023_v60  ;;  %v5576_v10 = vrot.slane %v5397_v43, %v8023_v60  ;;  %v5683_v51 = vrot.slane %v5662_v26, %v8023_v60  ;;  %v5676_v49 = vrot.slane %v5661_v55, %v8023_v60 }
 0x948   : > { %v5538_v18 = vcombine.low %v5528_v30, %v5535_v29  ;;  %v5539_v9 = vcombine.high %v5528_v30, %v5535_v29  ;;  %v5577_v23 = vcombine.high %v5576_v10, %v5576_v10  ;;  %v5584_v57 = vrot.slane %v5576_v10, %v8023_v60 }
 0x949   : > { %v5802_v54 = vcombine.low %v5669_v52, %v5683_v51  ;;  %v6848_v50 = vcombine.high %v5669_v52, %v5683_v51 }
 0x94a   : > { %v5560_v7 = vrot.slane %v5538_v18, %v8023_v60  ;;  %v5567_v2 = vrot.slane %v5539_v9, %v8023_v60  ;;  %v5591_v6 = vrot.slane %v5577_v23, %v8023_v60  ;;  %v5744_v18 = vcombine.high %v6838_v8, %v6838_v8 }
 0x94b   : > { %v5812_v16 = vrot.slane %v5802_v54, %v8023_v60  ;;  %v5819_v0 = vrot.slane %v6848_v50, %v8023_v60  ;;  %v5751_v9 = vrot.slane %v6838_v8, %v8023_v60 }
 0x94c   : > { %v5568_v11 = vcombine.low %v5546_v35, %v5560_v7  ;;  %v5569_v41 = vcombine.low %v5553_v19, %v5567_v2  ;;  %v6842_v4 = vpack.c.bf16 %v5591_v6, %v5584_v57  ;;  %v5758_v23 = vrot.slane %v5744_v18, %v8023_v60 }
 0x94d   : > { %v5835_v32 = vcombine.high %v5812_v16, %v5819_v0  ;;  %v5834_v36 = vcombine.low %v5812_v16, %v5819_v0  ;;  %v5759_v37 = vcombine.high %v5751_v9, %v5751_v9  ;;  %v5767_v19 = vrot.slane %v5751_v9, %v8023_v60 }
 0x94e   : > { %v6841_v56 = vpack.c.bf16 %v5569_v41, %v5568_v11  ;;  %v5701_v63 = vrot.slane %v6842_v4, %v8023_v60  ;;  %v5760_v35 = vcombine.high %v5758_v23, %v5758_v23  ;;  %v5774_v7 = vrot.slane %v5758_v23, %v8023_v60 }
 0x94f   : > { %v5851_v39 = vrot.slane %v5835_v32, %v8023_v60  ;;  %v5844_v43 = vrot.slane %v5834_v36, %v8023_v60  ;;  %v5781_v2 = vrot.slane %v5759_v37, %v8023_v60  ;;  %v5789_v26 = vcombine.high %v5767_v19, %v5767_v19 }
 0x950   : > { %v5694_v3 = vrot.slane %v6841_v56, %v8023_v60  ;;  %v5716_v1 = vrot.slane %v5701_v63, %v8023_v60  ;;  %v5788_v6 = vrot.slane %v5760_v35, %v8023_v60  ;;  %v5790_v11 = vcombine.high %v5774_v7, %v5774_v7 }
 0x951   : > { %v5791_v41 = vcombine.high %v5781_v2, %v5781_v2  ;;  %v5990_v57 = vcombine.low %v5767_v19, %v5781_v2  ;;  %v6865_v55 = vcombine.high %v5767_v19, %v5781_v2  ;;  %v6039_v51 = vcombine.low %v5767_v19, %v5767_v19 }
 0x952   : > { %v5702_v24 = vcombine.high %v5694_v3, %v5694_v3  ;;  %v5709_v27 = vrot.slane %v5694_v3, %v8023_v60  ;;  %v5992_v56 = vcombine.low %v5774_v7, %v5788_v6  ;;  %v6866_v4 = vcombine.high %v5774_v7, %v5788_v6 }
 0x953   : > { %v6040_v3 = vcombine.low %v5781_v2, %v5789_v26  ;;  %v6041_v52 = vcombine.low %v5791_v41, %v5774_v7  ;;  %v6049_v63 = vrot.slane %v6039_v51, %v8023_v60 }
 0x954   : > { %v5723_v58 = vrot.slane %v5702_v24, %v8023_v60  ;;  %v5724_v59 = vcombine.high %v5709_v27, %v5709_v27  ;;  %v5736_v5 = vunpack.i.h.s16 %v5709_v27  ;;  %v6843_v38 = vpack.i.b16 %v5709_v27, %v5676_v49 }
 0x955   : > { %v6042_v49 = vcombine.low %v5788_v6, %v5790_v11  ;;  %v6000_v24 = vrot.slane %v5990_v57, %v8023_v60  ;;  %v6007_v27 = vrot.slane %v6865_v55, %v8023_v60  ;;  %v6014_v54 = vrot.slane %v5992_v56, %v8023_v60 }
 0x956   : > { %v5725_v12 = vcombine.high %v5723_v58, %v5723_v58  ;;  %v5738_v46 = vunpack.i.h.s16 %v5723_v58  ;;  %v5740_v61 = vunpack.i.h.s16 %v5724_v59  ;;  %v6844_v42 = vpack.i.b16 %v5723_v58, %v5736_v5 }
 0x957   : > { %v6021_v50 = vrot.slane %v6866_v4, %v8023_v60  ;;  %v6056_v58 = vrot.slane %v6040_v3, %v8023_v60  ;;  %v6070_v5 = vrot.slane %v6042_v49, %v8023_v60 }
 0x958   : > { %v6845_v22 = vpack.i.b16 %v5724_v59, %v5738_v46  ;;  %v6846_v13 = vpack.i.b16 %v5725_v12, %v5740_v61  ;;  %v5804_v40 = vcombine.low %v6843_v38, %v6844_v42  ;;  %v5742_v21 = vunpack.i.h.s16 %v5725_v12 }
 0x959   : > { %v6063_v59 = vrot.slane %v6041_v52, %v8023_v60  ;;  %v6022_v38 = vcombine.low %v6000_v24, %v6007_v27  ;;  %v6023_v12 = vcombine.low %v6014_v54, %v6021_v50  ;;  %v6071_v46 = vcombine.low %v6049_v63, %v6056_v58 }
 0x95a   : > { %v5805_v62 = vcombine.low %v6845_v22, %v6846_v13  ;;  %v6847_v15 = vpack.i.b16 %v5716_v1, %v5742_v21  ;;  %v5826_v31 = vrot.slane %v5804_v40, %v8023_v60  ;;  %v5792_v21 = vcombine.high %v5788_v6, %v5788_v6 }
 0x95b   : > { %v6072_v61 = vcombine.low %v6063_v59, %v6070_v5  ;;  %v6030_v42 = vrot.slane %v6022_v38, %v8023_v60  ;;  %v6037_v16 = vrot.slane %v6023_v12, %v8023_v60  ;;  %v6079_v0 = vrot.slane %v6071_v46, %v8023_v60 }
 0x95c   : > { %v5833_v47 = vrot.slane %v5805_v62, %v8023_v60  ;;  %v5874_v28 = vrot.slane %v6847_v15, %v8023_v60 }
 0x95d   : > { %v6086_v1 = vrot.slane %v6072_v61, %v8023_v60  ;;  %v6038_v13 = vcombine.low %v6030_v42, %v6037_v16 }
 0x95e   : > { %v5837_v17 = vcombine.high %v5826_v31, %v5833_v47  ;;  %v5836_v20 = vcombine.low %v5826_v31, %v5833_v47  ;;  %v5875_v34 = vcombine.high %v5874_v28, %v5874_v28  ;;  %v5882_v45 = vrot.slane %v5874_v28, %v8023_v60 }
 0x95f   : > { %v6087_v32 = vcombine.low %v6079_v0, %v6086_v1  ;;  %v6088_v28 = vcombine.low %v5792_v21, %v5767_v19 }
 0x960   : > { %v5865_v48 = vrot.slane %v5837_v17, %v8023_v60  ;;  %v5858_v25 = vrot.slane %v5836_v20, %v8023_v60  ;;  %v5889_v10 = vrot.slane %v5875_v34, %v8023_v60 }
 0x962   : > { %v5867_v30 = vcombine.low %v5851_v39, %v5865_v48  ;;  %v5866_v29 = vcombine.low %v5844_v43, %v5858_v25 }
 0x964   : > { %6138 = vmatprep.mubr.bf16.mxu0 %v5867_v30 }
 0x965   : > { %6139 = vmatmul.mubr.bf16.vlgmr.msra.gmra.mrb[12].mxu0 %v5866_v29  ;;  %v6095_v29 = vrot.slane %v6088_v28, %v8023_v60 }
 0x966   : > { %6146 = vmatprep.mubr.bf16.mxu0 %v5889_v10 }
 0x967   : > { %v6102_v4 = vrot.slane %v6095_v29, %v8023_v60 }
 0x96d   : > { %6147 = vmatmul.mubr.bf16.gmra.mrb[16].mxu0 %v5882_v45 }
 0xa38   : > { %v6951_v22 = vpop.f32.mrb[12].mxu0 }
 0xa39   : > { %v6952_v40 = vpop.f32.mrb[13].mxu0 }
 0xa3a   : > { %v6953_v62 = vadd.f32 %v6952_v40, %v6951_v22  ;;  %v6954_v15 = vpop.f32.mrb[14].mxu0 }
 0xa3b   : > { %v6955_v31 = vpop.f32.mrb[15].mxu0 }
 0xa3c   : > { %v6141_v47 = vadd.f32 %v6953_v62, %v6038_v13  ;;  %v6956_v36 = vadd.f32 %v6955_v31, %v6954_v15 }
 0xa3e   : > { %v6157_v17 = vcombine.high %v6141_v47, %v6141_v47  ;;  %v6164_v20 = vrot.slane %v6141_v47, %v8023_v60  ;;  %v6144_v39 = vadd.f32 %v6956_v36, %v6087_v32 }
 0xa40   : > { %v6171_v48 = vrot.slane %v6157_v17, %v8023_v60  ;;  %v6172_v43 = vcombine.high %v6164_v20, %v6164_v20  ;;  %v6206_v25 = vcombine.high %v6144_v39, %v6144_v39  ;;  %v6957_v34 = vpop.f32.mrb[16].mxu0  ;;  %v6213_v30 = vrot.slane %v6144_v39, %v8023_v60 }
 0xa41   : > { %v6958_v10 = vpop.f32.mrb[17].mxu0  ;;  %v6180_v8 = vrot.slane %v6164_v20, %v8023_v60 }
 0xa42   : > { %v6173_v45 = vcombine.high %v6171_v48, %v6171_v48  ;;  %v6194_v18 = vrot.slane %v6172_v43, %v8023_v60  ;;  %v6220_v9 = vrot.slane %v6206_v25, %v8023_v60  ;;  %v6960_v23 = vpop.f32.mrb[18].mxu0  ;;  %v6187_v37 = vrot.slane %v6171_v48, %v8023_v60 }
 0xa43   : > { %v6221_v35 = vcombine.high %v6213_v30, %v6213_v30  ;;  %v6229_v19 = vrot.slane %v6213_v30, %v8023_v60  ;;  %v6959_v7 = vadd.f32 %v6958_v10, %v6957_v34  ;;  %v6961_v2 = vpop.f32.mrb[19].mxu0 }
 0xa44   : > { %v6201_v6 = vrot.slane %v6173_v45, %v8023_v60  ;;  %v6277_v26 = vcombine.low %v6180_v8, %v6194_v18  ;;  %v6867_v11 = vcombine.high %v6180_v8, %v6194_v18  ;;  %v6222_v41 = vcombine.high %v6220_v9, %v6220_v9 }
 0xa45   : > { %v6236_v57 = vrot.slane %v6220_v9, %v8023_v60  ;;  %v6243_v55 = vrot.slane %v6221_v35, %v8023_v60  ;;  %v6332_v56 = vrot.slane %v6229_v19, %v8023_v60  ;;  %v6251_v27 = vcombine.high %v6229_v19, %v6229_v19 }
 0xa46   : > { %v6279_v51 = vcombine.low %v6187_v37, %v6201_v6  ;;  %v6868_v3 = vcombine.high %v6187_v37, %v6201_v6  ;;  %v6287_v52 = vrot.slane %v6277_v26, %v8023_v60  ;;  %v6294_v49 = vrot.slane %v6867_v11, %v8023_v60 }
 0xa47   : > { %v6250_v24 = vrot.slane %v6222_v41, %v8023_v60  ;;  %v6253_v54 = vcombine.high %v6243_v55, %v6243_v55  ;;  %v6339_v59 = vrot.slane %v6332_v56, %v8023_v60  ;;  %v6252_v5 = vcombine.high %v6236_v57, %v6236_v57 }
 0xa48   : > { %v6301_v50 = vrot.slane %v6279_v51, %v8023_v60  ;;  %v6308_v63 = vrot.slane %v6868_v3, %v8023_v60  ;;  %v6309_v58 = vcombine.low %v6287_v52, %v6294_v49  ;;  %v6149_v12 = vadd.f32 %v6959_v7, %v6102_v4 }
 0xa49   : > { %v6341_v38 = vcombine.low %v6253_v54, %v6236_v57  ;;  %v6340_v61 = vcombine.low %v6243_v55, %v6251_v27  ;;  %v6254_v42 = vcombine.high %v6250_v24, %v6250_v24  ;;  %v6408_v22 = vadd.f32 %v6339_v59, %v8886_v53 }
 0xa4a   : > { %v6310_v46 = vcombine.low %v6301_v50, %v6308_v63  ;;  %v6261_v16 = vrot.slane %v6149_v12, %v8023_v60  ;;  %v6317_v0 = vrot.slane %v6309_v58, %v8023_v60  ;;  %v6342_v13 = vcombine.low %v6250_v24, %v6252_v5  ;;  %v6869_v5 = vld [vmem:[%s975_s27] ss:$0 sm:$0xff] }
 0xa4b   : > { %v6357_v40 = vrot.slane %v6341_v38, %v8023_v60  ;;  %v6350_v32 = vrot.slane %v6340_v61, %v8023_v60  ;;  %v6411_v28 = vsel %vm4629_vm8, %v6408_v22, 0.0 }
 0xa4c   : > { %v6324_v1 = vrot.slane %v6310_v46, %v8023_v60  ;;  %v6262_v21 = vcombine.high %v6261_v16, %v6261_v16  ;;  %v6269_v62 = vrot.slane %v6261_v16, %v8023_v60  ;;  %v6364_v20 = vrot.slane %v6342_v13, %v8023_v60 }
 0xa4d   : > { %v6372_v17 = vcombine.low %v6350_v32, %v6357_v40 }
 0xa4e   : > { %v6325_v15 = vcombine.low %v6317_v0, %v6324_v1  ;;  %v6276_v31 = vrot.slane %v6262_v21, %v8023_v60  ;;  %v6343_v47 = vcombine.low %v6254_v42, %v6269_v62  ;;  %v6870_v42 = vld [vmem:[%s978_s30] ss:$0 sm:$0xff] }
 0xa4f   : > { %v6380_v34 = vrot.slane %v6372_v17, %v8023_v60 }
 0xa50   : > { %v6407_v36 = vadd.f32 %v6325_v15, %v8892_v14  ;;  %v6371_v53 = vrot.slane %v6343_v47, %v8023_v60  ;;  %v6395_v39 = vrot.slane %v6276_v31, %v8023_v60 }
 0xa52   : > { %v6412_v48 = vadd.f32 %v6411_v28, %v6407_v36  ;;  %v6373_v43 = vcombine.low %v6364_v20, %v6371_v53  ;;  %v6402_v25 = vrot.slane %v6395_v39, %v8023_v60 }
 0xa54   : > { %v6387_v30 = vrot.slane %v6373_v43, %v8023_v60  ;;  %v6410_v14 = vadd.f32 %v6402_v25, %v8890_v44 }
 0xa56   : > { %v6388_v29 = vcombine.low %v6380_v34, %v6387_v30  ;;  %v6414_v8 = vsel %vm4629_vm8, %v6410_v14, 0.0 }
 0xa58   : > { %v6409_v10 = vadd.f32 %v6388_v29, %v8888_v33 }
 0xa5a   : > { %v6413_v45 = vadd.f32 %v6412_v48, %v6409_v10 }
 0xa5c   : > { %v6415_v18 = vadd.f32 %v6414_v8, %v6413_v45 }
 0xa5e   : > { %v6416_v9 = vrot.slane %v6415_v18, 4 }
 0xa60   : > { %v6417_v23 = vadd.f32 %v6416_v9, %v6415_v18 }
 0xa62   : > { %v6418_v37 = vrot.slane %v6417_v23, 2 }
 0xa64   : > { %v6419_v35 = vadd.f32 %v6418_v37, %v6417_v23 }
 0xa66   : > { %v6420_v19 = vrot.slane %v6419_v35, 1 }
 0xa68   : > { %v6421_v7 = vadd.f32 %v6420_v19, %v6419_v35 }
 0xa6a   : > { %v6422_v2 = vmul.f32 0.055555556, %v6421_v7 }
 0xa6c   : > { %v6423_v6 = vsub.f32 %v6407_v36, %v6422_v2  ;;  %v6424_v26 = vsub.f32 %v6408_v22, %v6422_v2  ;;  %v6425_v11 = vsub.f32 %v6409_v10, %v6422_v2  ;;  %v6426_v60 = vsub.f32 %v6410_v14, %v6422_v2 }
 0xa6e   : > { %v6427_v41 = vmul.f32 %v6423_v6, %v6423_v6  ;;  %v6428_v57 = vmul.f32 %v6424_v26, %v6424_v26  ;;  %v6430_v44 = vmul.f32 %v6426_v60, %v6426_v60  ;;  %v6429_v55 = vmul.f32 %v6425_v11, %v6425_v11 }
 0xa70   : > { %v6431_v33 = vsel %vm4629_vm8, %v6428_v57, 0.0  ;;  %v6434_v51 = vsel %vm4629_vm8, %v6430_v44, 0.0 }
 0xa71   : > { %v6432_v56 = vadd.f32 %v6431_v33, %v6427_v41 }
 0xa73   : > { %v6433_v4 = vadd.f32 %v6432_v56, %v6429_v55 }
 0xa75   : > { %v6435_v3 = vadd.f32 %v6434_v51, %v6433_v4 }
 0xa77   : > { %v6436_v52 = vrot.slane %v6435_v3, 4 }
 0xa79   : > { %v6437_v49 = vadd.f32 %v6436_v52, %v6435_v3 }
 0xa7b   : > { %v6438_v24 = vrot.slane %v6437_v49, 2 }
 0xa7d   : > { %v6439_v27 = vadd.f32 %v6438_v24, %v6437_v49 }
 0xa7f   : > { %v6440_v54 = vrot.slane %v6439_v27, 1 }
 0xa81   : > { %v6441_v50 = vadd.f32 %v6440_v54, %v6439_v27 }
 0xa83   : > { %v6442_v63 = vmul.f32 0.055555556, %v6441_v50 }
 0xa85   : > { %v6443_v58 = vadd.f32 1e-05, %v6442_v63 }
 0xa87   : > { %7289 = vrsqrt.f32 %v6443_v58 }
 0xa91   : > { %v7290_v59 = vpop.eup %7289 }
 0xa92   : > { %v6445_v38 = vmul.f32 %v7290_v59, %v6423_v6  ;;  %v6446_v12 = vmul.f32 %v7290_v59, %v6424_v26  ;;  %v6447_v46 = vmul.f32 %v7290_v59, %v6425_v11  ;;  %v6448_v61 = vmul.f32 %v7290_v59, %v6426_v60 }
 0xa94   : > { %v6456_v16 = vmul.f32 %v6869_v5, %v6445_v38  ;;  %v6457_v0 = vmul.f32 %v6869_v5, %v6446_v12  ;;  %v6458_v1 = vmul.f32 %v6869_v5, %v6447_v46  ;;  %v6459_v22 = vmul.f32 %v6869_v5, %v6448_v61 }
 0xa96   : > { %v6467_v13 = vadd.f32 %v6870_v42, %v6456_v16  ;;  %v6468_v40 = vadd.f32 %v6870_v42, %v6457_v0  ;;  %v6469_v21 = vadd.f32 %v6870_v42, %v6458_v1  ;;  %v6470_v62 = vadd.f32 %v6870_v42, %v6459_v22 }
 0xa98   : > { %6471 = vst [vmem:[%s9216_s15] sm:$0xff] %v6467_v13  ;;  %6472 = vst [vmem:[%s9216_s15 + $0x8] sm:$0x1] %v6468_v40 }
 0xa99   : > { %6473 = vst [vmem:[%s9216_s15 + $0x10] sm:$0xff] %v6469_v21  ;;  %6474 = vst [vmem:[%s9216_s15 + $0x18] sm:$0x1] %v6470_v62 }
 0xa9a PF: > { %s9229_s27 = sld [smem:[#allocation15_spill]]  ;;  %s9230_s2 = sld [smem:[#allocation13_spill]] }
 0xa9b   : > { %s9231_s25 = sld [smem:[#allocation14_spill]]  ;;  %s9232_s26 = sld [smem:[#allocation16_spill]] }
 0xaa0   : > { %p37_p13 = scmp.ge.s32.totalorder %s9229_s27, 4  }
 0xaa2   :  { %39 = sbr.rel (!%p37_p13) target bundleno = 27 (0x1b), region = 225 }
 0xaa9   :  { %6486 = vsyncpa [#allocation3], 1 }
 0xaaa   :  { %6488 = vsyncpa [#allocation3 + $0x1], 1 }
 0xaab   :  { %6489 = vsyncpa [#allocation5], 1 }
 0xaac   :  { %6491 = vsyncpa [#allocation5 + $0x1], 1 }
 0xaad   :  { %6492 = vsyncpa [#allocation8], 1 }
 0xaae   :  { %6494 = vsyncpa [#allocation8 + $0x1], 1 }

</bundles_post_ra>
